<compile_context>
chip_gen: v5e
topology: v5e:2x2
jax: 0.10.0
libtpu: 0.0.40
codegen_flags: <defaults>
</compile_context>

<pallas_src>
import functools

import jax
import jax.numpy as jnp
from jax import lax
from jax.experimental import pallas as pl
from jax.experimental.pallas import tpu as pltpu


ENC_DIM = 768   # Dinov2 hidden size (stand-in)
HID_DIM = 256   # projection hidden
EMB_DIM = 128   # embedding_size


def _pick_tile(n, candidates):
    for c in candidates:
        if n % c == 0:
            return c
    return n  # fall back to the full (un-tiled) dimension


# ---------------------------------------------------------------------------
# Kernel 1: retrieval-model embedding (tiled, bf16 MXU, f32 accumulator)
# ---------------------------------------------------------------------------
def embed_kernel(x_ref, wenc_ref, w1_ref, b1_ref, w2_ref, b2_ref, out_ref, acc_ref):
    k = pl.program_id(1)

    @pl.when(k == 0)
    def _():
        acc_ref[...] = jnp.zeros_like(acc_ref)

    # TODO(synk): the pretrained Dinov2 ('microsoft/rad-dino') CLS-token encoder cannot be
    # reproduced in-script; a single deterministic (C*H*W -> 768) linear is used as stand-in.
    acc_ref[...] += jnp.dot(x_ref[...], wenc_ref[...], preferred_element_type=jnp.float32)

    @pl.when(k == pl.num_programs(1) - 1)
    def _():
        # Projection head. Dropout(p=0.3) is treated as inference-mode identity.
        h = jnp.dot(acc_ref[...].astype(jnp.bfloat16), w1_ref[...],
                    preferred_element_type=jnp.float32) + b1_ref[...]
        h = jnp.maximum(h, 0.0).astype(jnp.bfloat16)
        out_ref[...] = jnp.dot(h, w2_ref[...],
                               preferred_element_type=jnp.float32) + b2_ref[...]


def _embed_tiled(x_bf16, params):
    M, K = x_bf16.shape
    tm = _pick_tile(M, (256, 128, 64, 32, 16, 8))
    tk = _pick_tile(K, (1024, 512, 256, 128))
    return pl.pallas_call(
        embed_kernel,
        out_shape=jax.ShapeDtypeStruct((M, EMB_DIM), jnp.float32),
        grid_spec=pltpu.PrefetchScalarGridSpec(
            num_scalar_prefetch=0,
            grid=(M // tm, K // tk),
            in_specs=[
                pl.BlockSpec((tm, tk), lambda i, k: (i, k)),
                pl.BlockSpec((tk, ENC_DIM), lambda i, k: (k, 0)),
                pl.BlockSpec((ENC_DIM, HID_DIM), lambda i, k: (0, 0)),
                pl.BlockSpec((1, HID_DIM), lambda i, k: (0, 0)),
                pl.BlockSpec((HID_DIM, EMB_DIM), lambda i, k: (0, 0)),
                pl.BlockSpec((1, EMB_DIM), lambda i, k: (0, 0)),
            ],
            out_specs=pl.BlockSpec((tm, EMB_DIM), lambda i, k: (i, 0)),
            scratch_shapes=[pltpu.VMEM((tm, ENC_DIM), jnp.float32)],
        ),
        compiler_params=pltpu.CompilerParams(
            dimension_semantics=("parallel", "arbitrary")),
    )(x_bf16, params["wenc"], params["w1"], params["b1"], params["w2"], params["b2"])


def embed(x_bf16, params):
    # Pad the row dimension to a multiple of 8 so every block is sublane-aligned.
    M = x_bf16.shape[0]
    pad = (-M) % 8
    if pad:
        x_bf16 = jnp.pad(x_bf16, ((0, pad), (0, 0)))
    out = _embed_tiled(x_bf16, params)
    return out[:M] if pad else out


# ---------------------------------------------------------------------------
# Kernel 2: cosine similarity + differentiable_top2 -> two indices per batch
# ---------------------------------------------------------------------------
def select_top2_kernel(q_ref, g_ref, n1_ref, n2_ref, idx_ref, *, inv_tau):
    q = q_ref[...]                 # (B, D) f32
    g = g_ref[...]                 # (B, N, D) f32
    B, N, _ = g.shape

    # F.cosine_similarity(dim=-1, eps=1e-8): reductions on the XLU, reciprocal on the EUP.
    dots = jnp.sum(q[:, None, :] * g, axis=-1)                      # (B, N)
    qn = jnp.sqrt(jnp.sum(q * q, axis=-1, keepdims=True))           # (B, 1)
    gn = jnp.sqrt(jnp.sum(g * g, axis=-1))                          # (B, N)
    denom = jnp.maximum(qn, 1e-8) * jnp.maximum(gn, 1e-8)
    sim = dots * pl.reciprocal(denom, approx=True)                  # (B, N)

    iota = lax.broadcasted_iota(jnp.int32, (B, N), 1)

    # gumbel_softmax(hard=True): forward value is the exact one-hot of the argmax,
    # so only the argmax index is needed downstream.
    # TODO(synk): straight-through gradient (one-hot fwd / soft bwd) not implemented; forward only.
    pert1 = (sim + n1_ref[...]) * inv_tau
    mx1 = jnp.max(pert1, axis=-1, keepdims=True)
    idx1 = jnp.min(jnp.where(pert1 >= mx1, iota, N), axis=-1, keepdims=True)   # (B, 1)

    masked = jnp.where(iota == idx1, -1e30, sim)                    # masked_similarity[-inf at idx1]
    pert2 = (masked + n2_ref[...]) * inv_tau
    mx2 = jnp.max(pert2, axis=-1, keepdims=True)
    idx2 = jnp.min(jnp.where(pert2 >= mx2, iota, N), axis=-1, keepdims=True)   # (B, 1)

    col = lax.broadcasted_iota(jnp.int32, (B, 2), 1)
    idx_ref[...] = jnp.where(col == 0, idx1, idx2)                  # (B, 2) int32


def select_top2(q_emb, gal_emb, noise1, noise2, tau=1.0):
    B, N, D = gal_emb.shape
    kernel = functools.partial(select_top2_kernel, inv_tau=float(1.0 / tau))
    return pl.pallas_call(
        kernel,
        out_shape=jax.ShapeDtypeStruct((B, 2), jnp.int32),
        grid=(1,),
        in_specs=[
            pl.BlockSpec((B, D), lambda i: (0, 0)),
            pl.BlockSpec((B, N, D), lambda i: (0, 0, 0)),
            pl.BlockSpec((B, N), lambda i: (0, 0)),
            pl.BlockSpec((B, N), lambda i: (0, 0)),
        ],
        out_specs=pl.BlockSpec((B, 2), lambda i: (0, 0)),
    )(q_emb, gal_emb, noise1, noise2)


# ---------------------------------------------------------------------------
# Kernel 3: one-hot-weighted einsums == gather of the selected rows
#           (scalar-prefetched indices drive the DMA; only 2 of N rows move)
# ---------------------------------------------------------------------------
def gather_combine_kernel(idx_ref, img_ref, msk_ref, img_out_ref, msk_out_ref):
    del idx_ref  # consumed only by the index_maps
    img_out_ref[...] = img_ref[...]
    msk_out_ref[...] = msk_ref[...]


def gather_combine(idx, gal_img, gal_msk):
    # gal_img: (B, N, C, H*W), gal_msk: (B, N, 1, H*W) in native dtypes, idx: (B, 2) int32
    B, N, C, HW = gal_img.shape
    grid_spec = pltpu.PrefetchScalarGridSpec(
        num_scalar_prefetch=1,
        grid=(B, 2),
        in_specs=[
            pl.BlockSpec((1, 1, C, HW), lambda b, s, idx_ref: (b, idx_ref[b, s], 0, 0)),
            pl.BlockSpec((1, 1, 1, HW), lambda b, s, idx_ref: (b, idx_ref[b, s], 0, 0)),
        ],
        out_specs=(
            pl.BlockSpec((1, 1, C, HW), lambda b, s, idx_ref: (b, s, 0, 0)),
            pl.BlockSpec((1, 1, 1, HW), lambda b, s, idx_ref: (b, s, 0, 0)),
        ),
    )
    return pl.pallas_call(
        gather_combine_kernel,
        out_shape=(
            jax.ShapeDtypeStruct((B, 2, C, HW), gal_img.dtype),
            jax.ShapeDtypeStruct((B, 2, 1, HW), gal_msk.dtype),
        ),
        grid_spec=grid_spec,
        compiler_params=pltpu.CompilerParams(
            dimension_semantics=("parallel", "parallel")),
    )(idx, gal_img, gal_msk)


# ---------------------------------------------------------------------------
# JointTrainingModule.forward (glue around the three Pallas kernels)
# ---------------------------------------------------------------------------
def joint_training_forward(params, query_image, gallery_images, gallery_masks, key, tau=1.0):
    B, N, C, H, W = gallery_images.shape
    CHW, HW = C * H * W, H * W

    # retrieval embeddings for query + gallery (bf16 data movement / MXU, f32 accumulation).
    # Two separate calls avoid materializing a concatenated (B*(N+1), CHW) array in HBM.
    q_emb = embed(query_image.reshape(B, CHW).astype(jnp.bfloat16), params)          # (B, 128)
    gal_emb = embed(gallery_images.reshape(B * N, CHW).astype(jnp.bfloat16),
                    params).reshape(B, N, EMB_DIM)                                   # (B, N, 128)

    # gumbel noise for the two hard gumbel-softmax draws in differentiable_top2
    k1, k2 = jax.random.split(key)
    noise1 = jax.random.gumbel(k1, (B, N), dtype=jnp.float32)
    noise2 = jax.random.gumbel(k2, (B, N), dtype=jnp.float32)

    idx = select_top2(q_emb, gal_emb, noise1, noise2, tau=tau)                        # (B, 2) int32

    # Gather only the 2 selected rows per batch element; keep native dtypes in the
    # kernel and apply the gallery_masks.half() rounding afterwards on the small
    # gathered result (torch einsum promotes the fp16 masks back to f32).
    gal_img = gallery_images.reshape(B, N, C, HW)
    gal_msk = gallery_masks.reshape(B, N, 1, HW)

    imgs, msks = gather_combine(idx, gal_img, gal_msk)   # (B, 2, C, HW), (B, 2, 1, HW)
    msks = msks.astype(jnp.float16).astype(jnp.float32)

    guide_image1 = imgs[:, 0].reshape(B, C, H, W)
    guide_image2 = imgs[:, 1].reshape(B, C, H, W)
    guide_mask1 = msks[:, 0].reshape(B, H, W)
    guide_mask2 = msks[:, 1].reshape(B, H, W)
    return guide_image1, guide_image2, guide_mask1, guide_mask2


def init_params(key, chw):
    ks = jax.random.split(key, 3)
    scale = 0.02
    return dict(
        wenc=(jax.random.normal(ks[0], (chw, ENC_DIM), jnp.float32) * scale).astype(jnp.bfloat16),
        w1=(jax.random.normal(ks[1], (ENC_DIM, HID_DIM), jnp.float32) * scale).astype(jnp.bfloat16),
        b1=jnp.zeros((1, HID_DIM), jnp.float32),
        w2=(jax.random.normal(ks[2], (HID_DIM, EMB_DIM), jnp.float32) * scale).astype(jnp.bfloat16),
        b2=jnp.zeros((1, EMB_DIM), jnp.float32),
    )


if __name__ == "__main__":
    key = jax.random.PRNGKey(0)
    kp, kq, kg, km, kn = jax.random.split(key, 5)

    # small shapes: batch=2, gallery size N=8, 3-channel 16x16 images, num_classes=4 masks
    B, N, C, H, W = 2, 8, 3, 16, 16
    query_image = jax.random.normal(kq, (B, C, H, W), jnp.float32)
    gallery_images = jax.random.normal(kg, (B, N, C, H, W), jnp.float32)
    gallery_masks = jax.random.randint(km, (B, N, H, W), 0, 4, dtype=jnp.int32)

    params = init_params(kp, C * H * W)

    fwd = jax.jit(functools.partial(joint_training_forward, tau=1.0))
    outs = fwd(params, query_image, gallery_images, gallery_masks, kn)
    outs = jax.block_until_ready(outs)

    g1, g2, gm1, gm2 = outs
    assert g1.shape == (B, C, H, W) and g2.shape == (B, C, H, W)
    assert gm1.shape == (B, H, W) and gm2.shape == (B, H, W)
    assert all(bool(jnp.all(jnp.isfinite(o))) for o in outs)
    # hard one-hot selection => each guide image is an exact copy of some gallery image
    for g in (g1, g2):
        d = jnp.abs(g[:, None] - gallery_images).max(axis=(2, 3, 4))   # (B, N)
        assert bool(jnp.all(d.min(axis=1) == 0.0))
    print("KERNEL_OK")
</pallas_src>

<mosaic_0001>
module attributes {stable_mosaic.version = 11 : i64} {
  func.func @embed_kernel(%arg0: i32, %arg1: i32, %arg2: memref<8x256xbf16, #tpu.memory_space<vmem>>, %arg3: memref<256x768xbf16, #tpu.memory_space<vmem>>, %arg4: memref<768x256xbf16, #tpu.memory_space<vmem>>, %arg5: memref<1x256xf32, #tpu.memory_space<vmem>>, %arg6: memref<256x128xbf16, #tpu.memory_space<vmem>>, %arg7: memref<1x128xf32, #tpu.memory_space<vmem>>, %arg8: memref<8x128xf32, #tpu.memory_space<vmem>>, %arg9: memref<8x768xf32, #tpu.memory_space<vmem>>) attributes {dimension_semantics = [#tpu.dimension_semantics<parallel>, #tpu.dimension_semantics<arbitrary>], iteration_bounds = array<i64: 1, 3>, scalar_prefetch = 0 : i64, scratch_operands = 1 : i64, tpu.core_type = #tpu.core_type<tc>, window_params = [{transform_indices = @transform_0, window_bounds = array<i64: 8, 256>}, {transform_indices = @transform_1, window_bounds = array<i64: 256, 768>}, {pipeline_mode = #tpu.pipeline_mode<synchronous>, transform_indices = @transform_2, window_bounds = array<i64: 768, 256>}, {pipeline_mode = #tpu.pipeline_mode<synchronous>, transform_indices = @transform_3, window_bounds = array<i64: 1, 256>}, {pipeline_mode = #tpu.pipeline_mode<synchronous>, transform_indices = @transform_4, window_bounds = array<i64: 256, 128>}, {pipeline_mode = #tpu.pipeline_mode<synchronous>, transform_indices = @transform_5, window_bounds = array<i64: 1, 128>}, {transform_indices = @transform_6, window_bounds = array<i64: 8, 128>}]} {
    %c0_i32 = arith.constant 0 : i32
    %0 = arith.cmpi eq, %arg1, %c0_i32 : i32
    %1 = arith.extui %0 : i1 to i32
    %c0_i32_0 = arith.constant 0 : i32
    %2 = arith.cmpi ne, %1, %c0_i32_0 : i32
    scf.if %2 {
      %cst_9 = arith.constant 0.000000e+00 : f32
      %12 = vector.broadcast %cst_9 : f32 to vector<8x768xf32>
      %c0_10 = arith.constant 0 : index
      %c0_11 = arith.constant 0 : index
      %13 = vector.load %arg9[%c0_10, %c0_11] : memref<8x768xf32, #tpu.memory_space<vmem>>, vector<8x768xf32>
      tpu.vector_store %arg9[%c0_10, %c0_11], %12 {strides = array<i32>} : memref<8x768xf32, #tpu.memory_space<vmem>>, vector<8x768xf32>,
    } else {
    }
    %c0 = arith.constant 0 : index
    %c0_1 = arith.constant 0 : index
    %3 = vector.load %arg9[%c0, %c0_1] : memref<8x768xf32, #tpu.memory_space<vmem>>, vector<8x768xf32>
    %c0_2 = arith.constant 0 : index
    %c0_3 = arith.constant 0 : index
    %4 = vector.load %arg2[%c0_2, %c0_3] : memref<8x256xbf16, #tpu.memory_space<vmem>>, vector<8x256xbf16>
    %c0_4 = arith.constant 0 : index
    %c0_5 = arith.constant 0 : index
    %5 = vector.load %arg3[%c0_4, %c0_5] : memref<256x768xbf16, #tpu.memory_space<vmem>>, vector<256x768xbf16>
    %cst = arith.constant dense<0.000000e+00> : vector<8x768xf32>
    %6 = tpu.matmul %4, %5, %cst {dimension_numbers = #tpu.dot_dimension_numbers<[1], [0], [0], [1], [0, 0, 1, 1], [], []>} : vector<8x256xbf16>, vector<256x768xbf16>, vector<8x768xf32> -> vector<8x768xf32>
    %7 = arith.addf %3, %6 : vector<8x768xf32>
    %c0_6 = arith.constant 0 : index
    %c0_7 = arith.constant 0 : index
    %8 = vector.load %arg9[%c0_6, %c0_7] : memref<8x768xf32, #tpu.memory_space<vmem>>, vector<8x768xf32>
    tpu.vector_store %arg9[%c0_6, %c0_7], %7 {strides = array<i32>} : memref<8x768xf32, #tpu.memory_space<vmem>>, vector<8x768xf32>,
    %c2_i32 = arith.constant 2 : i32
    %9 = arith.cmpi eq, %arg1, %c2_i32 : i32
    %10 = arith.extui %9 : i1 to i32
    %c0_i32_8 = arith.constant 0 : i32
    %11 = arith.cmpi ne, %10, %c0_i32_8 : i32
    scf.if %11 {
      %c0_9 = arith.constant 0 : index
      %c0_10 = arith.constant 0 : index
      %12 = vector.load %arg9[%c0_9, %c0_10] : memref<8x768xf32, #tpu.memory_space<vmem>>, vector<8x768xf32>
      %13 = arith.truncf %12 : vector<8x768xf32> to vector<8x768xbf16>
      %c0_11 = arith.constant 0 : index
      %c0_12 = arith.constant 0 : index
      %14 = vector.load %arg4[%c0_11, %c0_12] : memref<768x256xbf16, #tpu.memory_space<vmem>>, vector<768x256xbf16>
      %cst_13 = arith.constant dense<0.000000e+00> : vector<8x256xf32>
      %15 = tpu.matmul %13, %14, %cst_13 {dimension_numbers = #tpu.dot_dimension_numbers<[1], [0], [0], [1], [0, 0, 1, 1], [], []>} : vector<8x768xbf16>, vector<768x256xbf16>, vector<8x256xf32> -> vector<8x256xf32>
      %c0_14 = arith.constant 0 : index
      %c0_15 = arith.constant 0 : index
      %16 = vector.load %arg5[%c0_14, %c0_15] : memref<1x256xf32, #tpu.memory_space<vmem>>, vector<1x256xf32>
      %17 = vector.broadcast %16 : vector<1x256xf32> to vector<8x256xf32>
      %18 = arith.addf %15, %17 : vector<8x256xf32>
      %cst_16 = arith.constant 0.000000e+00 : f32
      %19 = vector.broadcast %cst_16 : f32 to vector<8x256xf32>
      %20 = arith.maximumf %18, %19 : vector<8x256xf32>
      %21 = arith.truncf %20 : vector<8x256xf32> to vector<8x256xbf16>
      %c0_17 = arith.constant 0 : index
      %c0_18 = arith.constant 0 : index
      %22 = vector.load %arg6[%c0_17, %c0_18] : memref<256x128xbf16, #tpu.memory_space<vmem>>, vector<256x128xbf16>
      %cst_19 = arith.constant dense<0.000000e+00> : vector<8x128xf32>
      %23 = tpu.matmul %21, %22, %cst_19 {dimension_numbers = #tpu.dot_dimension_numbers<[1], [0], [0], [1], [0, 0, 1, 1], [], []>} : vector<8x256xbf16>, vector<256x128xbf16>, vector<8x128xf32> -> vector<8x128xf32>
      %c0_20 = arith.constant 0 : index
      %c0_21 = arith.constant 0 : index
      %24 = vector.load %arg7[%c0_20, %c0_21] : memref<1x128xf32, #tpu.memory_space<vmem>>, vector<1x128xf32>
      %25 = vector.broadcast %24 : vector<1x128xf32> to vector<8x128xf32>
      %26 = arith.addf %23, %25 : vector<8x128xf32>
      %c0_22 = arith.constant 0 : index
      %c0_23 = arith.constant 0 : index
      %27 = vector.load %arg8[%c0_22, %c0_23] : memref<8x128xf32, #tpu.memory_space<vmem>>, vector<8x128xf32>
      tpu.vector_store %arg8[%c0_22, %c0_23], %26 {strides = array<i32>} : memref<8x128xf32, #tpu.memory_space<vmem>>, vector<8x128xf32>,
    } else {
    }
    return
  }
  func.func @transform_0(%arg0: i32, %arg1: i32) -> (i32, i32) {
    %c0_i32 = arith.constant 0 : i32
    return %arg0, %arg1 : i32, i32
  }
  func.func @transform_1(%arg0: i32, %arg1: i32) -> (i32, i32) {
    %c0_i32 = arith.constant 0 : i32
    %c0_i32_0 = arith.constant 0 : i32
    return %arg1, %c0_i32 : i32, i32
  }
  func.func @transform_2(%arg0: i32, %arg1: i32) -> (i32, i32) {
    %c0_i32 = arith.constant 0 : i32
    %c0_i32_0 = arith.constant 0 : i32
    %c0_i32_1 = arith.constant 0 : i32
    return %c0_i32, %c0_i32_0 : i32, i32
  }
  func.func @transform_3(%arg0: i32, %arg1: i32) -> (i32, i32) {
    %c0_i32 = arith.constant 0 : i32
    %c0_i32_0 = arith.constant 0 : i32
    %c0_i32_1 = arith.constant 0 : i32
    return %c0_i32, %c0_i32_0 : i32, i32
  }
  func.func @transform_4(%arg0: i32, %arg1: i32) -> (i32, i32) {
    %c0_i32 = arith.constant 0 : i32
    %c0_i32_0 = arith.constant 0 : i32
    %c0_i32_1 = arith.constant 0 : i32
    return %c0_i32, %c0_i32_0 : i32, i32
  }
  func.func @transform_5(%arg0: i32, %arg1: i32) -> (i32, i32) {
    %c0_i32 = arith.constant 0 : i32
    %c0_i32_0 = arith.constant 0 : i32
    %c0_i32_1 = arith.constant 0 : i32
    return %c0_i32, %c0_i32_0 : i32, i32
  }
  func.func @transform_6(%arg0: i32, %arg1: i32) -> (i32, i32) {
    %c0_i32 = arith.constant 0 : i32
    %c0_i32_0 = arith.constant 0 : i32
    return %arg0, %c0_i32 : i32, i32
  }
}

module attributes {stable_mosaic.version = 11 : i64} {
  func.func @embed_kernel(%arg0: i32, %arg1: i32, %arg2: memref<16x256xbf16, #tpu.memory_space<vmem>>, %arg3: memref<256x768xbf16, #tpu.memory_space<vmem>>, %arg4: memref<768x256xbf16, #tpu.memory_space<vmem>>, %arg5: memref<1x256xf32, #tpu.memory_space<vmem>>, %arg6: memref<256x128xbf16, #tpu.memory_space<vmem>>, %arg7: memref<1x128xf32, #tpu.memory_space<vmem>>, %arg8: memref<16x128xf32, #tpu.memory_space<vmem>>, %arg9: memref<16x768xf32, #tpu.memory_space<vmem>>) attributes {dimension_semantics = [#tpu.dimension_semantics<parallel>, #tpu.dimension_semantics<arbitrary>], iteration_bounds = array<i64: 1, 3>, scalar_prefetch = 0 : i64, scratch_operands = 1 : i64, tpu.core_type = #tpu.core_type<tc>, window_params = [{transform_indices = @transform_0, window_bounds = array<i64: 16, 256>}, {transform_indices = @transform_1, window_bounds = array<i64: 256, 768>}, {pipeline_mode = #tpu.pipeline_mode<synchronous>, transform_indices = @transform_2, window_bounds = array<i64: 768, 256>}, {pipeline_mode = #tpu.pipeline_mode<synchronous>, transform_indices = @transform_3, window_bounds = array<i64: 1, 256>}, {pipeline_mode = #tpu.pipeline_mode<synchronous>, transform_indices = @transform_4, window_bounds = array<i64: 256, 128>}, {pipeline_mode = #tpu.pipeline_mode<synchronous>, transform_indices = @transform_5, window_bounds = array<i64: 1, 128>}, {transform_indices = @transform_6, window_bounds = array<i64: 16, 128>}]} {
    %c0_i32 = arith.constant 0 : i32
    %0 = arith.cmpi eq, %arg1, %c0_i32 : i32
    %1 = arith.extui %0 : i1 to i32
    %c0_i32_0 = arith.constant 0 : i32
    %2 = arith.cmpi ne, %1, %c0_i32_0 : i32
    scf.if %2 {
      %cst_9 = arith.constant 0.000000e+00 : f32
      %12 = vector.broadcast %cst_9 : f32 to vector<16x768xf32>
      %c0_10 = arith.constant 0 : index
      %c0_11 = arith.constant 0 : index
      %13 = vector.load %arg9[%c0_10, %c0_11] : memref<16x768xf32, #tpu.memory_space<vmem>>, vector<16x768xf32>
      tpu.vector_store %arg9[%c0_10, %c0_11], %12 {strides = array<i32>} : memref<16x768xf32, #tpu.memory_space<vmem>>, vector<16x768xf32>,
    } else {
    }
    %c0 = arith.constant 0 : index
    %c0_1 = arith.constant 0 : index
    %3 = vector.load %arg9[%c0, %c0_1] : memref<16x768xf32, #tpu.memory_space<vmem>>, vector<16x768xf32>
    %c0_2 = arith.constant 0 : index
    %c0_3 = arith.constant 0 : index
    %4 = vector.load %arg2[%c0_2, %c0_3] : memref<16x256xbf16, #tpu.memory_space<vmem>>, vector<16x256xbf16>
    %c0_4 = arith.constant 0 : index
    %c0_5 = arith.constant 0 : index
    %5 = vector.load %arg3[%c0_4, %c0_5] : memref<256x768xbf16, #tpu.memory_space<vmem>>, vector<256x768xbf16>
    %cst = arith.constant dense<0.000000e+00> : vector<16x768xf32>
    %6 = tpu.matmul %4, %5, %cst {dimension_numbers = #tpu.dot_dimension_numbers<[1], [0], [0], [1], [0, 0, 1, 1], [], []>} : vector<16x256xbf16>, vector<256x768xbf16>, vector<16x768xf32> -> vector<16x768xf32>
    %7 = arith.addf %3, %6 : vector<16x768xf32>
    %c0_6 = arith.constant 0 : index
    %c0_7 = arith.constant 0 : index
    %8 = vector.load %arg9[%c0_6, %c0_7] : memref<16x768xf32, #tpu.memory_space<vmem>>, vector<16x768xf32>
    tpu.vector_store %arg9[%c0_6, %c0_7], %7 {strides = array<i32>} : memref<16x768xf32, #tpu.memory_space<vmem>>, vector<16x768xf32>,
    %c2_i32 = arith.constant 2 : i32
    %9 = arith.cmpi eq, %arg1, %c2_i32 : i32
    %10 = arith.extui %9 : i1 to i32
    %c0_i32_8 = arith.constant 0 : i32
    %11 = arith.cmpi ne, %10, %c0_i32_8 : i32
    scf.if %11 {
      %c0_9 = arith.constant 0 : index
      %c0_10 = arith.constant 0 : index
      %12 = vector.load %arg9[%c0_9, %c0_10] : memref<16x768xf32, #tpu.memory_space<vmem>>, vector<16x768xf32>
      %13 = arith.truncf %12 : vector<16x768xf32> to vector<16x768xbf16>
      %c0_11 = arith.constant 0 : index
      %c0_12 = arith.constant 0 : index
      %14 = vector.load %arg4[%c0_11, %c0_12] : memref<768x256xbf16, #tpu.memory_space<vmem>>, vector<768x256xbf16>
      %cst_13 = arith.constant dense<0.000000e+00> : vector<16x256xf32>
      %15 = tpu.matmul %13, %14, %cst_13 {dimension_numbers = #tpu.dot_dimension_numbers<[1], [0], [0], [1], [0, 0, 1, 1], [], []>} : vector<16x768xbf16>, vector<768x256xbf16>, vector<16x256xf32> -> vector<16x256xf32>
      %c0_14 = arith.constant 0 : index
      %c0_15 = arith.constant 0 : index
      %16 = vector.load %arg5[%c0_14, %c0_15] : memref<1x256xf32, #tpu.memory_space<vmem>>, vector<1x256xf32>
      %17 = vector.broadcast %16 : vector<1x256xf32> to vector<16x256xf32>
      %18 = arith.addf %15, %17 : vector<16x256xf32>
      %cst_16 = arith.constant 0.000000e+00 : f32
      %19 = vector.broadcast %cst_16 : f32 to vector<16x256xf32>
      %20 = arith.maximumf %18, %19 : vector<16x256xf32>
      %21 = arith.truncf %20 : vector<16x256xf32> to vector<16x256xbf16>
      %c0_17 = arith.constant 0 : index
      %c0_18 = arith.constant 0 : index
      %22 = vector.load %arg6[%c0_17, %c0_18] : memref<256x128xbf16, #tpu.memory_space<vmem>>, vector<256x128xbf16>
      %cst_19 = arith.constant dense<0.000000e+00> : vector<16x128xf32>
      %23 = tpu.matmul %21, %22, %cst_19 {dimension_numbers = #tpu.dot_dimension_numbers<[1], [0], [0], [1], [0, 0, 1, 1], [], []>} : vector<16x256xbf16>, vector<256x128xbf16>, vector<16x128xf32> -> vector<16x128xf32>
      %c0_20 = arith.constant 0 : index
      %c0_21 = arith.constant 0 : index
      %24 = vector.load %arg7[%c0_20, %c0_21] : memref<1x128xf32, #tpu.memory_space<vmem>>, vector<1x128xf32>
      %25 = vector.broadcast %24 : vector<1x128xf32> to vector<16x128xf32>
      %26 = arith.addf %23, %25 : vector<16x128xf32>
      %c0_22 = arith.constant 0 : index
      %c0_23 = arith.constant 0 : index
      %27 = vector.load %arg8[%c0_22, %c0_23] : memref<16x128xf32, #tpu.memory_space<vmem>>, vector<16x128xf32>
      tpu.vector_store %arg8[%c0_22, %c0_23], %26 {strides = array<i32>} : memref<16x128xf32, #tpu.memory_space<vmem>>, vector<16x128xf32>,
    } else {
    }
    return
  }
  func.func @transform_0(%arg0: i32, %arg1: i32) -> (i32, i32) {
    %c0_i32 = arith.constant 0 : i32
    return %arg0, %arg1 : i32, i32
  }
  func.func @transform_1(%arg0: i32, %arg1: i32) -> (i32, i32) {
    %c0_i32 = arith.constant 0 : i32
    %c0_i32_0 = arith.constant 0 : i32
    return %arg1, %c0_i32 : i32, i32
  }
  func.func @transform_2(%arg0: i32, %arg1: i32) -> (i32, i32) {
    %c0_i32 = arith.constant 0 : i32
    %c0_i32_0 = arith.constant 0 : i32
    %c0_i32_1 = arith.constant 0 : i32
    return %c0_i32, %c0_i32_0 : i32, i32
  }
  func.func @transform_3(%arg0: i32, %arg1: i32) -> (i32, i32) {
    %c0_i32 = arith.constant 0 : i32
    %c0_i32_0 = arith.constant 0 : i32
    %c0_i32_1 = arith.constant 0 : i32
    return %c0_i32, %c0_i32_0 : i32, i32
  }
  func.func @transform_4(%arg0: i32, %arg1: i32) -> (i32, i32) {
    %c0_i32 = arith.constant 0 : i32
    %c0_i32_0 = arith.constant 0 : i32
    %c0_i32_1 = arith.constant 0 : i32
    return %c0_i32, %c0_i32_0 : i32, i32
  }
  func.func @transform_5(%arg0: i32, %arg1: i32) -> (i32, i32) {
    %c0_i32 = arith.constant 0 : i32
    %c0_i32_0 = arith.constant 0 : i32
    %c0_i32_1 = arith.constant 0 : i32
    return %c0_i32, %c0_i32_0 : i32, i32
  }
  func.func @transform_6(%arg0: i32, %arg1: i32) -> (i32, i32) {
    %c0_i32 = arith.constant 0 : i32
    %c0_i32_0 = arith.constant 0 : i32
    return %arg0, %c0_i32 : i32, i32
  }
}

module attributes {stable_mosaic.version = 11 : i64} {
  func.func @select_top2_kernel(%arg0: i32, %arg1: memref<2x128xf32, #tpu.memory_space<vmem>>, %arg2: memref<2x8x128xf32, #tpu.memory_space<vmem>>, %arg3: memref<2x8xf32, #tpu.memory_space<vmem>>, %arg4: memref<2x8xf32, #tpu.memory_space<vmem>>, %arg5: memref<2x2xi32, #tpu.memory_space<vmem>>) attributes {dimension_semantics = [#tpu.dimension_semantics<arbitrary>], iteration_bounds = array<i64: 1>, scalar_prefetch = 0 : i64, scratch_operands = 0 : i64, tpu.core_type = #tpu.core_type<tc>, window_params = [{pipeline_mode = #tpu.pipeline_mode<synchronous>, transform_indices = @transform_0, window_bounds = array<i64: 2, 128>}, {pipeline_mode = #tpu.pipeline_mode<synchronous>, transform_indices = @transform_1, window_bounds = array<i64: 2, 8, 128>}, {pipeline_mode = #tpu.pipeline_mode<synchronous>, transform_indices = @transform_2, window_bounds = array<i64: 2, 8>}, {pipeline_mode = #tpu.pipeline_mode<synchronous>, transform_indices = @transform_3, window_bounds = array<i64: 2, 8>}, {pipeline_mode = #tpu.pipeline_mode<synchronous>, transform_indices = @transform_4, window_bounds = array<i64: 2, 2>}]} {
    %c0 = arith.constant 0 : index
    %c0_0 = arith.constant 0 : index
    %0 = vector.load %arg1[%c0, %c0_0] : memref<2x128xf32, #tpu.memory_space<vmem>>, vector<2x128xf32>
    %c0_1 = arith.constant 0 : index
    %c0_2 = arith.constant 0 : index
    %c0_3 = arith.constant 0 : index
    %1 = vector.load %arg2[%c0_1, %c0_2, %c0_3] : memref<2x8x128xf32, #tpu.memory_space<vmem>>, vector<2x8x128xf32>
    %2 = vector.shape_cast %0 : vector<2x128xf32> to vector<2x1x128xf32>
    %3 = vector.broadcast %2 : vector<2x1x128xf32> to vector<2x8x128xf32>
    %4 = arith.mulf %3, %1 : vector<2x8x128xf32>
    %cst = arith.constant dense<0.000000e+00> : vector<2x8xf32>
    %5 = vector.multi_reduction <add>, %4, %cst [2] : vector<2x8x128xf32> to vector<2x8xf32>
    %6 = arith.mulf %0, %0 : vector<2x128xf32>
    %cst_4 = arith.constant dense<0.000000e+00> : vector<2xf32>
    %7 = vector.multi_reduction <add>, %6, %cst_4 [1] : vector<2x128xf32> to vector<2xf32>
    %8 = vector.shape_cast %7 : vector<2xf32> to vector<2x1xf32>
    %9 = math.sqrt %8 : vector<2x1xf32>
    %10 = arith.mulf %1, %1 : vector<2x8x128xf32>
    %cst_5 = arith.constant dense<0.000000e+00> : vector<2x8xf32>
    %11 = vector.multi_reduction <add>, %10, %cst_5 [2] : vector<2x8x128xf32> to vector<2x8xf32>
    %12 = math.sqrt %11 : vector<2x8xf32>
    %cst_6 = arith.constant 9.99999993E-9 : f32
    %13 = vector.broadcast %cst_6 : f32 to vector<2x1xf32>
    %14 = arith.maximumf %9, %13 : vector<2x1xf32>
    %cst_7 = arith.constant 9.99999993E-9 : f32
    %15 = vector.broadcast %cst_7 : f32 to vector<2x8xf32>
    %16 = arith.maximumf %12, %15 : vector<2x8xf32>
    %17 = vector.broadcast %14 : vector<2x1xf32> to vector<2x8xf32>
    %18 = arith.mulf %17, %16 : vector<2x8xf32>
    %19 = tpu.reciprocal %18 {approx = true} : vector<2x8xf32> -> vector<2x8xf32>
    %20 = arith.mulf %5, %19 : vector<2x8xf32>
    %21 = tpu.iota {dimensions = array<i32: 1>} : vector<2x8xi32>
    %c0_8 = arith.constant 0 : index
    %c0_9 = arith.constant 0 : index
    %22 = vector.load %arg3[%c0_8, %c0_9] : memref<2x8xf32, #tpu.memory_space<vmem>>, vector<2x8xf32>
    %23 = arith.addf %20, %22 : vector<2x8xf32>
    %cst_10 = arith.constant 1.000000e+00 : f32
    %24 = vector.broadcast %cst_10 : f32 to vector<2x8xf32>
    %25 = arith.mulf %23, %24 : vector<2x8xf32>
    %cst_11 = arith.constant dense<0xFF800000> : vector<2xf32>
    %26 = vector.multi_reduction <maximumf>, %25, %cst_11 [1] : vector<2x8xf32> to vector<2xf32>
    %27 = vector.shape_cast %26 : vector<2xf32> to vector<2x1xf32>
    %28 = vector.broadcast %27 : vector<2x1xf32> to vector<2x8xf32>
    %29 = arith.cmpf oge, %25, %28 : vector<2x8xf32>
    %c8_i32 = arith.constant 8 : i32
    %30 = vector.broadcast %c8_i32 : i32 to vector<2x8xi32>
    %31 = arith.select %29, %21, %30 : vector<2x8xi1>, vector<2x8xi32>
    %cst_12 = arith.constant dense<2147483647> : vector<2xi32>
    %32 = vector.multi_reduction <minsi>, %31, %cst_12 [1] : vector<2x8xi32> to vector<2xi32>
    %33 = vector.shape_cast %32 : vector<2xi32> to vector<2x1xi32>
    %34 = vector.broadcast %33 : vector<2x1xi32> to vector<2x8xi32>
    %35 = arith.cmpi eq, %21, %34 : vector<2x8xi32>
    %cst_13 = arith.constant -1.000000e+30 : f32
    %36 = vector.broadcast %cst_13 : f32 to vector<2x8xf32>
    %37 = arith.select %35, %36, %20 : vector<2x8xi1>, vector<2x8xf32>
    %c0_14 = arith.constant 0 : index
    %c0_15 = arith.constant 0 : index
    %38 = vector.load %arg4[%c0_14, %c0_15] : memref<2x8xf32, #tpu.memory_space<vmem>>, vector<2x8xf32>
    %39 = arith.addf %37, %38 : vector<2x8xf32>
    %cst_16 = arith.constant 1.000000e+00 : f32
    %40 = vector.broadcast %cst_16 : f32 to vector<2x8xf32>
    %41 = arith.mulf %39, %40 : vector<2x8xf32>
    %cst_17 = arith.constant dense<0xFF800000> : vector<2xf32>
    %42 = vector.multi_reduction <maximumf>, %41, %cst_17 [1] : vector<2x8xf32> to vector<2xf32>
    %43 = vector.shape_cast %42 : vector<2xf32> to vector<2x1xf32>
    %44 = vector.broadcast %43 : vector<2x1xf32> to vector<2x8xf32>
    %45 = arith.cmpf oge, %41, %44 : vector<2x8xf32>
    %c8_i32_18 = arith.constant 8 : i32
    %46 = vector.broadcast %c8_i32_18 : i32 to vector<2x8xi32>
    %47 = arith.select %45, %21, %46 : vector<2x8xi1>, vector<2x8xi32>
    %cst_19 = arith.constant dense<2147483647> : vector<2xi32>
    %48 = vector.multi_reduction <minsi>, %47, %cst_19 [1] : vector<2x8xi32> to vector<2xi32>
    %49 = vector.shape_cast %48 : vector<2xi32> to vector<2x1xi32>
    %50 = tpu.iota {dimensions = array<i32: 1>} : vector<2x2xi32>
    %c0_i32 = arith.constant 0 : i32
    %51 = vector.broadcast %c0_i32 : i32 to vector<2x2xi32>
    %52 = arith.cmpi eq, %50, %51 : vector<2x2xi32>
    %53 = vector.shape_cast %33 : vector<2x1xi32> to vector<2x1xi32>
    %54 = vector.broadcast %53 : vector<2x1xi32> to vector<2x2xi32>
    %55 = vector.shape_cast %49 : vector<2x1xi32> to vector<2x1xi32>
    %56 = vector.broadcast %55 : vector<2x1xi32> to vector<2x2xi32>
    %57 = arith.select %52, %54, %56 : vector<2x2xi1>, vector<2x2xi32>
    %c0_20 = arith.constant 0 : index
    %c0_21 = arith.constant 0 : index
    %58 = vector.load %arg5[%c0_20, %c0_21] : memref<2x2xi32, #tpu.memory_space<vmem>>, vector<2x2xi32>
    tpu.vector_store %arg5[%c0_20, %c0_21], %57 {strides = array<i32>} : memref<2x2xi32, #tpu.memory_space<vmem>>, vector<2x2xi32>,
    return
  }
  func.func @transform_0(%arg0: i32) -> (i32, i32) {
    %c0_i32 = arith.constant 0 : i32
    %c0_i32_0 = arith.constant 0 : i32
    %c0_i32_1 = arith.constant 0 : i32
    return %c0_i32, %c0_i32_0 : i32, i32
  }
  func.func @transform_1(%arg0: i32) -> (i32, i32, i32) {
    %c0_i32 = arith.constant 0 : i32
    %c0_i32_0 = arith.constant 0 : i32
    %c0_i32_1 = arith.constant 0 : i32
    %c0_i32_2 = arith.constant 0 : i32
    return %c0_i32, %c0_i32_0, %c0_i32_1 : i32, i32, i32
  }
  func.func @transform_2(%arg0: i32) -> (i32, i32) {
    %c0_i32 = arith.constant 0 : i32
    %c0_i32_0 = arith.constant 0 : i32
    %c0_i32_1 = arith.constant 0 : i32
    return %c0_i32, %c0_i32_0 : i32, i32
  }
  func.func @transform_3(%arg0: i32) -> (i32, i32) {
    %c0_i32 = arith.constant 0 : i32
    %c0_i32_0 = arith.constant 0 : i32
    %c0_i32_1 = arith.constant 0 : i32
    return %c0_i32, %c0_i32_0 : i32, i32
  }
  func.func @transform_4(%arg0: i32) -> (i32, i32) {
    %c0_i32 = arith.constant 0 : i32
    %c0_i32_0 = arith.constant 0 : i32
    %c0_i32_1 = arith.constant 0 : i32
    return %c0_i32, %c0_i32_0 : i32, i32
  }
}

module attributes {stable_mosaic.version = 11 : i64} {
  func.func @gather_combine_kernel(%arg0: i32, %arg1: i32, %arg2: memref<2x2xi32, #tpu.memory_space<smem>>, %arg3: memref<1x1x3x256xf32, #tpu.memory_space<vmem>>, %arg4: memref<1x1x1x256xi32, #tpu.memory_space<vmem>>, %arg5: memref<1x1x3x256xf32, #tpu.memory_space<vmem>>, %arg6: memref<1x1x1x256xi32, #tpu.memory_space<vmem>>) attributes {dimension_semantics = [#tpu.dimension_semantics<parallel>, #tpu.dimension_semantics<parallel>], iteration_bounds = array<i64: 2, 2>, scalar_prefetch = 1 : i64, scratch_operands = 0 : i64, tpu.core_type = #tpu.core_type<tc>, window_params = [{transform_indices = @transform_0, window_bounds = array<i64: 1, 1, 3, 256>}, {transform_indices = @transform_1, window_bounds = array<i64: 1, 1, 1, 256>}, {transform_indices = @transform_2, window_bounds = array<i64: 1, 1, 3, 256>}, {transform_indices = @transform_3, window_bounds = array<i64: 1, 1, 1, 256>}]} {
    %c0 = arith.constant 0 : index
    %c0_0 = arith.constant 0 : index
    %c0_1 = arith.constant 0 : index
    %c0_2 = arith.constant 0 : index
    %0 = vector.load %arg3[%c0, %c0_0, %c0_1, %c0_2] : memref<1x1x3x256xf32, #tpu.memory_space<vmem>>, vector<1x1x3x256xf32>
    %c0_3 = arith.constant 0 : index
    %c0_4 = arith.constant 0 : index
    %c0_5 = arith.constant 0 : index
    %c0_6 = arith.constant 0 : index
    %1 = vector.load %arg5[%c0_3, %c0_4, %c0_5, %c0_6] : memref<1x1x3x256xf32, #tpu.memory_space<vmem>>, vector<1x1x3x256xf32>
    tpu.vector_store %arg5[%c0_3, %c0_4, %c0_5, %c0_6], %0 {strides = array<i32>} : memref<1x1x3x256xf32, #tpu.memory_space<vmem>>, vector<1x1x3x256xf32>,
    %c0_7 = arith.constant 0 : index
    %c0_8 = arith.constant 0 : index
    %c0_9 = arith.constant 0 : index
    %c0_10 = arith.constant 0 : index
    %2 = vector.load %arg4[%c0_7, %c0_8, %c0_9, %c0_10] : memref<1x1x1x256xi32, #tpu.memory_space<vmem>>, vector<1x1x1x256xi32>
    %c0_11 = arith.constant 0 : index
    %c0_12 = arith.constant 0 : index
    %c0_13 = arith.constant 0 : index
    %c0_14 = arith.constant 0 : index
    %3 = vector.load %arg6[%c0_11, %c0_12, %c0_13, %c0_14] : memref<1x1x1x256xi32, #tpu.memory_space<vmem>>, vector<1x1x1x256xi32>
    tpu.vector_store %arg6[%c0_11, %c0_12, %c0_13, %c0_14], %2 {strides = array<i32>} : memref<1x1x1x256xi32, #tpu.memory_space<vmem>>, vector<1x1x1x256xi32>,
    return
  }
  func.func @transform_0(%arg0: i32, %arg1: i32, %arg2: memref<2x2xi32, #tpu.memory_space<smem>>) -> (i32, i32, i32, i32) {
    %0 = arith.index_cast %arg0 : i32 to index
    %1 = arith.index_cast %arg1 : i32 to index
    %2 = memref.load %arg2[%0, %1] : memref<2x2xi32, #tpu.memory_space<smem>>
    %c0_i32 = arith.constant 0 : i32
    %c0_i32_0 = arith.constant 0 : i32
    %c0_i32_1 = arith.constant 0 : i32
    return %arg0, %2, %c0_i32, %c0_i32_0 : i32, i32, i32, i32
  }
  func.func @transform_1(%arg0: i32, %arg1: i32, %arg2: memref<2x2xi32, #tpu.memory_space<smem>>) -> (i32, i32, i32, i32) {
    %0 = arith.index_cast %arg0 : i32 to index
    %1 = arith.index_cast %arg1 : i32 to index
    %2 = memref.load %arg2[%0, %1] : memref<2x2xi32, #tpu.memory_space<smem>>
    %c0_i32 = arith.constant 0 : i32
    %c0_i32_0 = arith.constant 0 : i32
    %c0_i32_1 = arith.constant 0 : i32
    return %arg0, %2, %c0_i32, %c0_i32_0 : i32, i32, i32, i32
  }
  func.func @transform_2(%arg0: i32, %arg1: i32, %arg2: memref<2x2xi32, #tpu.memory_space<smem>>) -> (i32, i32, i32, i32) {
    %c0_i32 = arith.constant 0 : i32
    %c0_i32_0 = arith.constant 0 : i32
    %c0_i32_1 = arith.constant 0 : i32
    return %arg0, %arg1, %c0_i32, %c0_i32_0 : i32, i32, i32, i32
  }
  func.func @transform_3(%arg0: i32, %arg1: i32, %arg2: memref<2x2xi32, #tpu.memory_space<smem>>) -> (i32, i32, i32, i32) {
    %c0_i32 = arith.constant 0 : i32
    %c0_i32_0 = arith.constant 0 : i32
    %c0_i32_1 = arith.constant 0 : i32
    return %arg0, %arg1, %c0_i32, %c0_i32_0 : i32, i32, i32, i32
  }
}

</mosaic_0001>

<bundles_post_ra>
// kernel: joint_training_forward.4
= control target key start
LH: loop header
LB: loop body
LE: loop exit
PB: predicated region body
PF: predicated region fallthrough
CT: control target
= control target key end

     0   :  { %s3991_s0 = inlined_call_operand.vmem [shape: bf16[8,768], index: 0, kind: input, shape index: {}]   ;;  %s3992_s1 = inlined_call_operand.hbm [shape: bf16[768,768], index: 1, kind: input, shape index: {}]   ;;  %s3993_s2 = inlined_call_operand.hbm [shape: bf16[768,256], index: 2, kind: input, shape index: {}]   ;;  %s3994_s3 = inlined_call_operand.hbm [shape: f32[1,256], index: 3, kind: input, shape index: {}]   ;;  %s3995_s4 = inlined_call_operand.hbm [shape: bf16[256,128], index: 4, kind: input, shape index: {}]   ;;  %s3996_s5 = inlined_call_operand.hbm [shape: f32[1,128], index: 5, kind: input, shape index: {}]   ;;  %s3997_s6 = inlined_call_operand.vmem [shape: f32[8,128], index: 6, kind: output, shape index: {}]  }
   0x1   :  { %3998 = sst [smem:[#allocation14_spill]] %s3993_s2 }
   0x2   :  { %3999 = sst [smem:[#allocation15_spill]] %s3994_s3 }
   0x3   :  { %11 = vsyncpa [#allocation4], 0 }
   0x4   :  { %13 = vsyncpa [#allocation4 + $0x1], 0 }
   0x5   :  { %14 = vsyncpa [#allocation6], 0 }
   0x6   :  { %15 = vsyncpa [#allocation9], 0  ;;  %s3620_s21 = smov 0   ;;  %s3622_s22 = smov 0  }
   0x7   :  { %s3624_s23 = smov 0   ;;  %s3626_s24 = smov 0  }
   0x8   :  { %s3628_s25 = smov 0   ;;  %s3630_s26 = smov 0  }
   0x9 LB: > { %s2195_s27 = sadd.s32 4294967295, %s3572_s26   ;;  %p81_p0 = scmp.ne.s32.totalorder %s3556_s22, %s3552_s21  ;;  %s3572_s26 = sphi %s3630_s26, %s21_s26   ;;  %s3568_s25 = sphi %s3628_s25, %s4010_s25   ;;  %s3564_s24 = sphi %s3626_s24, %s4009_s24   ;;  %s3560_s23 = sphi %s3624_s23, %s4008_s23   ;;  %s3556_s22 = sphi %s3622_s22, %s4007_s22   ;;  %s3552_s21 = sphi %s3620_s21, %s4006_s21  }
   0xa   : > { %p3650_p1 = scmp.eq.s32.totalorder %s2195_s27, 0  ;;  %p2196_p2 = scmp.ge.s32.totalorder %s3572_s26, 1 }
   0xb   : > { %p202_p3 = scmp.lt.s32.totalorder %s3572_s26, 4  ;;  %s4002_s2 = sld [smem:[#allocation14_spill]] }
   0xc   : > { %p3658_p4 = por %p3650_p1, %p81_p0  ;;  %s3574_s10 = smov [#allocation5]  }
   0xd   : > { %p3665_p5 = pnand %p2196_p2, %p202_p3  ;;  %s215_s11 = sshll.u32 %s3574_s10, 4  ;;  %s216_s11 = int_to_ptr.vmem [resolvable:$true] %s215_s11 }
   0xe   : > { %s239_s15 = sshll.u32 %s3995_s4, 4  ;;  %s3575_s16 = smov 128   ;;  %s240_s15 = int_to_ptr.hbm [resolvable:$true] %s239_s15 }
   0xf   : > { %p3278_p6 = pneg %p3665_p5  ;;  %s3576_s17 = smov 8  }
  0x10   : > { %s3577_s18 = smov [#allocation8]   ;;  %s3578_s20 = smov 64  }
  0x11   : > { %s213_s8 = sshll.u32 %s4002_s2, 4  ;;  %p3673_p7 = pnand %p3278_p6, %p3650_p1  ;;  %s214_s8 = int_to_ptr.hbm [resolvable:$true] %s213_s8 }
  0x12   : > { %s241_s19 = sshll.u32 %s3577_s18, 4  ;;  %s3579_s21 = smov 4   ;;  %s242_s19 = int_to_ptr.vmem [resolvable:$true] %s241_s19 }
  0x13   : > { %3281 = dma.hbm_to_vmem [thread:$0]  (!%p3673_p7), %s214_s8, 12288, %s216_s11, [#allocation6], %s3575_s16, %s3575_s16, %s3576_s17  }
  0x14   : > { %3287 = dma.hbm_to_vmem [thread:$0]  (!%p3673_p7), %s240_s15, 2048, %s242_s19, [#allocation9], %s3578_s20, %s3578_s20, %s3579_s21  }
  0x15   : > { %s4005_s3 = sld [smem:[#allocation15_spill]]  ;;  %s3580_s8 = smov [#allocation7]  }
  0x16   : > { %s230_s10 = sshll.u32 %s3580_s8, 4  ;;  %s254_s14 = sshll.u32 %s3996_s5, 4  ;;  %s231_s10 = int_to_ptr.vmem [resolvable:$true] %s230_s10  ;;  %s255_s14 = int_to_ptr.hbm [resolvable:$true] %s254_s14 }
  0x17   : > { %s3581_s15 = smov [#allocation10]   ;;  %s30_s17 = sadd.s32 1, %s3568_s25 }
  0x18   : > { %s256_s16 = sshll.u32 %s3581_s15, 4  ;;  %s68_s18 = sadd.s32 1, %s3560_s23  ;;  %s257_s16 = int_to_ptr.vmem [resolvable:$true] %s256_s16 }
  0x19   : > { %3290 = dma.hbm_to_vmem [thread:$0]  (!%p3673_p7), %s255_s14, 16, %s257_s16, [#allocation9]  }
  0x1a   : > { %p31_p8 = scmp.ge.s32.totalorder %s30_s17, 3  ;;  %p75_p9 = scmp.ne.s32.totalorder %s3560_s23, %s3556_s22 }
  0x1b   : > { %s228_s7 = sshll.u32 %s4005_s3, 4  ;;  %p76_p10 = scmp.eq.s32.totalorder %s3572_s26, 0  ;;  %s229_s7 = int_to_ptr.hbm [resolvable:$true] %s228_s7 }
  0x1c   : > { %3284 = dma.hbm_to_vmem [thread:$0]  (!%p3673_p7), %s229_s7, 32, %s231_s10, [#allocation6]  }
  0x1d   : > { %p3299_p11 = scmp.lt.s32.totalorder %s3572_s26, 3  ;;  %s4012_s17 = smov (%p31_p8, %s30_s17), 0 }
  0x1e   : > { %p77_p12 = por %p76_p10, %p75_p9  ;;  %s280_s19 = sand.u32 1, %s3560_s23  }
  0x1f   : > { %s65_s20 = ssub.s32 %s3568_s25, %s4012_s17  ;;  %s3257_s21 = smul.u32 768, %s280_s19 }
  0x20   : > { %p66_p13 = scmp.eq.s32.totalorder %s65_s20, 0  ;;  %s3258_s27 = smul.u32 768, %s3568_s25 }
  0x21   : > { %p3292_p0 = pnand %p3299_p11, %p77_p12  ;;  %s284_s11 = scalar_lea.vmem [#allocation3], %s3257_s21 }
  0x22   : > { %s3707_s30 = scalar_select %p66_p13, %s3560_s23, %s68_s18  }
  0x23   : > { %s290_s8 = scalar_lea.hbm %s3992_s1, %s3258_s27  ;;  %s293_s13 = sshll.u32 %s284_s11, 4  ;;  %s294_s13 = int_to_ptr.vmem [resolvable:$true] %s293_s13 }
  0x24   : > { %s291_s10 = sshll.u32 %s290_s8, 4  ;;  %s281_s14 = scalar_lea.sflag [#allocation4], %s280_s19  ;;  %s292_s10 = int_to_ptr.hbm [resolvable:$true] %s291_s10 }
  0x25   : > { %s3582_s15 = smov 384   ;;  %s3583_s16 = smov 24  }
  0x26   : > { %3294 = dma.hbm_to_vmem [thread:$0]  (!%p3292_p0), %s292_s10, 12288, %s294_s13, %s281_s14, %s3582_s15, %s3582_s15, %s3583_s16  }
  0x27   : > { %305 = sbr.rel (%p3665_p5) target bundleno = 677 (0x2a5), region = 44  ;;  %s307_s18 = sand.u32 (!%p3665_p5), 1, %s3556_s22  }
  0x28   : > { %s3259_s20 = smul.u32 (!%p3665_p5), 768, %s307_s18  ;;  %s308_s2 = scalar_lea.sflag (!%p3665_p5), [#allocation4], %s307_s18 }
  0x2a   : > { %s3715_s3 = scalar_lea.vmem (!%p3665_p5), [#allocation3], %s3259_s20 }
  0x2c   : > { %3539 = dma.done.wait (%p3658_p4), %s308_s2, 12288  }
  0x2d   : > { %3541 = vsyncadd (%p3658_p4), %s308_s2, 4294955008 }
  0x2e   : > { %3543 = dma.done.wait (%p3650_p1), [#allocation6], 12320  }
  0x2f   : > { %3545 = vsyncadd (%p3650_p1), [#allocation6], 4294954976 }
  0x30   : > { %3547 = dma.done.wait (%p3650_p1), [#allocation9], 2064  }
  0x31   : > { %3549 = vsyncadd (%p3650_p1), [#allocation9], 4294965232  ;;  %s2210_s9 = sshll.u32 %s3564_s24, 1  ;;  %p2212_p3 = scmp.ne.s32.totalorder %s3564_s24, 0 }
  0x32   : > { %p372_p2 = scmp.lt.s32.totalorder %s2210_s9, 5 }
  0x33   : > { %387 = sbr.rel (%p2212_p3) target bundleno = 63 (0x3f), region = 68 }
  0x34   : > { %s4014_s9 = smov (!%p372_p2, %s2210_s9), 5 }
  0x35   : > { %s2211_s19 = sshll.u32 %s4014_s9, 2 }
  0x36   : > { %s3733_s2 = scalar_lea.vmem %s3991_s0, %s2211_s19 }
  0x38   : > { %v3584_v0 = vmov 0.0  }
  0x39   : > { %388 = vst [vmem:[#allocation2 + $0x28] sm:$0xff] %v3584_v0 }
  0x3a   : > { %389 = vst [vmem:[#allocation2 + $0x10] sm:$0xff] %v3584_v0 }
  0x3b   : > { %390 = vst [vmem:[#allocation2 + $0x8] sm:$0xff] %v3584_v0 }
  0x3c   : > { %391 = vst [vmem:[#allocation2] sm:$0xff] %v3584_v0 }
  0x3d   : > { %392 = vst [vmem:[#allocation2 + $0x18] sm:$0xff] %v3584_v0 }
  0x3e   : > { %393 = vst [vmem:[#allocation2 + $0x20] sm:$0xff] %v3584_v0 }
  0x3f PF: > { %v2383_v1 = vld [vmem:[%s3715_s3 + $0x150] sm:$0xf]  ;;  %v3094_v2 = vld [vmem:[%s3715_s3 + $0x164] sm:$0xf0]  ;;  %v3091_v6 = vld [vmem:[%s3715_s3 + $0x154] sm:$0xf] }
  0x40   : > { %v2575_v3 = vld [vmem:[%s3715_s3 + $0x2d0] sm:$0xf]  ;;  %v2384_v4 = vor.u32 %v3094_v2, %v2383_v1  ;;  %v3142_v5 = vld [vmem:[%s3715_s3 + $0x2e4] sm:$0xf0]  ;;  %v2385_v7 = vld [vmem:[%s3715_s3 + $0x168] sm:$0xf0] }
  0x41   : > { %v2576_v8 = vor.u32 %v3142_v5, %v2575_v3  ;;  %v2388_v9 = vor.u32 %v3091_v6, %v2385_v7  ;;  %v3139_v10 = vld [vmem:[%s3715_s3 + $0x2d4] sm:$0xf]  ;;  %v2577_v11 = vld [vmem:[%s3715_s3 + $0x2e8] sm:$0xf0]  ;;  %v2359_v12 = vld [vmem:[%s3715_s3 + $0x120] sm:$0xf] }
  0x42   : > { %984 = vmatpush.bf16.msra.mxu0 %v2384_v4  ;;  %v2580_v13 = vor.u32 %v3139_v10, %v2577_v11  ;;  %v3088_v14 = vld [vmem:[%s3715_s3 + $0x134] sm:$0xf0]  ;;  %v2551_v15 = vld [vmem:[%s3715_s3 + $0x2a0] sm:$0xf]  ;;  %v3085_v19 = vld [vmem:[%s3715_s3 + $0x124] sm:$0xf] }
  0x43   : > { %v3136_v16 = vld [vmem:[%s3715_s3 + $0x2b4] sm:$0xf0]  ;;  %997 = vmatpush.bf16.msra.mxu1 %v2576_v8  ;;  %1010 = vmatpush.bf16.msra.mxu2 %v2388_v9  ;;  %v2360_v17 = vor.u32 %v3088_v14, %v2359_v12  ;;  %v2361_v20 = vld [vmem:[%s3715_s3 + $0x138] sm:$0xf0]  ;;  %v3133_v21 = vld [vmem:[%s3715_s3 + $0x2a4] sm:$0xf] }
  0x44   : > { %v2552_v18 = vor.u32 %v3136_v16, %v2551_v15  ;;  %1023 = vmatpush.bf16.msra.mxu3 %v2580_v13  ;;  %v2364_v22 = vor.u32 %v3085_v19, %v2361_v20  ;;  %v2553_v23 = vld [vmem:[%s3715_s3 + $0x2b8] sm:$0xf0]  ;;  %v2335_v24 = vld [vmem:[%s3715_s3 + $0xf0] sm:$0xf]  ;;  %v3082_v25 = vld [vmem:[%s3715_s3 + $0x104] sm:$0xf0] }
  0x45   : > { %v2556_v26 = vor.u32 %v3133_v21, %v2553_v23  ;;  %v2527_v27 = vld [vmem:[%s3715_s3 + $0x270] sm:$0xf]  ;;  %v3130_v28 = vld [vmem:[%s3715_s3 + $0x284] sm:$0xf0]  ;;  %v3079_v29 = vld [vmem:[%s3715_s3 + $0xf4] sm:$0xf]  ;;  %v2336_v30 = vor.u32 %v3082_v25, %v2335_v24 }
  0x46   : > { %985 = vmatpush.bf16.msra.mxu0 %v2360_v17  ;;  %v2337_v31 = vld [vmem:[%s3715_s3 + $0x108] sm:$0xf0]  ;;  %v3127_v32 = vld [vmem:[%s3715_s3 + $0x274] sm:$0xf]  ;;  %v2528_v34 = vor.u32 %v3130_v28, %v2527_v27  ;;  %v2311_v36 = vld [vmem:[%s3715_s3 + $0xc0] sm:$0xf] }
  0x47   : > { %v2529_v33 = vld [vmem:[%s3715_s3 + $0x288] sm:$0xf0]  ;;  %998 = vmatpush.bf16.msra.mxu1 %v2552_v18  ;;  %1011 = vmatpush.bf16.msra.mxu2 %v2364_v22  ;;  %v2340_v35 = vor.u32 %v3079_v29, %v2337_v31  ;;  %v3076_v37 = vld [vmem:[%s3715_s3 + $0xd4] sm:$0xf0]  ;;  %v2503_v38 = vld [vmem:[%s3715_s3 + $0x240] sm:$0xf] }
  0x48   : > { %1024 = vmatpush.bf16.msra.mxu3 %v2556_v26  ;;  %v2532_v39 = vor.u32 %v3127_v32, %v2529_v33  ;;  %v3124_v40 = vld [vmem:[%s3715_s3 + $0x254] sm:$0xf0]  ;;  %v3073_v41 = vld [vmem:[%s3715_s3 + $0xc4] sm:$0xf]  ;;  %v2313_v42 = vld [vmem:[%s3715_s3 + $0xd8] sm:$0xf0]  ;;  %v2312_v45 = vor.u32 %v3076_v37, %v2311_v36 }
  0x49   : > { %v3121_v43 = vld [vmem:[%s3715_s3 + $0x244] sm:$0xf]  ;;  %v2505_v44 = vld [vmem:[%s3715_s3 + $0x258] sm:$0xf0]  ;;  %v2504_v46 = vor.u32 %v3124_v40, %v2503_v38  ;;  %v2316_v47 = vor.u32 %v3073_v41, %v2313_v42  ;;  %v2287_v48 = vld [vmem:[%s3715_s3 + $0x90] sm:$0xf] }
  0x4a   : > { %986 = vmatpush.bf16.msra.mxu0 %v2336_v30  ;;  %v3070_v49 = vld [vmem:[%s3715_s3 + $0xa4] sm:$0xf0]  ;;  %v2479_v50 = vld [vmem:[%s3715_s3 + $0x210] sm:$0xf]  ;;  %v2508_v51 = vor.u32 %v3121_v43, %v2505_v44  ;;  %v3067_v53 = vld [vmem:[%s3715_s3 + $0x94] sm:$0xf] }
  0x4b   : > { %999 = vmatpush.bf16.msra.mxu1 %v2528_v34  ;;  %1012 = vmatpush.bf16.msra.mxu2 %v2340_v35  ;;  %v3118_v52 = vld [vmem:[%s3715_s3 + $0x224] sm:$0xf0]  ;;  %v2289_v54 = vld [vmem:[%s3715_s3 + $0xa8] sm:$0xf0]  ;;  %v3115_v55 = vld [vmem:[%s3715_s3 + $0x214] sm:$0xf]  ;;  %v2288_v57 = vor.u32 %v3070_v49, %v2287_v48 }
  0x4c   : > { %1025 = vmatpush.bf16.msra.mxu3 %v2532_v39  ;;  %v2481_v56 = vld [vmem:[%s3715_s3 + $0x228] sm:$0xf0]  ;;  %v2480_v58 = vor.u32 %v3118_v52, %v2479_v50  ;;  %v2292_v59 = vor.u32 %v3067_v53, %v2289_v54  ;;  %v2263_v60 = vld [vmem:[%s3715_s3 + $0x60] sm:$0xf]  ;;  %v3064_v61 = vld [vmem:[%s3715_s3 + $0x74] sm:$0xf0] }
  0x4d   : > { %v2455_v62 = vld [vmem:[%s3715_s3 + $0x1e0] sm:$0xf]  ;;  %v2484_v63 = vor.u32 %v3115_v55, %v2481_v56  ;;  %v3112_v0 = vld [vmem:[%s3715_s3 + $0x1f4] sm:$0xf0]  ;;  %v3061_v1 = vld [vmem:[%s3715_s3 + $0x64] sm:$0xf]  ;;  %v2264_v5 = vor.u32 %v3064_v61, %v2263_v60 }
  0x4e   : > { %987 = vmatpush.bf16.msra.mxu0 %v2312_v45  ;;  %v2265_v2 = vld [vmem:[%s3715_s3 + $0x78] sm:$0xf0]  ;;  %v3109_v3 = vld [vmem:[%s3715_s3 + $0x1e4] sm:$0xf]  ;;  %v2456_v6 = vor.u32 %v3112_v0, %v2455_v62  ;;  %v2239_v8 = vld [vmem:[%s3715_s3 + $0x30] sm:$0xf] }
  0x4f   : > { %1000 = vmatpush.bf16.msra.mxu1 %v2504_v46  ;;  %1013 = vmatpush.bf16.msra.mxu2 %v2316_v47  ;;  %v2457_v4 = vld [vmem:[%s3715_s3 + $0x1f8] sm:$0xf0]  ;;  %v2268_v7 = vor.u32 %v3061_v1, %v2265_v2  ;;  %v3058_v9 = vld [vmem:[%s3715_s3 + $0x44] sm:$0xf0]  ;;  %v2431_v10 = vld [vmem:[%s3715_s3 + $0x1b0] sm:$0xf] }
  0x50   : > { %1026 = vmatpush.bf16.msra.mxu3 %v2508_v51  ;;  %v2460_v11 = vor.u32 %v3109_v3, %v2457_v4  ;;  %v3106_v12 = vld [vmem:[%s3715_s3 + $0x1c4] sm:$0xf0]  ;;  %v3055_v13 = vld [vmem:[%s3715_s3 + $0x34] sm:$0xf]  ;;  %v2241_v14 = vld [vmem:[%s3715_s3 + $0x48] sm:$0xf0]  ;;  %v2240_v17 = vor.u32 %v3058_v9, %v2239_v8 }
  0x51   : > { %v3103_v15 = vld [vmem:[%s3715_s3 + $0x1b4] sm:$0xf]  ;;  %v2433_v16 = vld [vmem:[%s3715_s3 + $0x1c8] sm:$0xf0]  ;;  %v2215_v18 = vld [vmem:[%s3715_s3] sm:$0xf]  ;;  %v2432_v20 = vor.u32 %v3106_v12, %v2431_v10  ;;  %v2244_v21 = vor.u32 %v3055_v13, %v2241_v14 }
  0x52   : > { %988 = vmatpush.bf16.msra.mxu0 %v2288_v57  ;;  %v3052_v19 = vld [vmem:[%s3715_s3 + $0x14] sm:$0xf0]  ;;  %v2407_v22 = vld [vmem:[%s3715_s3 + $0x180] sm:$0xf]  ;;  %v3049_v24 = vld [vmem:[%s3715_s3 + $0x4] sm:$0xf]  ;;  %v2436_v25 = vor.u32 %v3103_v15, %v2433_v16 }
  0x53   : > { %1001 = vmatpush.bf16.msra.mxu1 %v2480_v58  ;;  %1014 = vmatpush.bf16.msra.mxu2 %v2292_v59  ;;  %v3100_v23 = vld [vmem:[%s3715_s3 + $0x194] sm:$0xf0]  ;;  %v2217_v26 = vld [vmem:[%s3715_s3 + $0x18] sm:$0xf0]  ;;  %v3097_v27 = vld [vmem:[%s3715_s3 + $0x184] sm:$0xf]  ;;  %v2216_v32 = vor.u32 %v3052_v19, %v2215_v18 }
  0x54   : > { %1027 = vmatpush.bf16.msra.mxu3 %v2484_v63  ;;  %v2409_v28 = vld [vmem:[%s3715_s3 + $0x198] sm:$0xf0]  ;;  %v2391_v29 = vld [vmem:[%s3715_s3 + $0x158] sm:$0xf]  ;;  %v3095_v30 = vld [vmem:[%s3715_s3 + $0x16c] sm:$0xf0]  ;;  %v2408_v36 = vor.u32 %v3100_v23, %v2407_v22  ;;  %v2220_v37 = vor.u32 %v3049_v24, %v2217_v26 }
  0x55   : > { %v2583_v31 = vld [vmem:[%s3715_s3 + $0x2d8] sm:$0xf]  ;;  %v3143_v33 = vld [vmem:[%s3715_s3 + $0x2ec] sm:$0xf0]  ;;  %v3092_v34 = vld [vmem:[%s3715_s3 + $0x15c] sm:$0xf]  ;;  %v2412_v40 = vor.u32 %v3097_v27, %v2409_v28  ;;  %v2392_v41 = vor.u32 %v3095_v30, %v2391_v29 }
  0x56   : > { %989 = vmatpush.bf16.msra.mxu0 %v2264_v5  ;;  %v2393_v35 = vld [vmem:[%s3715_s3 + $0x170] sm:$0xf0]  ;;  %v3140_v38 = vld [vmem:[%s3715_s3 + $0x2dc] sm:$0xf]  ;;  %v2584_v42 = vor.u32 %v3143_v33, %v2583_v31  ;;  %v2367_v44 = vld [vmem:[%s3715_s3 + $0x128] sm:$0xf] }
  0x57   : > { %1002 = vmatpush.bf16.msra.mxu1 %v2456_v6  ;;  %1015 = vmatpush.bf16.msra.mxu2 %v2268_v7  ;;  %v2585_v39 = vld [vmem:[%s3715_s3 + $0x2f0] sm:$0xf0]  ;;  %v2396_v43 = vor.u32 %v3092_v34, %v2393_v35  ;;  %v3089_v45 = vld [vmem:[%s3715_s3 + $0x13c] sm:$0xf0]  ;;  %v2559_v46 = vld [vmem:[%s3715_s3 + $0x2a8] sm:$0xf] }
  0x58   : > { %1028 = vmatpush.bf16.msra.mxu3 %v2460_v11  ;;  %v2588_v47 = vor.u32 %v3140_v38, %v2585_v39  ;;  %v3137_v48 = vld [vmem:[%s3715_s3 + $0x2bc] sm:$0xf0]  ;;  %v3086_v49 = vld [vmem:[%s3715_s3 + $0x12c] sm:$0xf]  ;;  %v2369_v50 = vld [vmem:[%s3715_s3 + $0x140] sm:$0xf0]  ;;  %v2368_v53 = vor.u32 %v3089_v45, %v2367_v44 }
  0x59   : > { %v3134_v51 = vld [vmem:[%s3715_s3 + $0x2ac] sm:$0xf]  ;;  %v2561_v52 = vld [vmem:[%s3715_s3 + $0x2c0] sm:$0xf0]  ;;  %v2343_v54 = vld [vmem:[%s3715_s3 + $0xf8] sm:$0xf]  ;;  %v2560_v55 = vor.u32 %v3137_v48, %v2559_v46  ;;  %v2372_v56 = vor.u32 %v3086_v49, %v2369_v50 }
  0x5a   : > { %990 = vmatpush.bf16.msra.mxu0 %v2240_v17  ;;  %v3083_v57 = vld [vmem:[%s3715_s3 + $0x10c] sm:$0xf0]  ;;  %v2535_v58 = vld [vmem:[%s3715_s3 + $0x278] sm:$0xf]  ;;  %v2564_v60 = vor.u32 %v3134_v51, %v2561_v52  ;;  %v3080_v62 = vld [vmem:[%s3715_s3 + $0xfc] sm:$0xf] }
  0x5b   : > { %1003 = vmatpush.bf16.msra.mxu1 %v2432_v20  ;;  %1016 = vmatpush.bf16.msra.mxu2 %v2244_v21  ;;  %v400_v59 = vld [vmem:[%s3733_s2] sm:$0xff]  ;;  %v3128_v2 = vld [vmem:[%s3715_s3 + $0x27c] sm:$0xf]  ;;  %v2344_v4 = vor.u32 %v3083_v57, %v2343_v54  ;;  %v2319_v9 = vld [vmem:[%s3715_s3 + $0xc8] sm:$0xf]  ;;  %p2597_p1 = scmp.ne.s32.totalorder %s3564_s24, 2 }
  0x5c   : > { %1029 = vmatpush.bf16.msra.mxu3 %v2436_v25  ;;  %v3131_v61 = vld [vmem:[%s3715_s3 + $0x28c] sm:$0xf0]  ;;  %v2345_v63 = vld [vmem:[%s3715_s3 + $0x110] sm:$0xf0]  ;;  %v498_v0 = vunpack.c.l.b16 %v400_v59  ;;  %v499_v1 = vunpack.c.h.b16 %v400_v59  ;;  %v3077_v10 = vld [vmem:[%s3715_s3 + $0xdc] sm:$0xf0] }
  0x5d   : > { %v2537_v3 = vld [vmem:[%s3715_s3 + $0x290] sm:$0xf0]  ;;  %v2536_v7 = vor.u32 %v3131_v61, %v2535_v58  ;;  %v2348_v8 = vor.u32 %v3080_v62, %v2345_v63  ;;  %v2511_v11 = vld [vmem:[%s3715_s3 + $0x248] sm:$0xf]  ;;  %v3125_v13 = vld [vmem:[%s3715_s3 + $0x25c] sm:$0xf0]  ;;  %v2320_v18 = vor.u32 %v3077_v10, %v2319_v9 }
  0x5e   : > { %991 = vmatpush.bf16.msra.mxu0 %v2216_v32  ;;  %v3825_v5 = vpack.c.b16 %v498_v0, %v498_v0  ;;  %v3827_v6 = vpack.c.b16 %v499_v1, %v499_v1  ;;  %v2540_v12 = vor.u32 %v3128_v2, %v2537_v3  ;;  %v3074_v14 = vld [vmem:[%s3715_s3 + $0xcc] sm:$0xf]  ;;  %v2321_v15 = vld [vmem:[%s3715_s3 + $0xe0] sm:$0xf0]  ;;  %v2512_v19 = vor.u32 %v3125_v13, %v2511_v11  ;;  %v2295_v21 = vld [vmem:[%s3715_s3 + $0x98] sm:$0xf] }
  0x5f   : > { %1004 = vmatpush.bf16.msra.mxu1 %v2408_v36  ;;  %1017 = vmatpush.bf16.msra.mxu2 %v2220_v37  ;;  %v3122_v16 = vld [vmem:[%s3715_s3 + $0x24c] sm:$0xf]  ;;  %v2513_v17 = vld [vmem:[%s3715_s3 + $0x260] sm:$0xf0]  ;;  %v2324_v20 = vor.u32 %v3074_v14, %v2321_v15  ;;  %v3071_v22 = vld [vmem:[%s3715_s3 + $0xac] sm:$0xf0] }
  0x60   : > { %1030 = vmatpush.bf16.msra.mxu3 %v2412_v40  ;;  %v2487_v23 = vld [vmem:[%s3715_s3 + $0x218] sm:$0xf]  ;;  %v2516_v24 = vor.u32 %v3122_v16, %v2513_v17  ;;  %v3119_v25 = vld [vmem:[%s3715_s3 + $0x22c] sm:$0xf0]  ;;  %v3068_v26 = vld [vmem:[%s3715_s3 + $0x9c] sm:$0xf]  ;;  %v2296_v30 = vor.u32 %v3071_v22, %v2295_v21 }
  0x61   : > { %992 = vmatmul.bf16.vlgmr.msra.gmra.mxu0 %v3825_v5  ;;  %v2297_v27 = vld [vmem:[%s3715_s3 + $0xb0] sm:$0xf0]  ;;  %v3116_v28 = vld [vmem:[%s3715_s3 + $0x21c] sm:$0xf]  ;;  %v2488_v31 = vor.u32 %v3119_v25, %v2487_v23  ;;  %v2271_v33 = vld [vmem:[%s3715_s3 + $0x68] sm:$0xf] }
  0x62   : > { %1036 = vmatpush.bf16.msrb.mxu0 %v2392_v41  ;;  %1018 = vmatmul.bf16.vlgmr.msra.gmra.mxu2 %v3825_v5  ;;  %v2489_v29 = vld [vmem:[%s3715_s3 + $0x230] sm:$0xf0]  ;;  %v2300_v32 = vor.u32 %v3068_v26, %v2297_v27  ;;  %v3065_v34 = vld [vmem:[%s3715_s3 + $0x7c] sm:$0xf0]  ;;  %v2463_v35 = vld [vmem:[%s3715_s3 + $0x1e8] sm:$0xf] }
  0x63   : > { %1049 = vmatpush.bf16.msrb.mxu1 %v2584_v42  ;;  %1062 = vmatpush.bf16.msrb.mxu2 %v2396_v43  ;;  %v2492_v36 = vor.u32 %v3116_v28, %v2489_v29  ;;  %v3113_v37 = vld [vmem:[%s3715_s3 + $0x1fc] sm:$0xf0]  ;;  %v3062_v38 = vld [vmem:[%s3715_s3 + $0x6c] sm:$0xf]  ;;  %v2273_v39 = vld [vmem:[%s3715_s3 + $0x80] sm:$0xf0]  ;;  %v2272_v42 = vor.u32 %v3065_v34, %v2271_v33 }
  0x64   : > { %1075 = vmatpush.bf16.msrb.mxu3 %v2588_v47  ;;  %1005 = vmatmul.bf16.vlgmr.msra.gmra.mxu1 %v3827_v6  ;;  %v3110_v40 = vld [vmem:[%s3715_s3 + $0x1ec] sm:$0xf]  ;;  %v2465_v41 = vld [vmem:[%s3715_s3 + $0x200] sm:$0xf0]  ;;  %v2464_v43 = vor.u32 %v3113_v37, %v2463_v35  ;;  %v2276_v44 = vor.u32 %v3062_v38, %v2273_v39  ;;  %v2247_v45 = vld [vmem:[%s3715_s3 + $0x38] sm:$0xf] }
  0x65   : > { %1031 = vmatmul.bf16.vlgmr.msra.gmra.mxu3 %v3827_v6  ;;  %v3059_v46 = vld [vmem:[%s3715_s3 + $0x4c] sm:$0xf0]  ;;  %v2439_v47 = vld [vmem:[%s3715_s3 + $0x1b8] sm:$0xf]  ;;  %v2468_v48 = vor.u32 %v3110_v40, %v2465_v41  ;;  %v3056_v50 = vld [vmem:[%s3715_s3 + $0x3c] sm:$0xf] }
  0x66   : > { %1037 = vmatpush.bf16.msrb.mxu0 %v2368_v53  ;;  %v3107_v49 = vld [vmem:[%s3715_s3 + $0x1cc] sm:$0xf0]  ;;  %v2249_v51 = vld [vmem:[%s3715_s3 + $0x50] sm:$0xf0]  ;;  %v3104_v52 = vld [vmem:[%s3715_s3 + $0x1bc] sm:$0xf]  ;;  %v2248_v54 = vor.u32 %v3059_v46, %v2247_v45 }
  0x67   : > { %1050 = vmatpush.bf16.msrb.mxu1 %v2560_v55  ;;  %1063 = vmatpush.bf16.msrb.mxu2 %v2372_v56  ;;  %v2441_v53 = vld [vmem:[%s3715_s3 + $0x1d0] sm:$0xf0]  ;;  %v2223_v55 = vld [vmem:[%s3715_s3 + $0x8] sm:$0xf]  ;;  %v3053_v56 = vld [vmem:[%s3715_s3 + $0x1c] sm:$0xf0]  ;;  %v2440_v57 = vor.u32 %v3107_v49, %v2439_v47  ;;  %v2252_v58 = vor.u32 %v3056_v50, %v2249_v51 }
  0x68   : > { %1076 = vmatpush.bf16.msrb.mxu3 %v2564_v60  ;;  %v2415_v59 = vld [vmem:[%s3715_s3 + $0x188] sm:$0xf]  ;;  %v3101_v60 = vld [vmem:[%s3715_s3 + $0x19c] sm:$0xf0]  ;;  %v3050_v61 = vld [vmem:[%s3715_s3 + $0xc] sm:$0xf]  ;;  %v2444_v62 = vor.u32 %v3104_v52, %v2441_v53 }
  0x69   : > { %v2225_v63 = vld [vmem:[%s3715_s3 + $0x20] sm:$0xf0]  ;;  %v3098_v0 = vld [vmem:[%s3715_s3 + $0x18c] sm:$0xf]  ;;  %v2399_v2 = vld [vmem:[%s3715_s3 + $0x160] sm:$0xf]  ;;  %v2416_v11 = vor.u32 %v3101_v60, %v2415_v59 }
  0x6a   : > { %1038 = vmatpush.bf16.msrb.mxu0 %v2344_v4  ;;  %v2417_v1 = vld [vmem:[%s3715_s3 + $0x1a0] sm:$0xf0]  ;;  %v3096_v3 = vld [vmem:[%s3715_s3 + $0x174] sm:$0xf0]  ;;  %v2591_v4 = vld [vmem:[%s3715_s3 + $0x2e0] sm:$0xf] }
  0x6b   : > { %1051 = vmatpush.bf16.msrb.mxu1 %v2536_v7  ;;  %1064 = vmatpush.bf16.msrb.mxu2 %v2348_v8  ;;  %v2224_v7 = vor.u32 %v3053_v56, %v2223_v55  ;;  %v3144_v8 = vld [vmem:[%s3715_s3 + $0x2f4] sm:$0xf0]  ;;  %v3093_v9 = vld [vmem:[%s3715_s3 + $0x164] sm:$0xf]  ;;  %v2401_v10 = vld [vmem:[%s3715_s3 + $0x178] sm:$0xf0]  ;;  %v2420_v15 = vor.u32 %v3098_v0, %v2417_v1  ;;  %v2400_v16 = vor.u32 %v3096_v3, %v2399_v2 }
  0x6c   : > { %1077 = vmatpush.bf16.msrb.mxu3 %v2540_v12  ;;  %v2228_v12 = vor.u32 %v3050_v61, %v2225_v63  ;;  %v3141_v13 = vld [vmem:[%s3715_s3 + $0x2e4] sm:$0xf]  ;;  %v2593_v14 = vld [vmem:[%s3715_s3 + $0x2f8] sm:$0xf0]  ;;  %v2592_v17 = vor.u32 %v3144_v8, %v2591_v4  ;;  %v2567_v21 = vld [vmem:[%s3715_s3 + $0x2b0] sm:$0xf] }
  0x6d   : > { %v2596_v22 = vor.u32 %v3141_v13, %v2593_v14  ;;  %v3138_v23 = vld [vmem:[%s3715_s3 + $0x2c4] sm:$0xf0]  ;;  %v2377_v25 = vld [vmem:[%s3715_s3 + $0x148] sm:$0xf0]  ;;  %v3135_v26 = vld [vmem:[%s3715_s3 + $0x2b4] sm:$0xf] }
  0x6e   : > { %1039 = vmatpush.bf16.msrb.mxu0 %v2320_v18  ;;  %v2404_v18 = vor.u32 %v3093_v9, %v2401_v10  ;;  %v2569_v27 = vld [vmem:[%s3715_s3 + $0x2c8] sm:$0xf0]  ;;  %v2568_v29 = vor.u32 %v3138_v23, %v2567_v21  ;;  %v2543_v33 = vld [vmem:[%s3715_s3 + $0x280] sm:$0xf]  ;;  %v3132_v35 = vld [vmem:[%s3715_s3 + $0x294] sm:$0xf0] }
  0x6f   : > { %1052 = vmatpush.bf16.msrb.mxu1 %v2512_v19  ;;  %1065 = vmatpush.bf16.msrb.mxu2 %v2324_v20  ;;  %v2375_v19 = vld [vmem:[%s3715_s3 + $0x130] sm:$0xf]  ;;  %v3090_v20 = vld [vmem:[%s3715_s3 + $0x144] sm:$0xf0]  ;;  %v2572_v34 = vor.u32 %v3135_v26, %v2569_v27  ;;  %v2353_v37 = vld [vmem:[%s3715_s3 + $0x118] sm:$0xf0]  ;;  %v2544_v41 = vor.u32 %v3132_v35, %v2543_v33 }
  0x70   : > { %1078 = vmatpush.bf16.msrb.mxu3 %v2516_v24  ;;  %v3087_v24 = vld [vmem:[%s3715_s3 + $0x134] sm:$0xf]  ;;  %v2376_v28 = vor.u32 %v3090_v20, %v2375_v19  ;;  %v3129_v38 = vld [vmem:[%s3715_s3 + $0x284] sm:$0xf]  ;;  %v2545_v39 = vld [vmem:[%s3715_s3 + $0x298] sm:$0xf0] }
  0x71   : > { %v2519_v45 = vld [vmem:[%s3715_s3 + $0x250] sm:$0xf]  ;;  %v2548_v46 = vor.u32 %v3129_v38, %v2545_v39  ;;  %v3126_v47 = vld [vmem:[%s3715_s3 + $0x264] sm:$0xf0]  ;;  %v2329_v49 = vld [vmem:[%s3715_s3 + $0xe8] sm:$0xf0] }
  0x72   : > { %1040 = vmatpush.bf16.msrb.mxu0 %v2296_v30  ;;  %v2380_v30 = vor.u32 %v3087_v24, %v2377_v25  ;;  %v3123_v50 = vld [vmem:[%s3715_s3 + $0x254] sm:$0xf]  ;;  %v2521_v51 = vld [vmem:[%s3715_s3 + $0x268] sm:$0xf0]  ;;  %v2520_v53 = vor.u32 %v3126_v47, %v2519_v45  ;;  %v2303_v55 = vld [vmem:[%s3715_s3 + $0xa0] sm:$0xf] }
  0x73   : > { %1053 = vmatpush.bf16.msrb.mxu1 %v2488_v31  ;;  %1066 = vmatpush.bf16.msrb.mxu2 %v2300_v32  ;;  %v2351_v31 = vld [vmem:[%s3715_s3 + $0x100] sm:$0xf]  ;;  %v3084_v32 = vld [vmem:[%s3715_s3 + $0x114] sm:$0xf0]  ;;  %v3069_v60 = vld [vmem:[%s3715_s3 + $0xa4] sm:$0xf] }
  0x74   : > { %1079 = vmatpush.bf16.msrb.mxu3 %v2492_v36  ;;  %v3081_v36 = vld [vmem:[%s3715_s3 + $0x104] sm:$0xf]  ;;  %v2352_v40 = vor.u32 %v3084_v32, %v2351_v31  ;;  %v3072_v56 = vld [vmem:[%s3715_s3 + $0xb4] sm:$0xf0]  ;;  %v2305_v61 = vld [vmem:[%s3715_s3 + $0xb8] sm:$0xf0] }
  0x75   : > { %v3120_v59 = vld [vmem:[%s3715_s3 + $0x234] sm:$0xf0]  ;;  %v2497_v63 = vld [vmem:[%s3715_s3 + $0x238] sm:$0xf0]  ;;  %v2304_v0 = vor.u32 %v3072_v56, %v2303_v55  ;;  %v2308_v2 = vor.u32 %v3069_v60, %v2305_v61  ;;  %v2279_v3 = vld [vmem:[%s3715_s3 + $0x70] sm:$0xf] }
  0x76   : > { %1041 = vmatpush.bf16.msrb.mxu0 %v2272_v42  ;;  %v2356_v42 = vor.u32 %v3081_v36, %v2353_v37  ;;  %v3066_v4 = vld [vmem:[%s3715_s3 + $0x84] sm:$0xf0]  ;;  %v3063_v10 = vld [vmem:[%s3715_s3 + $0x74] sm:$0xf]  ;;  %v2473_v13 = vld [vmem:[%s3715_s3 + $0x208] sm:$0xf0] }
  0x77   : > { %1054 = vmatpush.bf16.msrb.mxu1 %v2464_v43  ;;  %1067 = vmatpush.bf16.msrb.mxu2 %v2276_v44  ;;  %v2327_v43 = vld [vmem:[%s3715_s3 + $0xd0] sm:$0xf]  ;;  %v3078_v44 = vld [vmem:[%s3715_s3 + $0xe4] sm:$0xf0]  ;;  %v2280_v14 = vor.u32 %v3066_v4, %v2279_v3  ;;  %v2447_v19 = vld [vmem:[%s3715_s3 + $0x1c0] sm:$0xf] }
  0x78   : > { %1080 = vmatpush.bf16.msrb.mxu3 %v2468_v48  ;;  %v3075_v48 = vld [vmem:[%s3715_s3 + $0xd4] sm:$0xf]  ;;  %v2328_v52 = vor.u32 %v3078_v44, %v2327_v43  ;;  %v3114_v9 = vld [vmem:[%s3715_s3 + $0x204] sm:$0xf0]  ;;  %v3108_v21 = vld [vmem:[%s3715_s3 + $0x1d4] sm:$0xf0] }
  0x79   : > { %v2257_v23 = vld [vmem:[%s3715_s3 + $0x58] sm:$0xf0]  ;;  %v3105_v24 = vld [vmem:[%s3715_s3 + $0x1c4] sm:$0xf]  ;;  %v2448_v27 = vor.u32 %v3108_v21, %v2447_v19  ;;  %v2423_v31 = vld [vmem:[%s3715_s3 + $0x190] sm:$0xf] }
  0x7a   : > { %1042 = vmatpush.bf16.msrb.mxu0 %v2248_v54  ;;  %v2332_v54 = vor.u32 %v3075_v48, %v2329_v49  ;;  %v2449_v25 = vld [vmem:[%s3715_s3 + $0x1d8] sm:$0xf0]  ;;  %v3102_v33 = vld [vmem:[%s3715_s3 + $0x1a4] sm:$0xf0]  ;;  %v2233_v35 = vld [vmem:[%s3715_s3 + $0x28] sm:$0xf0] }
  0x7b   : > { %1055 = vmatpush.bf16.msrb.mxu1 %v2440_v57  ;;  %1068 = vmatpush.bf16.msrb.mxu2 %v2252_v58  ;;  %v2495_v57 = vld [vmem:[%s3715_s3 + $0x220] sm:$0xf]  ;;  %v2524_v58 = vor.u32 %v3123_v50, %v2521_v51  ;;  %v2452_v32 = vor.u32 %v3105_v24, %v2449_v25  ;;  %v3099_v36 = vld [vmem:[%s3715_s3 + $0x194] sm:$0xf]  ;;  %v2425_v37 = vld [vmem:[%s3715_s3 + $0x1a8] sm:$0xf0]  ;;  %v2424_v39 = vor.u32 %v3102_v33, %v2423_v31 }
  0x7c   : > { %1081 = vmatpush.bf16.msrb.mxu3 %v2444_v62  ;;  %v3117_v62 = vld [vmem:[%s3715_s3 + $0x224] sm:$0xf]  ;;  %v2496_v1 = vor.u32 %v3120_v59, %v2495_v57  ;;  %v394_v43 = vld [vmem:[#allocation2 + $0x28] sm:$0xff]  ;;  %v397_v60 = vld [vmem:[#allocation2] sm:$0xff] }
  0x7d   : > { %v2500_v8 = vor.u32 %v3117_v62, %v2497_v63  ;;  %v395_v48 = vld [vmem:[#allocation2 + $0x10] sm:$0xff] }
  0x7e   : > { %1043 = vmatpush.bf16.msrb.mxu0 %v2224_v7  ;;  %v2471_v7 = vld [vmem:[%s3715_s3 + $0x1f0] sm:$0xf] }
  0x7f   : > { %1056 = vmatpush.bf16.msrb.mxu1 %v2416_v11  ;;  %1069 = vmatpush.bf16.msrb.mxu2 %v2228_v12  ;;  %v2281_v11 = vld [vmem:[%s3715_s3 + $0x88] sm:$0xf0]  ;;  %v3111_v12 = vld [vmem:[%s3715_s3 + $0x1f4] sm:$0xf] }
  0x80   : > { %1082 = vmatpush.bf16.msrb.mxu3 %v2420_v15  ;;  %v2472_v15 = vor.u32 %v3114_v9, %v2471_v7  ;;  %v2476_v20 = vor.u32 %v3111_v12, %v2473_v13  ;;  %v398_v7 = vld [vmem:[#allocation2 + $0x18] sm:$0xff]  ;;  %v399_v12 = vld [vmem:[#allocation2 + $0x20] sm:$0xff] }
  0x81   : > { %1044 = vmatmul.bf16.vlgmr.msrb.gmra.mxu0 %v3825_v5 }
  0x82   : > { %1088 = vmatpush.bf16.msra.mxu0 %v2400_v16  ;;  %1070 = vmatmul.bf16.vlgmr.msrb.gmra.mxu2 %v3825_v5  ;;  %v2284_v16 = vor.u32 %v3063_v10, %v2281_v11 }
  0x83   : > { %1101 = vmatpush.bf16.msra.mxu1 %v2592_v17  ;;  %1114 = vmatpush.bf16.msra.mxu2 %v2404_v18  ;;  %v2255_v17 = vld [vmem:[%s3715_s3 + $0x40] sm:$0xf]  ;;  %v3060_v18 = vld [vmem:[%s3715_s3 + $0x54] sm:$0xf0] }
  0x84   : > { %1127 = vmatpush.bf16.msra.mxu3 %v2596_v22  ;;  %1057 = vmatmul.bf16.vlgmr.msrb.gmra.mxu1 %v3827_v6  ;;  %v3057_v22 = vld [vmem:[%s3715_s3 + $0x44] sm:$0xf]  ;;  %v2256_v26 = vor.u32 %v3060_v18, %v2255_v17 }
  0x85   : > { %1083 = vmatmul.bf16.vlgmr.msrb.gmra.mxu3 %v3827_v6 }
  0x86   : > { %1089 = vmatpush.bf16.msra.mxu0 %v2376_v28  ;;  %v2260_v28 = vor.u32 %v3057_v22, %v2257_v23 }
  0x87   : > { %1102 = vmatpush.bf16.msra.mxu1 %v2568_v29  ;;  %1115 = vmatpush.bf16.msra.mxu2 %v2380_v30  ;;  %v2231_v29 = vld [vmem:[%s3715_s3 + $0x10] sm:$0xf]  ;;  %v3054_v30 = vld [vmem:[%s3715_s3 + $0x24] sm:$0xf0] }
  0x88   : > { %1128 = vmatpush.bf16.msra.mxu3 %v2572_v34  ;;  %v3051_v34 = vld [vmem:[%s3715_s3 + $0x14] sm:$0xf]  ;;  %v2232_v38 = vor.u32 %v3054_v30, %v2231_v29 }
  0x8a   : > { %1090 = vmatpush.bf16.msra.mxu0 %v2352_v40  ;;  %v2236_v40 = vor.u32 %v3051_v34, %v2233_v35 }
  0x8b   : > { %1103 = vmatpush.bf16.msra.mxu1 %v2544_v41  ;;  %1116 = vmatpush.bf16.msra.mxu2 %v2356_v42  ;;  %v2428_v41 = vor.u32 %v3099_v36, %v2425_v37 }
  0x8c   : > { %1129 = vmatpush.bf16.msra.mxu3 %v2548_v46 }
  0x8e   : > { %1091 = vmatpush.bf16.msra.mxu0 %v2328_v52 }
  0x8f   : > { %1104 = vmatpush.bf16.msra.mxu1 %v2520_v53  ;;  %1117 = vmatpush.bf16.msra.mxu2 %v2332_v54 }
  0x90   : > { %1130 = vmatpush.bf16.msra.mxu3 %v2524_v58 }
  0x92   : > { %1092 = vmatpush.bf16.msra.mxu0 %v2304_v0 }
  0x93   : > { %1105 = vmatpush.bf16.msra.mxu1 %v2496_v1  ;;  %1118 = vmatpush.bf16.msra.mxu2 %v2308_v2 }
  0x94   : > { %1131 = vmatpush.bf16.msra.mxu3 %v2500_v8 }
  0x96   : > { %1093 = vmatpush.bf16.msra.mxu0 %v2280_v14 }
  0x97   : > { %1106 = vmatpush.bf16.msra.mxu1 %v2472_v15  ;;  %1119 = vmatpush.bf16.msra.mxu2 %v2284_v16 }
  0x98   : > { %1132 = vmatpush.bf16.msra.mxu3 %v2476_v20 }
  0x9a   : > { %1094 = vmatpush.bf16.msra.mxu0 %v2256_v26 }
  0x9b   : > { %1107 = vmatpush.bf16.msra.mxu1 %v2448_v27  ;;  %1120 = vmatpush.bf16.msra.mxu2 %v2260_v28 }
  0x9c   : > { %1133 = vmatpush.bf16.msra.mxu3 %v2452_v32 }
  0x9e   : > { %1095 = vmatpush.bf16.msra.mxu0 %v2232_v38 }
  0x9f   : > { %1108 = vmatpush.bf16.msra.mxu1 %v2424_v39  ;;  %1121 = vmatpush.bf16.msra.mxu2 %v2236_v40 }
  0xa0   : > { %1134 = vmatpush.bf16.msra.mxu3 %v2428_v41 }
  0xa1   : > { %1096 = vmatmul.bf16.vlgmr.msra.gmra.mxu0 %v3825_v5 }
  0xa2   : > { %1109 = vmatmul.bf16.vlgmr.msra.gmra.mxu1 %v3827_v6  ;;  %1122 = vmatmul.bf16.vlgmr.msra.gmra.mxu2 %v3825_v5  ;;  %v396_v5 = vld [vmem:[#allocation2 + $0x8] sm:$0xff] }
  0xa3   : > { %1135 = vmatmul.bf16.vlgmr.msra.gmra.mxu3 %v3827_v6 }
  0xde   : > { %v993_v42 = vpop.f32.mrf.mxu0 }
  0xe1   : > { %v1006_v44 = vpop.f32.mrf.mxu1 }
  0xe2   : > { %v1007_v45 = vadd.f32 %v1006_v44, %v993_v42 }
  0xe4   : > { %v1140_v46 = vadd.f32 %v1007_v45, %v394_v43 }
  0xe5   : > { %v1019_v47 = vpop.f32.mrf.mxu2 }
  0xe6   : > { %1146 = vst [vmem:[#allocation2 + $0x28] sm:$0xff] %v1140_v46  ;;  %v995_v51 = vpop.f32.mrf.mxu0 }
  0xe8   : > { %v1032_v49 = vpop.f32.mrf.mxu3 }
  0xe9   : > { %v1033_v50 = vadd.f32 %v1032_v49, %v1019_v47  ;;  %v1008_v53 = vpop.f32.mrf.mxu1 }
  0xeb   : > { %v1141_v52 = vadd.f32 %v1033_v50, %v395_v48 }
  0xed   : > { %1147 = vst [vmem:[#allocation2 + $0x10] sm:$0xff] %v1141_v52  ;;  %v1021_v54 = vpop.f32.mrf.mxu2 }
  0xf0   : > { %v1034_v55 = vpop.f32.mrf.mxu3 }
  0xfe   : > { %v1045_v56 = vpop.f32.mrf.mxu0 }
 0x101   : > { %v1058_v57 = vpop.f32.mrf.mxu1 }
 0x102   : > { %v1059_v6 = vadd.f32 %v1058_v57, %v1045_v56 }
 0x104   : > { %v1142_v58 = vadd.f32 %v1059_v6, %v396_v5 }
 0x105   : > { %v1071_v59 = vpop.f32.mrf.mxu2 }
 0x106   : > { %1148 = vst [vmem:[#allocation2 + $0x8] sm:$0xff] %v1142_v58  ;;  %v1047_v63 = vpop.f32.mrf.mxu0 }
 0x108   : > { %v1084_v61 = vpop.f32.mrf.mxu3 }
 0x109   : > { %v1085_v62 = vadd.f32 %v1084_v61, %v1071_v59  ;;  %v1060_v1 = vpop.f32.mrf.mxu1 }
 0x10b   : > { %v1143_v0 = vadd.f32 %v1085_v62, %v397_v60 }
 0x10d   : > { %1149 = vst [vmem:[#allocation2] sm:$0xff] %v1143_v0  ;;  %v1073_v2 = vpop.f32.mrf.mxu2 }
 0x110   : > { %v1086_v3 = vpop.f32.mrf.mxu3 }
 0x11e   : > { %v1097_v4 = vpop.f32.mrf.mxu0 }
 0x11f   : > { %v1110_v8 = vpop.f32.mrf.mxu1 }
 0x120   : > { %v1111_v9 = vadd.f32 %v1110_v8, %v1097_v4 }
 0x122   : > { %v1144_v10 = vadd.f32 %v1111_v9, %v398_v7 }
 0x124   : > { %1150 = vst [vmem:[#allocation2 + $0x18] sm:$0xff] %v1144_v10 }
 0x125   : > { %v1123_v11 = vpop.f32.mrf.mxu2 }
 0x126   : > { %v1136_v13 = vpop.f32.mrf.mxu3  ;;  %v1099_v14 = vpop.f32.mrf.mxu0 }
 0x127   : > { %v1137_v15 = vadd.f32 %v1136_v13, %v1123_v11  ;;  %v1112_v16 = vpop.f32.mrf.mxu1 }
 0x129   : > { %v1145_v17 = vadd.f32 %v1137_v15, %v399_v12 }
 0x12a   : > { %1155 = sbr.rel (%p2597_p1) target bundleno = 677 (0x2a5), region = 72 }
 0x12b   : > { %1151 = vst [vmem:[#allocation2 + $0x20] sm:$0xff] %v1145_v17 }
 0x12d   : > { %v1125_v18 = vpop.f32.mrf.mxu2 }
 0x12e   : > { %v1138_v19 = vpop.f32.mrf.mxu3 }
 0x12f   : > { %v2656_v20 = vld [vmem:[#allocation5 + $0x70] sm:$0xf]  ;;  %v3160_v21 = vld [vmem:[#allocation5 + $0x74] sm:$0xf0]  ;;  %v2648_v31 = vld [vmem:[#allocation5 + $0x60] sm:$0xf] }
 0x130   : > { %v2720_v22 = vld [vmem:[#allocation5 + $0xf0] sm:$0xf]  ;;  %v2657_v23 = vor.u32 %v3160_v21, %v2656_v20  ;;  %v3176_v24 = vld [vmem:[#allocation5 + $0xf4] sm:$0xf0]  ;;  %v3158_v33 = vld [vmem:[#allocation5 + $0x64] sm:$0xf0] }
 0x131   : > { %v2784_v25 = vld [vmem:[#allocation5 + $0x170] sm:$0xf]  ;;  %v3192_v26 = vld [vmem:[#allocation5 + $0x174] sm:$0xf0]  ;;  %v2721_v27 = vor.u32 %v3176_v24, %v2720_v22  ;;  %v2712_v34 = vld [vmem:[#allocation5 + $0xe0] sm:$0xf]  ;;  %v2649_v36 = vor.u32 %v3158_v33, %v2648_v31 }
 0x132   : > { %v2785_v28 = vor.u32 %v3192_v26, %v2784_v25  ;;  %v2848_v29 = vld [vmem:[#allocation5 + $0x1f0] sm:$0xf]  ;;  %v3208_v30 = vld [vmem:[#allocation5 + $0x1f4] sm:$0xf0]  ;;  %1750 = vmatpush.bf16.msra.mxu0 %v2657_v23  ;;  %v3174_v35 = vld [vmem:[#allocation5 + $0xe4] sm:$0xf0] }
 0x133   : > { %v2849_v32 = vor.u32 %v3208_v30, %v2848_v29  ;;  %1763 = vmatpush.bf16.msra.mxu1 %v2721_v27  ;;  %v2713_v37 = vor.u32 %v3174_v35, %v2712_v34  ;;  %v2776_v38 = vld [vmem:[#allocation5 + $0x160] sm:$0xf]  ;;  %v3190_v39 = vld [vmem:[#allocation5 + $0x164] sm:$0xf0]  ;;  %v2640_v43 = vld [vmem:[#allocation5 + $0x50] sm:$0xf] }
 0x134   : > { %1776 = vmatpush.bf16.msra.mxu2 %v2785_v28  ;;  %v2840_v40 = vld [vmem:[#allocation5 + $0x1e0] sm:$0xf]  ;;  %v2777_v41 = vor.u32 %v3190_v39, %v2776_v38  ;;  %v3206_v42 = vld [vmem:[#allocation5 + $0x1e4] sm:$0xf0]  ;;  %v3156_v44 = vld [vmem:[#allocation5 + $0x54] sm:$0xf0] }
 0x135   : > { %1789 = vmatpush.bf16.msra.mxu3 %v2849_v32  ;;  %v2841_v45 = vor.u32 %v3206_v42, %v2840_v40  ;;  %v2704_v46 = vld [vmem:[#allocation5 + $0xd0] sm:$0xf]  ;;  %v3172_v47 = vld [vmem:[#allocation5 + $0xd4] sm:$0xf0]  ;;  %v2641_v49 = vor.u32 %v3156_v44, %v2640_v43  ;;  %v2632_v55 = vld [vmem:[#allocation5 + $0x40] sm:$0xf] }
 0x136   : > { %v2768_v48 = vld [vmem:[#allocation5 + $0x150] sm:$0xf]  ;;  %1751 = vmatpush.bf16.msra.mxu0 %v2649_v36  ;;  %v3188_v50 = vld [vmem:[#allocation5 + $0x154] sm:$0xf0]  ;;  %v2705_v53 = vor.u32 %v3172_v47, %v2704_v46  ;;  %v3154_v56 = vld [vmem:[#allocation5 + $0x44] sm:$0xf0] }
 0x137   : > { %v2832_v51 = vld [vmem:[#allocation5 + $0x1d0] sm:$0xf]  ;;  %v3204_v52 = vld [vmem:[#allocation5 + $0x1d4] sm:$0xf0]  ;;  %1764 = vmatpush.bf16.msra.mxu1 %v2713_v37  ;;  %v2769_v54 = vor.u32 %v3188_v50, %v2768_v48  ;;  %v2696_v5 = vld [vmem:[#allocation5 + $0xc0] sm:$0xf]  ;;  %v2633_v62 = vor.u32 %v3154_v56, %v2632_v55 }
 0x138   : > { %1777 = vmatpush.bf16.msra.mxu2 %v2777_v41  ;;  %v2833_v57 = vor.u32 %v3204_v52, %v2832_v51  ;;  %v3170_v6 = vld [vmem:[#allocation5 + $0xc4] sm:$0xf0]  ;;  %v2760_v58 = vld [vmem:[#allocation5 + $0x140] sm:$0xf]  ;;  %v2624_v1 = vld [vmem:[#allocation5 + $0x30] sm:$0xf] }
 0x139   : > { %1790 = vmatpush.bf16.msra.mxu3 %v2841_v45  ;;  %v3186_v59 = vld [vmem:[#allocation5 + $0x144] sm:$0xf0]  ;;  %v2824_v60 = vld [vmem:[#allocation5 + $0x1c0] sm:$0xf]  ;;  %v2697_v63 = vor.u32 %v3170_v6, %v2696_v5  ;;  %v3152_v2 = vld [vmem:[#allocation5 + $0x34] sm:$0xf0] }
 0x13a   : > { %v3202_v61 = vld [vmem:[#allocation5 + $0x1c4] sm:$0xf0]  ;;  %1752 = vmatpush.bf16.msra.mxu0 %v2641_v49  ;;  %v2761_v0 = vor.u32 %v3186_v59, %v2760_v58  ;;  %v2688_v3 = vld [vmem:[#allocation5 + $0xb0] sm:$0xf]  ;;  %v3168_v7 = vld [vmem:[#allocation5 + $0xb4] sm:$0xf0]  ;;  %v2625_v12 = vor.u32 %v3152_v2, %v2624_v1 }
 0x13b   : > { %1765 = vmatpush.bf16.msra.mxu1 %v2705_v53  ;;  %v2825_v4 = vor.u32 %v3202_v61, %v2824_v60  ;;  %v2752_v8 = vld [vmem:[#allocation5 + $0x130] sm:$0xf]  ;;  %v3184_v9 = vld [vmem:[#allocation5 + $0x134] sm:$0xf0]  ;;  %v2689_v13 = vor.u32 %v3168_v7, %v2688_v3  ;;  %v2616_v15 = vld [vmem:[#allocation5 + $0x20] sm:$0xf] }
 0x13c   : > { %1778 = vmatpush.bf16.msra.mxu2 %v2769_v54  ;;  %v2816_v10 = vld [vmem:[#allocation5 + $0x1b0] sm:$0xf]  ;;  %v3200_v11 = vld [vmem:[#allocation5 + $0x1b4] sm:$0xf0]  ;;  %v2753_v14 = vor.u32 %v3184_v9, %v2752_v8  ;;  %v3150_v16 = vld [vmem:[#allocation5 + $0x24] sm:$0xf0] }
 0x13d   : > { %1791 = vmatpush.bf16.msra.mxu3 %v2833_v57  ;;  %v2680_v17 = vld [vmem:[#allocation5 + $0xa0] sm:$0xf]  ;;  %v2817_v18 = vor.u32 %v3200_v11, %v2816_v10  ;;  %v3166_v19 = vld [vmem:[#allocation5 + $0xa4] sm:$0xf0]  ;;  %v2617_v24 = vor.u32 %v3150_v16, %v2616_v15  ;;  %v2608_v27 = vld [vmem:[#allocation5 + $0x10] sm:$0xf] }
 0x13e   : > { %1753 = vmatpush.bf16.msra.mxu0 %v2633_v62  ;;  %v2744_v20 = vld [vmem:[#allocation5 + $0x120] sm:$0xf]  ;;  %v3182_v21 = vld [vmem:[#allocation5 + $0x124] sm:$0xf0]  ;;  %v2681_v25 = vor.u32 %v3166_v19, %v2680_v17  ;;  %v3148_v28 = vld [vmem:[#allocation5 + $0x14] sm:$0xf0] }
 0x13f   : > { %1766 = vmatpush.bf16.msra.mxu1 %v2697_v63  ;;  %v2808_v22 = vld [vmem:[#allocation5 + $0x1a0] sm:$0xf]  ;;  %v3198_v23 = vld [vmem:[#allocation5 + $0x1a4] sm:$0xf0]  ;;  %v2745_v26 = vor.u32 %v3182_v21, %v2744_v20  ;;  %v2672_v29 = vld [vmem:[#allocation5 + $0x90] sm:$0xf]  ;;  %v2609_v36 = vor.u32 %v3148_v28, %v2608_v27 }
 0x140   : > { %1779 = vmatpush.bf16.msra.mxu2 %v2761_v0  ;;  %v2809_v30 = vor.u32 %v3198_v23, %v2808_v22  ;;  %v3164_v31 = vld [vmem:[#allocation5 + $0x94] sm:$0xf0]  ;;  %v2736_v32 = vld [vmem:[#allocation5 + $0x110] sm:$0xf]  ;;  %v2600_v37 = vld [vmem:[#allocation5] sm:$0xf] }
 0x141   : > { %1792 = vmatpush.bf16.msra.mxu3 %v2825_v4  ;;  %v3180_v33 = vld [vmem:[#allocation5 + $0x114] sm:$0xf0]  ;;  %v2800_v34 = vld [vmem:[#allocation5 + $0x190] sm:$0xf]  ;;  %v3146_v38 = vld [vmem:[#allocation5 + $0x4] sm:$0xf0]  ;;  %v2673_v39 = vor.u32 %v3164_v31, %v2672_v29 }
 0x142   : > { %1754 = vmatpush.bf16.msra.mxu0 %v2625_v12  ;;  %v3196_v35 = vld [vmem:[#allocation5 + $0x194] sm:$0xf0]  ;;  %v2737_v40 = vor.u32 %v3180_v33, %v2736_v32  ;;  %v2664_v41 = vld [vmem:[#allocation5 + $0x80] sm:$0xf]  ;;  %v3162_v42 = vld [vmem:[#allocation5 + $0x84] sm:$0xf0]  ;;  %v2601_v51 = vor.u32 %v3146_v38, %v2600_v37 }
 0x143   : > { %1767 = vmatpush.bf16.msra.mxu1 %v2689_v13  ;;  %v2728_v43 = vld [vmem:[#allocation5 + $0x100] sm:$0xf]  ;;  %v2801_v44 = vor.u32 %v3196_v35, %v2800_v34  ;;  %v3178_v45 = vld [vmem:[#allocation5 + $0x104] sm:$0xf0]  ;;  %v2912_v48 = vld [vmem:[#allocation5 + $0x270] sm:$0xf]  ;;  %v2665_v55 = vor.u32 %v3162_v42, %v2664_v41 }
 0x144   : > { %1780 = vmatpush.bf16.msra.mxu2 %v2753_v14  ;;  %v2792_v46 = vld [vmem:[#allocation5 + $0x180] sm:$0xf]  ;;  %v3194_v47 = vld [vmem:[#allocation5 + $0x184] sm:$0xf0]  ;;  %v3224_v49 = vld [vmem:[#allocation5 + $0x274] sm:$0xf0]  ;;  %v2729_v56 = vor.u32 %v3178_v45, %v2728_v43 }
 0x145   : > { %1793 = vmatpush.bf16.msra.mxu3 %v2817_v18  ;;  %v2976_v50 = vld [vmem:[#allocation5 + $0x2f0] sm:$0xf]  ;;  %v3240_v52 = vld [vmem:[#allocation5 + $0x2f4] sm:$0xf0]  ;;  %v3159_v53 = vld [vmem:[#allocation5 + $0x74] sm:$0xf]  ;;  %v2793_v6 = vor.u32 %v3194_v47, %v2792_v46  ;;  %v2913_v58 = vor.u32 %v3224_v49, %v2912_v48 }
 0x146   : > { %1755 = vmatpush.bf16.msra.mxu0 %v2617_v24  ;;  %v2658_v54 = vld [vmem:[#allocation5 + $0x78] sm:$0xf0]  ;;  %v3175_v5 = vld [vmem:[#allocation5 + $0xf4] sm:$0xf]  ;;  %v2977_v59 = vor.u32 %v3240_v52, %v2976_v50  ;;  %v2904_v61 = vld [vmem:[#allocation5 + $0x260] sm:$0xf] }
 0x147   : > { %1768 = vmatpush.bf16.msra.mxu1 %v2681_v25  ;;  %v2722_v57 = vld [vmem:[#allocation5 + $0xf8] sm:$0xf0]  ;;  %v2661_v60 = vor.u32 %v3159_v53, %v2658_v54  ;;  %v3222_v62 = vld [vmem:[#allocation5 + $0x264] sm:$0xf0]  ;;  %v2968_v63 = vld [vmem:[#allocation5 + $0x2e0] sm:$0xf] }
 0x148   : > { %1781 = vmatpush.bf16.msra.mxu2 %v2745_v26  ;;  %v2725_v0 = vor.u32 %v3175_v5, %v2722_v57  ;;  %v3238_v1 = vld [vmem:[#allocation5 + $0x2e4] sm:$0xf0]  ;;  %v3157_v2 = vld [vmem:[#allocation5 + $0x64] sm:$0xf]  ;;  %v2650_v3 = vld [vmem:[#allocation5 + $0x68] sm:$0xf0]  ;;  %v2905_v9 = vor.u32 %v3222_v62, %v2904_v61 }
 0x149   : > { %1794 = vmatpush.bf16.msra.mxu3 %v2809_v30  ;;  %v3173_v4 = vld [vmem:[#allocation5 + $0xe4] sm:$0xf]  ;;  %v2714_v7 = vld [vmem:[#allocation5 + $0xe8] sm:$0xf0]  ;;  %v1156_v8 = vld [vmem:[#allocation2 + $0x28] sm:$0xff]  ;;  %v2969_v13 = vor.u32 %v3238_v1, %v2968_v63  ;;  %v2653_v14 = vor.u32 %v3157_v2, %v2650_v3 }
 0x14a   : > { %1756 = vmatpush.bf16.msra.mxu0 %v2609_v36  ;;  %v2896_v10 = vld [vmem:[#allocation5 + $0x250] sm:$0xf]  ;;  %v3220_v11 = vld [vmem:[#allocation5 + $0x254] sm:$0xf0]  ;;  %v3946_v12 = vpack.c.bf16 %v1156_v8, %v1156_v8  ;;  %v3155_v17 = vld [vmem:[#allocation5 + $0x54] sm:$0xf]  ;;  %v2717_v18 = vor.u32 %v3173_v4, %v2714_v7 }
 0x14b   : > { %1769 = vmatpush.bf16.msra.mxu1 %v2673_v39  ;;  %v2960_v15 = vld [vmem:[#allocation5 + $0x2d0] sm:$0xf]  ;;  %v3236_v16 = vld [vmem:[#allocation5 + $0x2d4] sm:$0xf0]  ;;  %v2642_v19 = vld [vmem:[#allocation5 + $0x58] sm:$0xf0]  ;;  %v2897_v26 = vor.u32 %v3220_v11, %v2896_v10 }
 0x14c   : > { %1782 = vmatpush.bf16.msra.mxu2 %v2737_v40  ;;  %v1157_v20 = vld [vmem:[#allocation2 + $0x10] sm:$0xff]  ;;  %v1158_v21 = vld [vmem:[#allocation2 + $0x8] sm:$0xff]  ;;  %v3171_v22 = vld [vmem:[#allocation5 + $0xd4] sm:$0xf]  ;;  %v2961_v28 = vor.u32 %v3236_v16, %v2960_v15  ;;  %v2645_v29 = vor.u32 %v3155_v17, %v2642_v19 }
 0x14d   : > { %1795 = vmatpush.bf16.msra.mxu3 %v2801_v44  ;;  %v2706_v23 = vld [vmem:[#allocation5 + $0xd8] sm:$0xf0]  ;;  %v3949_v24 = vpack.c.bf16 %v1157_v20, %v1157_v20  ;;  %v3951_v25 = vpack.c.bf16 %v1158_v21, %v1158_v21  ;;  %v2888_v27 = vld [vmem:[#allocation5 + $0x240] sm:$0xf]  ;;  %v3218_v30 = vld [vmem:[#allocation5 + $0x244] sm:$0xf0] }
 0x14e   : > { %1757 = vmatpush.bf16.msra.mxu0 %v2601_v51  ;;  %v2952_v31 = vld [vmem:[#allocation5 + $0x2c0] sm:$0xf]  ;;  %v1159_v32 = vld [vmem:[#allocation2] sm:$0xff]  ;;  %v2709_v33 = vor.u32 %v3171_v22, %v2706_v23  ;;  %v3234_v34 = vld [vmem:[#allocation5 + $0x2c4] sm:$0xf0]  ;;  %v2889_v40 = vor.u32 %v3218_v30, %v2888_v27 }
 0x14f   : > { %1770 = vmatpush.bf16.msra.mxu1 %v2665_v55  ;;  %v3153_v35 = vld [vmem:[#allocation5 + $0x44] sm:$0xf]  ;;  %v2634_v36 = vld [vmem:[#allocation5 + $0x48] sm:$0xf0]  ;;  %v3954_v37 = vpack.c.bf16 %v1159_v32, %v1159_v32  ;;  %v2953_v41 = vor.u32 %v3234_v34, %v2952_v31  ;;  %v2880_v43 = vld [vmem:[#allocation5 + $0x230] sm:$0xf] }
 0x150   : > { %1783 = vmatpush.bf16.msra.mxu2 %v2729_v56  ;;  %v3169_v38 = vld [vmem:[#allocation5 + $0xc4] sm:$0xf]  ;;  %v2698_v39 = vld [vmem:[#allocation5 + $0xc8] sm:$0xf0]  ;;  %v2637_v42 = vor.u32 %v3153_v35, %v2634_v36  ;;  %v3216_v44 = vld [vmem:[#allocation5 + $0x234] sm:$0xf0] }
 0x151   : > { %1796 = vmatpush.bf16.msra.mxu3 %v2793_v6  ;;  %1758 = vmatmul.bf16.vlgmr.msra.gmra.mxu0 %v3946_v12  ;;  %v2944_v45 = vld [vmem:[#allocation5 + $0x2b0] sm:$0xf]  ;;  %v2701_v46 = vor.u32 %v3169_v38, %v2698_v39  ;;  %v3232_v47 = vld [vmem:[#allocation5 + $0x2b4] sm:$0xf0]  ;;  %v3151_v48 = vld [vmem:[#allocation5 + $0x34] sm:$0xf]  ;;  %v2881_v52 = vor.u32 %v3216_v44, %v2880_v43 }
 0x152   : > { %1802 = vmatpush.bf16.msrb.mxu0 %v2913_v58  ;;  %1771 = vmatmul.bf16.vlgmr.msra.gmra.mxu1 %v3949_v24  ;;  %v2626_v49 = vld [vmem:[#allocation5 + $0x38] sm:$0xf0]  ;;  %v3167_v50 = vld [vmem:[#allocation5 + $0xb4] sm:$0xf]  ;;  %v2945_v53 = vor.u32 %v3232_v47, %v2944_v45  ;;  %v2872_v55 = vld [vmem:[#allocation5 + $0x220] sm:$0xf] }
 0x153   : > { %1815 = vmatpush.bf16.msrb.mxu1 %v2977_v59  ;;  %1784 = vmatmul.bf16.vlgmr.msra.gmra.mxu2 %v3951_v25  ;;  %v2690_v51 = vld [vmem:[#allocation5 + $0xb8] sm:$0xf0]  ;;  %v2629_v54 = vor.u32 %v3151_v48, %v2626_v49  ;;  %v3214_v56 = vld [vmem:[#allocation5 + $0x224] sm:$0xf0]  ;;  %v2936_v5 = vld [vmem:[#allocation5 + $0x2a0] sm:$0xf] }
 0x154   : > { %1828 = vmatpush.bf16.msrb.mxu2 %v2661_v60  ;;  %1797 = vmatmul.bf16.vlgmr.msra.gmra.mxu3 %v3954_v37  ;;  %v2693_v57 = vor.u32 %v3167_v50, %v2690_v51  ;;  %v3230_v6 = vld [vmem:[#allocation5 + $0x2a4] sm:$0xf0]  ;;  %v3149_v58 = vld [vmem:[#allocation5 + $0x24] sm:$0xf]  ;;  %v2618_v59 = vld [vmem:[#allocation5 + $0x28] sm:$0xf0]  ;;  %v2873_v62 = vor.u32 %v3214_v56, %v2872_v55 }
 0x155   : > { %1841 = vmatpush.bf16.msrb.mxu3 %v2725_v0  ;;  %v3165_v60 = vld [vmem:[#allocation5 + $0xa4] sm:$0xf]  ;;  %v2682_v61 = vld [vmem:[#allocation5 + $0xa8] sm:$0xf0]  ;;  %v2937_v63 = vor.u32 %v3230_v6, %v2936_v5  ;;  %v2621_v0 = vor.u32 %v3149_v58, %v2618_v59  ;;  %v2864_v1 = vld [vmem:[#allocation5 + $0x210] sm:$0xf] }
 0x156   : > { %1803 = vmatpush.bf16.msrb.mxu0 %v2905_v9  ;;  %v3212_v2 = vld [vmem:[#allocation5 + $0x214] sm:$0xf0]  ;;  %v2928_v3 = vld [vmem:[#allocation5 + $0x290] sm:$0xf]  ;;  %v2685_v4 = vor.u32 %v3165_v60, %v2682_v61  ;;  %v3147_v8 = vld [vmem:[#allocation5 + $0x14] sm:$0xf] }
 0x157   : > { %1816 = vmatpush.bf16.msrb.mxu1 %v2969_v13  ;;  %v3228_v7 = vld [vmem:[#allocation5 + $0x294] sm:$0xf0]  ;;  %v2610_v9 = vld [vmem:[#allocation5 + $0x18] sm:$0xf0]  ;;  %v3163_v10 = vld [vmem:[#allocation5 + $0x94] sm:$0xf]  ;;  %v2865_v13 = vor.u32 %v3212_v2, %v2864_v1 }
 0x158   : > { %1829 = vmatpush.bf16.msrb.mxu2 %v2653_v14  ;;  %v2674_v11 = vld [vmem:[#allocation5 + $0x98] sm:$0xf0]  ;;  %v2856_v14 = vld [vmem:[#allocation5 + $0x200] sm:$0xf]  ;;  %v3210_v15 = vld [vmem:[#allocation5 + $0x204] sm:$0xf0]  ;;  %v2929_v16 = vor.u32 %v3228_v7, %v2928_v3  ;;  %v2613_v17 = vor.u32 %v3147_v8, %v2610_v9 }
 0x159   : > { %1842 = vmatpush.bf16.msrb.mxu3 %v2717_v18  ;;  %v2920_v18 = vld [vmem:[#allocation5 + $0x280] sm:$0xf]  ;;  %v3226_v19 = vld [vmem:[#allocation5 + $0x284] sm:$0xf0]  ;;  %v3145_v20 = vld [vmem:[#allocation5 + $0x4] sm:$0xf]  ;;  %v2677_v21 = vor.u32 %v3163_v10, %v2674_v11  ;;  %v2857_v30 = vor.u32 %v3210_v15, %v2856_v14 }
 0x15a   : > { %1804 = vmatpush.bf16.msrb.mxu0 %v2897_v26  ;;  %v2602_v22 = vld [vmem:[#allocation5 + $0x8] sm:$0xf0]  ;;  %v3161_v23 = vld [vmem:[#allocation5 + $0x84] sm:$0xf]  ;;  %v3191_v27 = vld [vmem:[#allocation5 + $0x174] sm:$0xf]  ;;  %v2921_v34 = vor.u32 %v3226_v19, %v2920_v18 }
 0x15b   : > { %1817 = vmatpush.bf16.msrb.mxu1 %v2961_v28  ;;  %v2666_v26 = vld [vmem:[#allocation5 + $0x88] sm:$0xf0]  ;;  %v2786_v28 = vld [vmem:[#allocation5 + $0x178] sm:$0xf0]  ;;  %v3223_v32 = vld [vmem:[#allocation5 + $0x274] sm:$0xf]  ;;  %v2605_v35 = vor.u32 %v3145_v20, %v2602_v22 }
 0x15c   : > { %1830 = vmatpush.bf16.msrb.mxu2 %v2645_v29  ;;  %v3207_v29 = vld [vmem:[#allocation5 + $0x1f4] sm:$0xf]  ;;  %v2850_v31 = vld [vmem:[#allocation5 + $0x1f8] sm:$0xf0]  ;;  %v1160_v39 = vld [vmem:[#allocation2 + $0x18] sm:$0xff] }
 0x15d   : > { %1843 = vmatpush.bf16.msrb.mxu3 %v2709_v33  ;;  %v2914_v33 = vld [vmem:[#allocation5 + $0x278] sm:$0xf0]  ;;  %v3239_v36 = vld [vmem:[#allocation5 + $0x2f4] sm:$0xf]  ;;  %v2853_v43 = vor.u32 %v3207_v29, %v2850_v31  ;;  %v3189_v45 = vld [vmem:[#allocation5 + $0x164] sm:$0xf]  ;;  %v3958_v49 = vpack.c.bf16 %v1160_v39, %v1160_v39 }
 0x15e   : > { %1805 = vmatpush.bf16.msrb.mxu0 %v2889_v40  ;;  %v2978_v38 = vld [vmem:[#allocation5 + $0x2f8] sm:$0xf0]  ;;  %v2669_v40 = vor.u32 %v3161_v23, %v2666_v26  ;;  %v2917_v44 = vor.u32 %v3223_v32, %v2914_v33  ;;  %v3205_v47 = vld [vmem:[#allocation5 + $0x1e4] sm:$0xf]  ;;  %v2842_v50 = vld [vmem:[#allocation5 + $0x1e8] sm:$0xf0] }
 0x15f   : > { %1818 = vmatpush.bf16.msrb.mxu1 %v2953_v41  ;;  %v2789_v41 = vor.u32 %v3191_v27, %v2786_v28  ;;  %v2981_v48 = vor.u32 %v3239_v36, %v2978_v38  ;;  %v3221_v51 = vld [vmem:[#allocation5 + $0x264] sm:$0xf]  ;;  %v2970_v55 = vld [vmem:[#allocation5 + $0x2e8] sm:$0xf0]  ;;  %v2845_v5 = vor.u32 %v3205_v47, %v2842_v50  ;;  %v3187_v6 = vld [vmem:[#allocation5 + $0x154] sm:$0xf] }
 0x160   : > { %1831 = vmatpush.bf16.msrb.mxu2 %v2637_v42  ;;  %v1161_v42 = vld [vmem:[#allocation2 + $0x20] sm:$0xff]  ;;  %v2770_v58 = vld [vmem:[#allocation5 + $0x158] sm:$0xf0]  ;;  %v3185_v7 = vld [vmem:[#allocation5 + $0x144] sm:$0xf] }
 0x161   : > { %1844 = vmatpush.bf16.msrb.mxu3 %v2701_v46  ;;  %v2778_v46 = vld [vmem:[#allocation5 + $0x168] sm:$0xf0]  ;;  %v3203_v59 = vld [vmem:[#allocation5 + $0x1d4] sm:$0xf]  ;;  %v2834_v61 = vld [vmem:[#allocation5 + $0x1d8] sm:$0xf0]  ;;  %v2773_v2 = vor.u32 %v3187_v6, %v2770_v58 }
 0x162   : > { %1806 = vmatpush.bf16.msrb.mxu0 %v2881_v52  ;;  %v2906_v52 = vld [vmem:[#allocation5 + $0x268] sm:$0xf0]  ;;  %v2781_v56 = vor.u32 %v3189_v45, %v2778_v46  ;;  %v2962_v1 = vld [vmem:[#allocation5 + $0x2d8] sm:$0xf0]  ;;  %v2837_v3 = vor.u32 %v3203_v59, %v2834_v61  ;;  %v3201_v9 = vld [vmem:[#allocation5 + $0x1c4] sm:$0xf] }
 0x163   : > { %1819 = vmatpush.bf16.msrb.mxu1 %v2945_v53  ;;  %v3960_v53 = vpack.c.bf16 %v1161_v42, %v1161_v42  ;;  %v2762_v8 = vld [vmem:[#allocation5 + $0x148] sm:$0xf0]  ;;  %v3233_v15 = vld [vmem:[#allocation5 + $0x2c4] sm:$0xf]  ;;  %v3183_v18 = vld [vmem:[#allocation5 + $0x134] sm:$0xf] }
 0x164   : > { %1832 = vmatpush.bf16.msrb.mxu2 %v2629_v54  ;;  %v3237_v54 = vld [vmem:[#allocation5 + $0x2e4] sm:$0xf]  ;;  %v2826_v11 = vld [vmem:[#allocation5 + $0x1c8] sm:$0xf0]  ;;  %v2754_v19 = vld [vmem:[#allocation5 + $0x138] sm:$0xf0] }
 0x165   : > { %1845 = vmatpush.bf16.msrb.mxu3 %v2693_v57  ;;  %v2909_v57 = vor.u32 %v3221_v51, %v2906_v52  ;;  %v2973_v60 = vor.u32 %v3237_v54, %v2970_v55  ;;  %v2890_v14 = vld [vmem:[#allocation5 + $0x248] sm:$0xf0]  ;;  %v3199_v20 = vld [vmem:[#allocation5 + $0x1b4] sm:$0xf]  ;;  %v2818_v22 = vld [vmem:[#allocation5 + $0x1b8] sm:$0xf0]  ;;  %v2757_v29 = vor.u32 %v3183_v18, %v2754_v19 }
 0x166   : > { %1807 = vmatpush.bf16.msrb.mxu0 %v2873_v62  ;;  %v3219_v62 = vld [vmem:[#allocation5 + $0x254] sm:$0xf]  ;;  %v2882_v26 = vld [vmem:[#allocation5 + $0x238] sm:$0xf0]  ;;  %v3181_v32 = vld [vmem:[#allocation5 + $0x124] sm:$0xf] }
 0x167   : > { %1820 = vmatpush.bf16.msrb.mxu1 %v2937_v63  ;;  %v2898_v63 = vld [vmem:[#allocation5 + $0x258] sm:$0xf0]  ;;  %v3215_v23 = vld [vmem:[#allocation5 + $0x234] sm:$0xf]  ;;  %v2746_v33 = vld [vmem:[#allocation5 + $0x128] sm:$0xf0] }
 0x168   : > { %1833 = vmatpush.bf16.msrb.mxu2 %v2621_v0  ;;  %v3235_v0 = vld [vmem:[#allocation5 + $0x2d4] sm:$0xf]  ;;  %v2946_v28 = vld [vmem:[#allocation5 + $0x2b8] sm:$0xf0]  ;;  %v2885_v31 = vor.u32 %v3215_v23, %v2882_v26  ;;  %v2810_v36 = vld [vmem:[#allocation5 + $0x1a8] sm:$0xf0]  ;;  %v2749_v42 = vor.u32 %v3181_v32, %v2746_v33 }
 0x169   : > { %1846 = vmatpush.bf16.msrb.mxu3 %v2685_v4  ;;  %v2901_v4 = vor.u32 %v3219_v62, %v2898_v63  ;;  %v2965_v10 = vor.u32 %v3235_v0, %v2962_v1  ;;  %v3231_v27 = vld [vmem:[#allocation5 + $0x2b4] sm:$0xf]  ;;  %v3213_v38 = vld [vmem:[#allocation5 + $0x224] sm:$0xf]  ;;  %v2874_v39 = vld [vmem:[#allocation5 + $0x228] sm:$0xf0] }
 0x16a   : > { %1808 = vmatpush.bf16.msrb.mxu0 %v2865_v13  ;;  %v3217_v13 = vld [vmem:[#allocation5 + $0x244] sm:$0xf]  ;;  %v3179_v45 = vld [vmem:[#allocation5 + $0x114] sm:$0xf]  ;;  %v2738_v46 = vld [vmem:[#allocation5 + $0x118] sm:$0xf0] }
 0x16b   : > { %1821 = vmatpush.bf16.msrb.mxu1 %v2929_v16  ;;  %v2765_v16 = vor.u32 %v3185_v7, %v2762_v8  ;;  %v3195_v47 = vld [vmem:[#allocation5 + $0x194] sm:$0xf]  ;;  %v2802_v50 = vld [vmem:[#allocation5 + $0x198] sm:$0xf0]  ;;  %v3177_v6 = vld [vmem:[#allocation5 + $0x104] sm:$0xf] }
 0x16c   : > { %1834 = vmatpush.bf16.msrb.mxu2 %v2613_v17  ;;  %v2829_v17 = vor.u32 %v3201_v9, %v2826_v11  ;;  %v3211_v51 = vld [vmem:[#allocation5 + $0x214] sm:$0xf]  ;;  %v2866_v52 = vld [vmem:[#allocation5 + $0x218] sm:$0xf0]  ;;  %v2730_v58 = vld [vmem:[#allocation5 + $0x108] sm:$0xf0] }
 0x16d   : > { %1847 = vmatpush.bf16.msrb.mxu3 %v2677_v21  ;;  %v3227_v54 = vld [vmem:[#allocation5 + $0x294] sm:$0xf]  ;;  %v2930_v55 = vld [vmem:[#allocation5 + $0x298] sm:$0xf0]  ;;  %v3193_v59 = vld [vmem:[#allocation5 + $0x184] sm:$0xf] }
 0x16e   : > { %1809 = vmatpush.bf16.msrb.mxu0 %v2857_v30  ;;  %v2821_v30 = vor.u32 %v3199_v20, %v2818_v22  ;;  %v2794_v61 = vld [vmem:[#allocation5 + $0x188] sm:$0xf0]  ;;  %v3209_v62 = vld [vmem:[#allocation5 + $0x204] sm:$0xf]  ;;  %v3248_v8 = vld [vmem:[#allocation8 + $0x38] sm:$0xff] }
 0x16f   : > { %1822 = vmatpush.bf16.msrb.mxu1 %v2921_v34  ;;  %v3197_v34 = vld [vmem:[#allocation5 + $0x1a4] sm:$0xf]  ;;  %v2858_v63 = vld [vmem:[#allocation5 + $0x208] sm:$0xf0]  ;;  %v3247_v9 = vld [vmem:[#allocation8 + $0x30] sm:$0xff] }
 0x170   : > { %1835 = vmatpush.bf16.msrb.mxu2 %v2605_v35  ;;  %v2949_v35 = vor.u32 %v3231_v27, %v2946_v28  ;;  %v3225_v0 = vld [vmem:[#allocation5 + $0x284] sm:$0xf]  ;;  %v2922_v1 = vld [vmem:[#allocation5 + $0x288] sm:$0xf0]  ;;  %v3251_v33 = vld [vmem:[#allocation8 + $0x50] sm:$0xff] }
 0x171   : > { %1848 = vmatpush.bf16.msrb.mxu3 %v2669_v40  ;;  %1810 = vmatmul.bf16.vlgmr.msrb.gmra.mxu0 %v3958_v49  ;;  %v3229_v40 = vld [vmem:[#allocation5 + $0x2a4] sm:$0xf]  ;;  %v2925_v7 = vor.u32 %v3225_v0, %v2922_v1 }
 0x172   : > { %1854 = vmatpush.bf16.msra.mxu0 %v2789_v41  ;;  %1823 = vmatmul.bf16.vlgmr.msrb.gmra.mxu1 %v3960_v53  ;;  %v2938_v41 = vld [vmem:[#allocation5 + $0x2a8] sm:$0xf0]  ;;  %v3245_v11 = vld [vmem:[#allocation8 + $0x20] sm:$0xff] }
 0x173   : > { %1867 = vmatpush.bf16.msra.mxu1 %v2853_v43  ;;  %1836 = vmatmul.bf16.vlgmr.msrb.gmra.mxu2 %v3946_v12  ;;  %v2954_v12 = vld [vmem:[#allocation5 + $0x2c8] sm:$0xf0]  ;;  %v2813_v43 = vor.u32 %v3197_v34, %v2810_v36  ;;  %v3253_v23 = vld [vmem:[#allocation8 + $0x60] sm:$0xff] }
 0x174   : > { %1880 = vmatpush.bf16.msra.mxu2 %v2917_v44  ;;  %1849 = vmatmul.bf16.vlgmr.msrb.gmra.mxu3 %v3949_v24  ;;  %v2893_v24 = vor.u32 %v3217_v13, %v2890_v14  ;;  %v2957_v21 = vor.u32 %v3233_v15, %v2954_v12  ;;  %v2877_v44 = vor.u32 %v3213_v38, %v2874_v39  ;;  %v3244_v13 = vld [vmem:[#allocation8 + $0x18] sm:$0xff]  ;;  %v3243_v14 = vld [vmem:[#allocation8 + $0x10] sm:$0xff]  ;;  %v3242_v12 = vld [vmem:[#allocation8 + $0x8] sm:$0xff] }
 0x175   : > { %1893 = vmatpush.bf16.msra.mxu3 %v2981_v48  ;;  %v2941_v48 = vor.u32 %v3229_v40, %v2938_v41  ;;  %v3250_v39 = vld [vmem:[#allocation8 + $0x48] sm:$0xff] }
 0x176   : > { %1855 = vmatpush.bf16.msra.mxu0 %v2781_v56  ;;  %v2741_v56 = vor.u32 %v3179_v45, %v2738_v46  ;;  %v3249_v45 = vld [vmem:[#allocation8 + $0x40] sm:$0xff] }
 0x177   : > { %1868 = vmatpush.bf16.msra.mxu1 %v2845_v5  ;;  %v2805_v5 = vor.u32 %v3195_v47, %v2802_v50 }
 0x178   : > { %1881 = vmatpush.bf16.msra.mxu2 %v2909_v57  ;;  %v2869_v57 = vor.u32 %v3211_v51, %v2866_v52 }
 0x179   : > { %1894 = vmatpush.bf16.msra.mxu3 %v2973_v60  ;;  %v2933_v60 = vor.u32 %v3227_v54, %v2930_v55 }
 0x17a   : > { %1856 = vmatpush.bf16.msra.mxu0 %v2773_v2  ;;  %v2733_v2 = vor.u32 %v3177_v6, %v2730_v58 }
 0x17b   : > { %1869 = vmatpush.bf16.msra.mxu1 %v2837_v3  ;;  %v2797_v3 = vor.u32 %v3193_v59, %v2794_v61 }
 0x17c   : > { %1882 = vmatpush.bf16.msra.mxu2 %v2901_v4  ;;  %v2861_v4 = vor.u32 %v3209_v62, %v2858_v63 }
 0x17d   : > { %1895 = vmatpush.bf16.msra.mxu3 %v2965_v10  ;;  %v3246_v10 = vld [vmem:[#allocation8 + $0x28] sm:$0xff] }
 0x17e   : > { %1857 = vmatpush.bf16.msra.mxu0 %v2765_v16 }
 0x17f   : > { %1870 = vmatpush.bf16.msra.mxu1 %v2829_v17 }
 0x180   : > { %1883 = vmatpush.bf16.msra.mxu2 %v2893_v24 }
 0x181   : > { %1896 = vmatpush.bf16.msra.mxu3 %v2957_v21  ;;  %v3254_v21 = vld [vmem:[#allocation8 + $0x68] sm:$0xff] }
 0x182   : > { %1858 = vmatpush.bf16.msra.mxu0 %v2757_v29 }
 0x183   : > { %1871 = vmatpush.bf16.msra.mxu1 %v2821_v30 }
 0x184   : > { %1884 = vmatpush.bf16.msra.mxu2 %v2885_v31  ;;  %v3252_v31 = vld [vmem:[#allocation8 + $0x58] sm:$0xff] }
 0x185   : > { %1897 = vmatpush.bf16.msra.mxu3 %v2949_v35 }
 0x186   : > { %1859 = vmatpush.bf16.msra.mxu0 %v2749_v42 }
 0x187   : > { %1872 = vmatpush.bf16.msra.mxu1 %v2813_v43 }
 0x188   : > { %1885 = vmatpush.bf16.msra.mxu2 %v2877_v44 }
 0x189   : > { %1898 = vmatpush.bf16.msra.mxu3 %v2941_v48 }
 0x18a   : > { %1860 = vmatpush.bf16.msra.mxu0 %v2741_v56 }
 0x18b   : > { %1873 = vmatpush.bf16.msra.mxu1 %v2805_v5 }
 0x18c   : > { %1886 = vmatpush.bf16.msra.mxu2 %v2869_v57 }
 0x18d   : > { %1899 = vmatpush.bf16.msra.mxu3 %v2933_v60 }
 0x18e   : > { %1861 = vmatpush.bf16.msra.mxu0 %v2733_v2 }
 0x18f   : > { %1874 = vmatpush.bf16.msra.mxu1 %v2797_v3  ;;  %v3363_v3 = vld [vmem:[#allocation10] ss:$0 sm:$0xff] }
 0x190   : > { %1887 = vmatpush.bf16.msra.mxu2 %v2861_v4 }
 0x191   : > { %1900 = vmatpush.bf16.msra.mxu3 %v2925_v7  ;;  %1862 = vmatmul.bf16.vlgmr.msra.gmra.mxu0 %v3951_v25  ;;  %v3241_v25 = vld [vmem:[#allocation8] sm:$0xff] }
 0x192   : > { %2042 = vmatpush.bf16.msrb.mxu0 %v3248_v8  ;;  %1875 = vmatmul.bf16.vlgmr.msra.gmra.mxu1 %v3954_v37  ;;  %v1264_v37 = vld [vmem:[#allocation7] sm:$0x3] }
 0x193   : > { %1888 = vmatmul.bf16.vlgmr.msra.gmra.mxu2 %v3958_v49  ;;  %v3256_v49 = vld [vmem:[#allocation8 + $0x78] sm:$0xff]  ;;  %v1266_v24 = vperm.slane %v1264_v37, 0  ;;  %v1267_v48 = vperm.slane %v1264_v37, 1 }
 0x194   : > { %1901 = vmatmul.bf16.vlgmr.msra.gmra.mxu3 %v3960_v53  ;;  %2055 = vmatpush.bf16.msrb.mxu1 %v3256_v49  ;;  %v3255_v53 = vld [vmem:[#allocation8 + $0x70] sm:$0xff] }
 0x196   : > { %2043 = vmatpush.bf16.msrb.mxu0 %v3247_v9 }
 0x198   : > { %2056 = vmatpush.bf16.msrb.mxu1 %v3255_v53 }
 0x19a   : > { %2044 = vmatpush.bf16.msrb.mxu0 %v3246_v10 }
 0x19c   : > { %2057 = vmatpush.bf16.msrb.mxu1 %v3254_v21 }
 0x19e   : > { %2045 = vmatpush.bf16.msrb.mxu0 %v3245_v11 }
 0x1a0   : > { %2058 = vmatpush.bf16.msrb.mxu1 %v3253_v23 }
 0x1a2   : > { %2046 = vmatpush.bf16.msrb.mxu0 %v3244_v13 }
 0x1a4   : > { %2059 = vmatpush.bf16.msrb.mxu1 %v3252_v31 }
 0x1a6   : > { %2047 = vmatpush.bf16.msrb.mxu0 %v3243_v14 }
 0x1a8   : > { %2060 = vmatpush.bf16.msrb.mxu1 %v3251_v33 }
 0x1aa   : > { %2048 = vmatpush.bf16.msrb.mxu0 %v3242_v12 }
 0x1ac   : > { %2061 = vmatpush.bf16.msrb.mxu1 %v3250_v39 }
 0x1ae   : > { %2049 = vmatpush.bf16.msrb.mxu0 %v3241_v25 }
 0x1b0   : > { %2062 = vmatpush.bf16.msrb.mxu1 %v3249_v45 }
 0x1ce   : > { %v1759_v15 = vpop.f32.mrf.mxu0 }
 0x1cf   : > { %v1772_v16 = vpop.f32.mrf.mxu1  ;;  %v1760_v22 = vadd.f32 %v1759_v15, %v1266_v24 }
 0x1d1   : > { %v1773_v26 = vadd.f32 %v1772_v16, %v1760_v22 }
 0x1d6   : > { %v1761_v17 = vpop.f32.mrf.mxu0  ;;  %v1785_v18 = vpop.f32.mrf.mxu2 }
 0x1d7   : > { %v1774_v19 = vpop.f32.mrf.mxu1  ;;  %v1798_v20 = vpop.f32.mrf.mxu3  ;;  %v1786_v29 = vadd.f32 %v1785_v18, %v1773_v26 }
 0x1d9   : > { %v1799_v30 = vadd.f32 %v1798_v20, %v1786_v29 }
 0x1de   : > { %v1787_v27 = vpop.f32.mrf.mxu2 }
 0x1df   : > { %v1800_v28 = vpop.f32.mrf.mxu3 }
 0x1ee   : > { %v1811_v32 = vpop.f32.mrf.mxu0 }
 0x1ef   : > { %v1812_v34 = vadd.f32 %v1811_v32, %v1799_v30  ;;  %v1824_v35 = vpop.f32.mrf.mxu1 }
 0x1f1   : > { %v1825_v36 = vadd.f32 %v1824_v35, %v1812_v34 }
 0x1f3   : > { %v1906_v38 = vmax.f32 %v1825_v36, 0.0 }
 0x1f5   : > { %v1908_v40 = vpack.c.bf16 %v1906_v38, %v1906_v38 }
 0x1f6   : > { %v1837_v41 = vpop.f32.mrf.mxu2  ;;  %v1813_v43 = vpop.f32.mrf.mxu0 }
 0x1f7   : > { %v1850_v42 = vpop.f32.mrf.mxu3  ;;  %2050 = vmatmul.bf16.vlgmr.msrb.gmra.mxu0 %v1908_v40  ;;  %v1826_v44 = vpop.f32.mrf.mxu1  ;;  %v1838_v50 = vadd.f32 %v1837_v41, %v1267_v48 }
 0x1f9   : > { %v1851_v51 = vadd.f32 %v1850_v42, %v1838_v50 }
 0x1fe   : > { %v1839_v46 = vpop.f32.mrf.mxu2 }
 0x1ff   : > { %v1852_v47 = vpop.f32.mrf.mxu3 }
 0x20e   : > { %v1863_v52 = vpop.f32.mrf.mxu0 }
 0x20f   : > { %v1876_v54 = vpop.f32.mrf.mxu1  ;;  %v1864_v55 = vadd.f32 %v1863_v52, %v1851_v51 }
 0x211   : > { %v1877_v56 = vadd.f32 %v1876_v54, %v1864_v55 }
 0x216   : > { %v1889_v5 = vpop.f32.mrf.mxu2  ;;  %v1865_v58 = vpop.f32.mrf.mxu0 }
 0x217   : > { %v1890_v57 = vadd.f32 %v1889_v5, %v1877_v56  ;;  %v1902_v6 = vpop.f32.mrf.mxu3  ;;  %v1878_v59 = vpop.f32.mrf.mxu1 }
 0x219   : > { %v1903_v60 = vadd.f32 %v1902_v6, %v1890_v57 }
 0x21b   : > { %v1907_v61 = vmax.f32 %v1903_v60, 0.0 }
 0x21d   : > { %v1909_v62 = vpack.c.bf16 %v1907_v61, %v1907_v61 }
 0x21e   : > { %v1891_v63 = vpop.f32.mrf.mxu2 }
 0x21f   : > { %v1904_v0 = vpop.f32.mrf.mxu3  ;;  %2063 = vmatmul.bf16.vlgmr.msrb.gmra.mxu1 %v1909_v62 }
 0x274   : > { %v2051_v1 = vpop.f32.mrf.mxu0 }
 0x275   : > { %v2052_v4 = vadd.f32 %v3363_v3, %v2051_v1 }
 0x27c   : > { %v2053_v2 = vpop.f32.mrf.mxu0 }
 0x29c   : > { %v2064_v7 = vpop.f32.mrf.mxu1 }
 0x29d   : > { %v2065_v8 = vadd.f32 %v2064_v7, %v2052_v4 }
 0x29f   : > { %2068 = vst [vmem:[%s3997_s6] sm:$0xff] %v2065_v8 }
 0x2a4   : > { %v2066_v9 = vpop.f32.mrf.mxu1 }
 0x2a5 PF: > { %s21_s26 = sadd.s32 1, %s3572_s26   ;;  %s4006_s21 = smov %s3556_s22 }
 0x2a6   : > { %p18_p4 = scmp.ge.s32.totalorder %s21_s26, 5   ;;  %s4007_s22 = smov %s3560_s23 }
 0x2a7   : > { %s4008_s23 = smov %s3707_s30  ;;  %s4009_s24 = smov %s3568_s25 }
 0x2a8   : > { %s4010_s25 = smov %s4012_s17  ;;  %20 = sbr.rel (!%p18_p4) target bundleno = 9 (0x9), region = 111 }
 0x2ad   :  { %2088 = vsyncpa [#allocation4], 1 }
 0x2ae   :  { %2090 = vsyncpa [#allocation4 + $0x1], 1 }
 0x2af   :  { %2091 = vsyncpa [#allocation6], 1 }
 0x2b0   :  { %2092 = vsyncpa [#allocation9], 1 }

// kernel: joint_training_forward.6
= control target key start
LH: loop header
LB: loop body
LE: loop exit
PB: predicated region body
PF: predicated region fallthrough
CT: control target
= control target key end

     0   :  { %vm33_vm0 = vcmask 1041408   ;;  %v84_v12 = vlaneseq  ;;  %vm88_vm7 = vcmask 1041409   ;;  %v248_v61 = vmov 0   ;;  %s320_s1 = inlined_call_operand.vmem [shape: f32[2,8,128], index: 1, kind: input, shape index: {}]   ;;  %s321_s0 = inlined_call_operand.vmem [shape: f32[2,128], index: 0, kind: input, shape index: {}]   ;;  %s322_s2 = inlined_call_operand.vmem [shape: f32[2,8], index: 2, kind: input, shape index: {}]   ;;  %s323_s3 = inlined_call_operand.vmem [shape: f32[2,8], index: 3, kind: input, shape index: {}]   ;;  %s324_s4 = inlined_call_operand.vmem [shape: s32[2,2], index: 4, kind: output, shape index: {}]  }
   0x1   :  { %v18_v0 = vld [vmem:[%s320_s1] sm:$0xff]  ;;  %v19_v5 = vld [vmem:[%s320_s1 + $0x8] sm:$0xff]  ;;  %vm144_vm8 = vcmask 58368  }
   0x2   :  { %v17_v1 = vld [vmem:[%s321_s0] sm:$0x3]  ;;  %v49_v2 = vmul.f32 %v18_v0, %v18_v0  ;;  %v50_v7 = vmul.f32 %v19_v5, %v19_v5  ;;  %v283_v13 = vshrl.u32 %v84_v12, 7  ;;  %v291_v45 = vand.u32 127, %v84_v12 }
   0x3   :  { %v32_v3 = vmul.f32 %v17_v1, %v17_v1  ;;  %v22_v6 = vperm.slane %v17_v1, 0  ;;  %v21_v9 = vrot.slane %v17_v1, 1  ;;  %v112_v14 = vld [vmem:[%s322_s2] sm:$0x3] }
   0x4   :  { %51 = vadd.xlane.f32.xlu0 %v49_v2  ;;  %234 = vset.pattern.permute.xlu1 %v283_v13  ;;  %v114_v15 = vperm.slane %v112_v14, 0  ;;  %v121_v60 = vperm.slane %v112_v14, 1  ;;  %vm223_vm15 = vcmp.eq.s32.totalorder %v291_v45, 0 }
   0x5   :  { %v34_v4 = vsel %vm33_vm0, %v32_v3, 0.0  ;;  %v26_v8 = vmul.f32 %v22_v6, %v18_v0  ;;  %v23_v10 = vperm.slane %v21_v9, 0  ;;  %233 = vset.pattern.permute.xlu0 %v283_v13  ;;  %232 = vset.pattern.permute.xlu2 %v283_v13  ;;  %vm225_vm0 = vcmask 9216  }
   0x6   :  { %35 = vadd.xlane.f32.xlu1 %v34_v4 }
   0x7   :  { %v27_v11 = vmul.f32 %v23_v10, %v19_v5 }
   0x9   :  { %30 = vadd.xlane.f32.xlu2 %v27_v11 }
   0xc   :  { %53 = vadd.xlane.f32.xlu0 %v50_v7 }
   0xe   :  { %28 = vadd.xlane.f32.xlu1 %v26_v8 }
  0x27   :  { %119 = vperm.xlu1 %234, %v114_v15  }
  0x2f   :  { %236 = vset.pattern.permute.xlu1 %v248_v61 }
  0x77   :  { %v52_v16 = vpop.xlane.xlu0 %51 }
  0x78   :  { %240 = vrsqrt.f32 %v52_v16  ;;  %vm62_vm1 = vcmp.eq.f32.partialorder %v52_v16, inf  ;;  %v65_v38 = vand.u32 2147483648, %v52_v16  ;;  %vm64_vm2 = vcmp.eq.f32.partialorder %v52_v16, 0.0 }
  0x79   :  { %v36_v17 = vpop.xlane.xlu1 %35 }
  0x7a   :  { %242 = vrsqrt.f32 %v36_v17  ;;  %vm44_vm3 = vcmp.eq.f32.partialorder %v36_v17, inf  ;;  %v47_v47 = vand.u32 2147483648, %v36_v17  ;;  %vm46_vm6 = vcmp.eq.f32.partialorder %v36_v17, 0.0 }
  0x7c   :  { %v31_v62 = vpop.xlane.xlu2 %30 }
  0x7e   :  { %v241_v18 = vpop.eup %240 }
  0x7f   :  { %v56_v20 = vmul.f32 %v241_v18, %v52_v16  ;;  %v54_v21 = vpop.xlane.xlu0 %53 }
  0x80   :  { %v243_v19 = vpop.eup %242  ;;  %244 = vrsqrt.f32 %v54_v21  ;;  %vm74_vm4 = vcmp.eq.f32.partialorder %v54_v21, inf  ;;  %v77_v44 = vand.u32 2147483648, %v54_v21  ;;  %vm76_vm5 = vcmp.eq.f32.partialorder %v54_v21, 0.0 }
  0x81   :  { %v38_v22 = vmul.f32 %v243_v19, %v36_v17  ;;  %v57_v23 = vmul.f32 %v241_v18, %v56_v20  ;;  %v29_v63 = vpop.xlane.xlu1 %28 }
  0x83   :  { %v39_v24 = vmul.f32 %v243_v19, %v38_v22  ;;  %v58_v25 = vmul.f32 0.5, %v57_v23 }
  0x85   :  { %v40_v26 = vmul.f32 0.5, %v39_v24  ;;  %v59_v27 = vsub.f32 1.5, %v58_v25 }
  0x86   :  { %v245_v28 = vpop.eup %244 }
  0x87   :  { %v41_v29 = vsub.f32 1.5, %v40_v26  ;;  %v60_v30 = vmul.f32 %v241_v18, %v59_v27  ;;  %v68_v31 = vmul.f32 %v245_v28, %v54_v21 }
  0x89   :  { %v61_v32 = vmul.f32 %v60_v30, %v52_v16  ;;  %v69_v33 = vmul.f32 %v245_v28, %v68_v31  ;;  %v42_v34 = vmul.f32 %v243_v19, %v41_v29 }
  0x8b   :  { %v70_v35 = vmul.f32 0.5, %v69_v33  ;;  %v63_v36 = vsel %vm62_vm1, %v52_v16, %v61_v32  ;;  %v43_v39 = vmul.f32 %v42_v34, %v36_v17 }
  0x8c   :  { %v66_v41 = vsel %vm64_vm2, %v65_v38, %v63_v36 }
  0x8d   :  { %v71_v37 = vsub.f32 1.5, %v70_v35  ;;  %v45_v43 = vsel %vm44_vm3, %v36_v17, %v43_v39  ;;  %v80_v46 = vmax.f32 %v66_v41, 1e-08  ;;  %v201_v41 = vld [vmem:[%s323_s3] sm:$0x3] }
  0x8e   :  { %v48_v51 = vsel %vm46_vm6, %v47_v47, %v45_v43 }
  0x8f   :  { %v72_v40 = vmul.f32 %v245_v28, %v71_v37  ;;  %v86_v52 = vperm.slane %v80_v46, %v291_v45  ;;  %v79_v54 = vmax.f32 %v48_v51, 1e-08 }
  0x91   :  { %v73_v42 = vmul.f32 %v72_v40, %v54_v21 }
  0x93   :  { %v75_v48 = vsel %vm74_vm4, %v54_v21, %v73_v42 }
  0x94   :  { %v78_v49 = vsel %vm76_vm5, %v77_v44, %v75_v48 }
  0x95   :  { %v81_v50 = vmax.f32 %v78_v49, 1e-08 }
  0x97   :  { %v87_v53 = vperm.slane %v81_v50, %v291_v45 }
  0x99   :  { %v89_v55 = vsel %vm88_vm7, %v87_v53, %v86_v52  ;;  %v120_v1 = vpop.permute.xlu1 %119 }
  0x9a   :  { %v91_v56 = vmul.f32 %v89_v55, %v79_v54 }
  0x9c   :  { %246 = vrcp.f32 %v91_v56 }
  0xa2   :  { %v247_v57 = vpop.eup %246 }
  0xa3   :  { %v101_v58 = vperm.slane %v247_v57, 1  ;;  %v94_v59 = vperm.slane %v247_v57, 0 }
  0xa5   :  { %106 = vperm.xlu0 %233, %v101_v58   ;;  %99 = vperm.xlu2 %232, %v94_v59  }
  0xad   :  { %126 = vperm.xlu2 %232, %v121_v60   ;;  %238 = vset.pattern.permute.xlu0 %v248_v61 }
  0xb5   :  { %235 = vset.pattern.permute.xlu2 %v248_v61 }
  0xff   :  { %v100_v0 = vpop.permute.xlu2 %99 }
 0x100   :  { %v110_v2 = vmul.f32 %v100_v0, %v29_v63 }
 0x102   :  { %v130_v3 = vadd.f32 %v120_v1, %v110_v2 }
 0x104   :  { %135 = vperm.xlu2 %235, %v130_v3  }
 0x107   :  { %v127_v6 = vpop.permute.xlu2 %126 }
 0x117   :  { %v107_v4 = vpop.permute.xlu0 %106 }
 0x118   :  { %v111_v5 = vmul.f32 %v107_v4, %v31_v62 }
 0x11a   :  { %v131_v7 = vadd.f32 %v127_v6, %v111_v5 }
 0x11c   :  { %138 = vperm.xlu1 %236, %v131_v7  }
 0x124   :  { %237 = vset.pattern.permute.xlu1 %v283_v13 }
 0x12c   :  { %159 = vperm.xlu1 %237, %v291_v45  }
 0x134   :  { %239 = vset.pattern.permute.xlu1 %v248_v61 }
 0x15e   :  { %v136_v8 = vpop.permute.xlu2 %135 }
 0x15f   :  { %v140_v10 = vperm.slane %v136_v8, %v291_v45 }
 0x18e   :  { %v139_v9 = vpop.permute.xlu1 %138 }
 0x18f   :  { %v141_v11 = vperm.slane %v139_v9, %v291_v45 }
 0x191   :  { %v142_v12 = vsel %vm88_vm7, %v141_v11, %v140_v10 }
 0x192   :  { %v145_v14 = vsel %vm144_vm8, %v142_v12, -inf }
 0x193   :  { %146 = vmax.xlane.f32.xlu2 %v145_v14 }
 0x19e   :  { %v160_v13 = vpop.permute.xlu1 %159 }
 0x1ab   :  { %191 = vperm.xlu2 %235, %v110_v2  }
 0x206   :  { %v147_v15 = vpop.xlane.xlu2 %146 }
 0x207   :  { %v149_v16 = vperm.slane %v147_v15, 0  ;;  %v150_v17 = vperm.slane %v147_v15, 1 }
 0x209   :  { %vm154_vm9 = vcmp.ge.f32.partialorder %v131_v7, %v150_v17  ;;  %vm153_vm10 = vcmp.ge.f32.partialorder %v130_v3, %v149_v16 }
 0x20a   :  { %v162_v18 = vsel %vm154_vm9, %v160_v13, 8  ;;  %v161_v19 = vsel %vm153_vm10, %v160_v13, 8 }
 0x20b   :  { %167 = vperm.xlu1 %239, %v162_v18   ;;  %164 = vperm.xlu0 %238, %v161_v19  }
 0x20e   :  { %v192_v34 = vpop.permute.xlu2 %191 }
 0x20f   :  { %v196_v39 = vperm.slane %v192_v34, %v291_v45 }
 0x27d   :  { %v168_v20 = vpop.permute.xlu1 %167  ;;  %v165_v21 = vpop.permute.xlu0 %164 }
 0x27e   :  { %v170_v22 = vperm.slane %v168_v20, %v291_v45  ;;  %v169_v23 = vperm.slane %v165_v21, %v291_v45 }
 0x280   :  { %v171_v24 = vsel %vm88_vm7, %v170_v22, %v169_v23 }
 0x281   :  { %v172_v25 = vsel %vm144_vm8, %v171_v24, 2147483647 }
 0x282   :  { %v174_v26 = vshra.s32 %v172_v25, 16  ;;  %v173_v28 = vand.u32 65535, %v172_v25 }
 0x284   :  { %v176_v27 = vcvt.s32.f32 %v174_v26  ;;  %v175_v30 = vcvt.s32.f32 %v173_v28 }
 0x286   :  { %177 = vmin.xlane.f32.xlu1 %v176_v27 }
 0x29f   :  { %194 = vperm.xlu1 %239, %v111_v5  }
 0x2f9   :  { %v178_v29 = vpop.xlane.xlu1 %177 }
 0x2fa   :  { %vm179_vm11 = vcmp.eq.f32.partialorder %v176_v27, %v178_v29  ;;  %v184_v32 = vcvt.f32.s32 %v178_v29 }
 0x2fb   :  { %v180_v31 = vsel %vm179_vm11, %v175_v30, inf }
 0x2fc   :  { %181 = vmin.xlane.f32.xlu0 %v180_v31  ;;  %v185_v36 = vshll.u32 %v184_v32, 16 }
 0x311   :  { %v195_v33 = vpop.permute.xlu1 %194 }
 0x312   :  { %v197_v37 = vperm.slane %v195_v33, %v291_v45 }
 0x314   :  { %v198_v42 = vsel %vm88_vm7, %v197_v37, %v196_v39 }
 0x36f   :  { %v182_v35 = vpop.xlane.xlu0 %181 }
 0x370   :  { %v183_v38 = vcvt.f32.s32 %v182_v35 }
 0x372   :  { %v186_v40 = vadd.s32 %v185_v36, %v183_v38 }
 0x374   :  { %vm187_vm12 = vcmp.eq.s32.totalorder %v291_v45, %v186_v40 }
 0x375   :  { %v200_v43 = vsel %vm187_vm12, -1e+30, %v198_v42 }
 0x376   :  { %v202_v44 = vadd.f32 %v201_v41, %v200_v43 }
 0x378   :  { %v203_v46 = vsel %vm144_vm8, %v202_v44, -inf }
 0x379   :  { %204 = vmax.xlane.f32.xlu2 %v203_v46 }
 0x3ec   :  { %v205_v47 = vpop.xlane.xlu2 %204 }
 0x3ed   :  { %vm206_vm13 = vcmp.ge.f32.partialorder %v202_v44, %v205_v47 }
 0x3ee   :  { %v207_v48 = vsel %vm206_vm13, %v291_v45, 8 }
 0x3ef   :  { %v208_v49 = vsel %vm144_vm8, %v207_v48, 2147483647 }
 0x3f0   :  { %v210_v50 = vshra.s32 %v208_v49, 16  ;;  %v209_v52 = vand.u32 65535, %v208_v49 }
 0x3f2   :  { %v212_v51 = vcvt.s32.f32 %v210_v50  ;;  %v211_v54 = vcvt.s32.f32 %v209_v52 }
 0x3f4   :  { %213 = vmin.xlane.f32.xlu0 %v212_v51 }
 0x467   :  { %v214_v53 = vpop.xlane.xlu0 %213 }
 0x468   :  { %vm215_vm14 = vcmp.eq.f32.partialorder %v212_v51, %v214_v53  ;;  %v220_v56 = vcvt.f32.s32 %v214_v53 }
 0x469   :  { %v216_v55 = vsel %vm215_vm14, %v211_v54, inf }
 0x46a   :  { %217 = vmin.xlane.f32.xlu0 %v216_v55  ;;  %v221_v58 = vshll.u32 %v220_v56, 16 }
 0x4dd   :  { %v218_v57 = vpop.xlane.xlu0 %217 }
 0x4de   :  { %v219_v59 = vcvt.f32.s32 %v218_v57 }
 0x4e0   :  { %v222_v60 = vadd.s32 %v221_v58, %v219_v59 }
 0x4e2   :  { %v224_v61 = vsel %vm223_vm15, %v186_v40, %v222_v60 }
 0x4e3   :  { %226 = vst.msk [vmem:[%s324_s4] sm:$0x3] %vm225_vm0, %v224_v61 }

// kernel: joint_training_forward.5
= control target key start
LH: loop header
LB: loop body
LE: loop exit
PB: predicated region body
PF: predicated region fallthrough
CT: control target
= control target key end

     0   :  { %s4116_s0 = inlined_call_operand.vmem [shape: bf16[16,768], index: 0, kind: input, shape index: {}]   ;;  %s4117_s1 = inlined_call_operand.hbm [shape: bf16[768,768], index: 1, kind: input, shape index: {}]   ;;  %s4118_s2 = inlined_call_operand.hbm [shape: bf16[768,256], index: 2, kind: input, shape index: {}]   ;;  %s4119_s3 = inlined_call_operand.hbm [shape: f32[1,256], index: 3, kind: input, shape index: {}]   ;;  %s4120_s4 = inlined_call_operand.hbm [shape: bf16[256,128], index: 4, kind: input, shape index: {}]   ;;  %s4121_s5 = inlined_call_operand.hbm [shape: f32[1,128], index: 5, kind: input, shape index: {}]   ;;  %s4122_s6 = inlined_call_operand.vmem [shape: f32[16,128], index: 6, kind: output, shape index: {}]  }
   0x1   :  { %4125 = sst [smem:[#allocation17_spill]] %s4118_s2 }
   0x2   :  { %4126 = sst [smem:[#allocation18_spill]] %s4120_s4 }
   0x3   :  { %4127 = sst [smem:[#allocation19_spill]] %s4122_s6 }
   0x4   :  { %11 = vsyncpa [#allocation5], 0 }
   0x5   :  { %13 = vsyncpa [#allocation5 + $0x1], 0 }
   0x6   :  { %14 = vsyncpa [#allocation7], 0 }
   0x7   :  { %15 = vsyncpa [#allocation10], 0  ;;  %s3730_s21 = smov 0   ;;  %s3732_s22 = smov 0  }
   0x8   :  { %s3734_s23 = smov 0   ;;  %s3736_s24 = smov 0  }
   0x9   :  { %s3738_s25 = smov 0   ;;  %s3740_s26 = smov 0  }
   0xa LB: > { %s2298_s27 = sadd.s32 4294967295, %s3682_s26   ;;  %s30_s28 = sadd.s32 1, %s3678_s25  ;;  %s3682_s26 = sphi %s3740_s26, %s21_s26   ;;  %s3678_s25 = sphi %s3738_s25, %s4144_s25   ;;  %s3674_s24 = sphi %s3736_s24, %s4143_s24   ;;  %s3670_s23 = sphi %s3734_s23, %s4142_s23   ;;  %s3666_s22 = sphi %s3732_s22, %s4141_s22   ;;  %s3662_s21 = sphi %s3730_s21, %s4140_s21  }
   0xb   : > { %p31_p0 = scmp.ge.s32.totalorder %s30_s28, 3  ;;  %s42_s29 = sadd.s32 1, %s3670_s23 }
   0xc   : > { %p49_p1 = scmp.ne.s32.totalorder %s3670_s23, %s3666_s22  ;;  %p50_p2 = scmp.eq.s32.totalorder %s3682_s26, 0 }
   0xd   : > { %s4146_s28 = smov (%p31_p0, %s30_s28), 0  ;;  %p81_p4 = scmp.ne.s32.totalorder %s3666_s22, %s3662_s21 }
   0xe   : > { %4128 = sst [smem:[#allocation15_spill]] %s4146_s28  ;;  %p3766_p3 = por %p50_p2, %p49_p1 }
   0xf   : > { %s38_s7 = ssub.s32 %s3678_s25, %s4146_s28  ;;  %p3773_p5 = scmp.eq.s32.totalorder %s2298_s27, 0 }
  0x10   : > { %p40_p6 = scmp.eq.s32.totalorder %s38_s7, 0  ;;  %p2299_p7 = scmp.ge.s32.totalorder %s3682_s26, 1 }
  0x11   : > { %p3780_p8 = por %p3773_p5, %p81_p4  ;;  %p202_p9 = scmp.lt.s32.totalorder %s3682_s26, 4 }
  0x12   : > { %s3786_s10 = scalar_select %p40_p6, %s3670_s23, %s42_s29  }
  0x13   : > { %p3788_p10 = pnand %p2299_p7, %p202_p9  ;;  %s4134_s2 = sld [smem:[#allocation17_spill]] }
  0x14   : > { %4132 = sst [smem:[#allocation16_spill]] %s3786_s10  ;;  %s3684_s15 = smov [#allocation6]  }
  0x15   : > { %p3395_p11 = pneg %p3788_p10  ;;  %s215_s16 = sshll.u32 %s3684_s15, 4  ;;  %s216_s16 = int_to_ptr.vmem [resolvable:$true] %s215_s16 }
  0x16   : > { %s4136_s4 = sld [smem:[#allocation18_spill]]  ;;  %s3685_s21 = smov 128  }
  0x17   : > { %p3799_p12 = pnand %p3395_p11, %p3773_p5  ;;  %s3686_s27 = smov 8  }
  0x18   : > { %s3687_s29 = smov [#allocation9]   ;;  %s228_s15 = sshll.u32 %s4119_s3, 4  ;;  %s229_s15 = int_to_ptr.hbm [resolvable:$true] %s228_s15 }
  0x19   : > { %s213_s14 = sshll.u32 %s4134_s2, 4  ;;  %s241_s7 = sshll.u32 %s3687_s29, 4  ;;  %s214_s14 = int_to_ptr.hbm [resolvable:$true] %s213_s14  ;;  %s242_s7 = int_to_ptr.vmem [resolvable:$true] %s241_s7 }
  0x1a   : > { %3398 = dma.hbm_to_vmem [thread:$0]  (!%p3799_p12), %s214_s14, 12288, %s216_s16, [#allocation7], %s3685_s21, %s3685_s21, %s3686_s27  }
  0x1b   : > { %s3688_s2 = smov 64   ;;  %s3689_s28 = smov 4  }
  0x1c   : > { %s239_s20 = sshll.u32 %s4136_s4, 4  ;;  %s3690_s18 = smov [#allocation8]   ;;  %s240_s20 = int_to_ptr.hbm [resolvable:$true] %s239_s20 }
  0x1d   : > { %3404 = dma.hbm_to_vmem [thread:$0]  (!%p3799_p12), %s240_s20, 2048, %s242_s7, [#allocation10], %s3688_s2, %s3688_s2, %s3689_s28  }
  0x1e   : > { %s230_s19 = sshll.u32 %s3690_s18, 4  ;;  %s254_s6 = sshll.u32 %s4121_s5, 4  ;;  %s231_s19 = int_to_ptr.vmem [resolvable:$true] %s230_s19  ;;  %s255_s6 = int_to_ptr.hbm [resolvable:$true] %s254_s6 }
  0x1f   : > { %3401 = dma.hbm_to_vmem [thread:$0]  (!%p3799_p12), %s229_s15, 32, %s231_s19, [#allocation7]  }
  0x20   : > { %s3691_s14 = smov [#allocation11]   ;;  %p2304_p13 = scmp.ge.s32.totalorder %s3682_s26, 3 }
  0x21   : > { %s256_s16 = sshll.u32 %s3691_s14, 4  ;;  %s257_s16 = int_to_ptr.vmem [resolvable:$true] %s256_s16 }
  0x22   : > { %3407 = dma.hbm_to_vmem [thread:$0]  (!%p3799_p12), %s255_s6, 16, %s257_s16, [#allocation10]  }
  0x23   : > { %263 = sbr.rel (%p2304_p13) target bundleno = 52 (0x34), region = 32 }
  0x28   : > { %266 = sbr.rel (!%p3766_p3) target bundleno = 46 (0x2e), region = 36  ;;  %s268_s2 = sand.u32 (%p3766_p3), 1, %s3670_s23  }
  0x29   : > { %s3163_s4 = sshll.u32 (%p3766_p3), %s3678_s25, 3  ;;  %s2305_s28 = sshll.u32 (%p3766_p3), %s268_s2, 4 }
  0x2a   : > { %s276_s21 = scalar_lea.vmem (%p3766_p3), %s4116_s0, %s3163_s4  ;;  %s270_s27 = scalar_lea.vmem (%p3766_p3), [#allocation3], %s2305_s28 }
  0x2b   : > { %v307_v0 = vld [vmem:[%s276_s21] sm:$0xff] (%p3766_p3)  ;;  %v309_v1 = vld [vmem:[%s276_s21 + $0x18] sm:$0xff] (%p3766_p3) }
  0x2c   : > { %308 = vst [vmem:[%s270_s27] sm:$0xff] (%p3766_p3), %v307_v0 }
  0x2d   : > { %310 = vst [vmem:[%s270_s27 + $0x8] sm:$0xff] %v309_v1 }
  0x2e PF: > { %s317_s6 = sand.u32 1, %s3670_s23   ;;  %s3375_s17 = smul.u32 768, %s3678_s25 }
  0x2f   : > { %s3374_s29 = smul.u32 768, %s317_s6  ;;  %s318_s14 = scalar_lea.sflag [#allocation5], %s317_s6 }
  0x30   : > { %s327_s13 = scalar_lea.hbm %s4117_s1, %s3375_s17  ;;  %s3692_s16 = smov 384  }
  0x31   : > { %s328_s15 = sshll.u32 %s327_s13, 4  ;;  %s321_s18 = scalar_lea.vmem [#allocation4], %s3374_s29  ;;  %s329_s15 = int_to_ptr.hbm [resolvable:$true] %s328_s15 }
  0x32   : > { %s330_s19 = sshll.u32 %s321_s18, 4  ;;  %s3693_s2 = smov 24   ;;  %s331_s19 = int_to_ptr.vmem [resolvable:$true] %s330_s19 }
  0x33   : > { %3385 = dma.hbm_to_vmem [thread:$0]  (%p3766_p3), %s329_s15, 12288, %s331_s19, %s318_s14, %s3692_s16, %s3692_s16, %s3693_s2  }
  0x34 PF: > { %342 = sbr.rel (%p3788_p10) target bundleno = 712 (0x2c8), region = 78  ;;  %s345_s4 = sand.u32 (!%p3788_p10), 1, %s3666_s22  }
  0x35   : > { %s2312_s28 = sshll.u32 (!%p3788_p10), %s345_s4, 4  ;;  %s3376_s10 = smul.u32 (!%p3788_p10), 768, %s345_s4 }
  0x36   : > { %s3838_s20 = scalar_lea.vmem (!%p3788_p10), [#allocation3], %s2312_s28  ;;  %s352_s21 = scalar_lea.sflag (!%p3788_p10), [#allocation5], %s345_s4 }
  0x37   : > { %s3840_s27 = scalar_lea.vmem (!%p3788_p10), [#allocation4], %s3376_s10 }
  0x39   : > { %3649 = dma.done.wait (%p3780_p8), %s352_s21, 12288  }
  0x3a   : > { %3651 = vsyncadd (%p3780_p8), %s352_s21, 4294955008 }
  0x3b   : > { %3653 = dma.done.wait (%p3773_p5), [#allocation7], 12320  }
  0x3c   : > { %3655 = vsyncadd (%p3773_p5), [#allocation7], 4294954976 }
  0x3d   : > { %3657 = dma.done.wait (%p3773_p5), [#allocation10], 2064  }
  0x3e   : > { %3659 = vsyncadd (%p3773_p5), [#allocation10], 4294965232  ;;  %p2317_p0 = scmp.ne.s32.totalorder %s3674_s24, 0 }
  0x40   : > { %421 = sbr.rel (%p2317_p0) target bundleno = 82 (0x52), region = 106 }
  0x45   : > { %v3694_v2 = vmov 0.0  }
  0x46   : > { %422 = vst [vmem:[#allocation2 + $0x30] sm:$0xff] %v3694_v2 }
  0x47   : > { %423 = vst [vmem:[#allocation2] sm:$0xff] %v3694_v2 }
  0x48   : > { %424 = vst [vmem:[#allocation2 + $0x58] sm:$0xff] %v3694_v2 }
  0x49   : > { %425 = vst [vmem:[#allocation2 + $0x18] sm:$0xff] %v3694_v2 }
  0x4a   : > { %426 = vst [vmem:[#allocation2 + $0x50] sm:$0xff] %v3694_v2 }
  0x4b   : > { %427 = vst [vmem:[#allocation2 + $0x20] sm:$0xff] %v3694_v2 }
  0x4c   : > { %428 = vst [vmem:[#allocation2 + $0x8] sm:$0xff] %v3694_v2 }
  0x4d   : > { %429 = vst [vmem:[#allocation2 + $0x38] sm:$0xff] %v3694_v2 }
  0x4e   : > { %430 = vst [vmem:[#allocation2 + $0x28] sm:$0xff] %v3694_v2 }
  0x4f   : > { %431 = vst [vmem:[#allocation2 + $0x48] sm:$0xff] %v3694_v2 }
  0x50   : > { %432 = vst [vmem:[#allocation2 + $0x10] sm:$0xff] %v3694_v2 }
  0x51   : > { %433 = vst [vmem:[#allocation2 + $0x40] sm:$0xff] %v3694_v2 }
  0x52 PF: > { %v2496_v3 = vld [vmem:[%s3840_s27 + $0x150] sm:$0xf]  ;;  %v3211_v4 = vld [vmem:[%s3840_s27 + $0x164] sm:$0xf0]  ;;  %v3208_v8 = vld [vmem:[%s3840_s27 + $0x154] sm:$0xf] }
  0x53   : > { %v2688_v5 = vld [vmem:[%s3840_s27 + $0x2d0] sm:$0xf]  ;;  %v2497_v6 = vor.u32 %v3211_v4, %v2496_v3  ;;  %v3259_v7 = vld [vmem:[%s3840_s27 + $0x2e4] sm:$0xf0]  ;;  %v2498_v9 = vld [vmem:[%s3840_s27 + $0x168] sm:$0xf0] }
  0x54   : > { %v2689_v10 = vor.u32 %v3259_v7, %v2688_v5  ;;  %v2501_v11 = vor.u32 %v3208_v8, %v2498_v9  ;;  %v3256_v12 = vld [vmem:[%s3840_s27 + $0x2d4] sm:$0xf]  ;;  %v2690_v13 = vld [vmem:[%s3840_s27 + $0x2e8] sm:$0xf0]  ;;  %v2472_v14 = vld [vmem:[%s3840_s27 + $0x120] sm:$0xf] }
  0x55   : > { %1034 = vmatpush.bf16.msra.mxu0 %v2497_v6  ;;  %v2693_v15 = vor.u32 %v3256_v12, %v2690_v13  ;;  %v3205_v16 = vld [vmem:[%s3840_s27 + $0x134] sm:$0xf0]  ;;  %v2664_v17 = vld [vmem:[%s3840_s27 + $0x2a0] sm:$0xf]  ;;  %v3202_v21 = vld [vmem:[%s3840_s27 + $0x124] sm:$0xf] }
  0x56   : > { %v3253_v18 = vld [vmem:[%s3840_s27 + $0x2b4] sm:$0xf0]  ;;  %1048 = vmatpush.bf16.msra.mxu1 %v2689_v10  ;;  %1062 = vmatpush.bf16.msra.mxu2 %v2501_v11  ;;  %v2473_v19 = vor.u32 %v3205_v16, %v2472_v14  ;;  %v2474_v22 = vld [vmem:[%s3840_s27 + $0x138] sm:$0xf0]  ;;  %v3250_v23 = vld [vmem:[%s3840_s27 + $0x2a4] sm:$0xf] }
  0x57   : > { %v2665_v20 = vor.u32 %v3253_v18, %v2664_v17  ;;  %1076 = vmatpush.bf16.msra.mxu3 %v2693_v15  ;;  %v2477_v24 = vor.u32 %v3202_v21, %v2474_v22  ;;  %v2666_v25 = vld [vmem:[%s3840_s27 + $0x2b8] sm:$0xf0]  ;;  %v2448_v26 = vld [vmem:[%s3840_s27 + $0xf0] sm:$0xf]  ;;  %v3199_v27 = vld [vmem:[%s3840_s27 + $0x104] sm:$0xf0] }
  0x58   : > { %v2669_v28 = vor.u32 %v3250_v23, %v2666_v25  ;;  %v2640_v29 = vld [vmem:[%s3840_s27 + $0x270] sm:$0xf]  ;;  %v3247_v30 = vld [vmem:[%s3840_s27 + $0x284] sm:$0xf0]  ;;  %v3196_v31 = vld [vmem:[%s3840_s27 + $0xf4] sm:$0xf]  ;;  %v2449_v32 = vor.u32 %v3199_v27, %v2448_v26 }
  0x59   : > { %1035 = vmatpush.bf16.msra.mxu0 %v2473_v19  ;;  %v2450_v33 = vld [vmem:[%s3840_s27 + $0x108] sm:$0xf0]  ;;  %v3244_v34 = vld [vmem:[%s3840_s27 + $0x274] sm:$0xf]  ;;  %v2641_v36 = vor.u32 %v3247_v30, %v2640_v29  ;;  %v2424_v38 = vld [vmem:[%s3840_s27 + $0xc0] sm:$0xf] }
  0x5a   : > { %v2642_v35 = vld [vmem:[%s3840_s27 + $0x288] sm:$0xf0]  ;;  %1049 = vmatpush.bf16.msra.mxu1 %v2665_v20  ;;  %1063 = vmatpush.bf16.msra.mxu2 %v2477_v24  ;;  %v2453_v37 = vor.u32 %v3196_v31, %v2450_v33  ;;  %v3193_v39 = vld [vmem:[%s3840_s27 + $0xd4] sm:$0xf0]  ;;  %v2616_v40 = vld [vmem:[%s3840_s27 + $0x240] sm:$0xf] }
  0x5b   : > { %1077 = vmatpush.bf16.msra.mxu3 %v2669_v28  ;;  %v2645_v41 = vor.u32 %v3244_v34, %v2642_v35  ;;  %v3241_v42 = vld [vmem:[%s3840_s27 + $0x254] sm:$0xf0]  ;;  %v3190_v43 = vld [vmem:[%s3840_s27 + $0xc4] sm:$0xf]  ;;  %v2426_v44 = vld [vmem:[%s3840_s27 + $0xd8] sm:$0xf0]  ;;  %v2425_v47 = vor.u32 %v3193_v39, %v2424_v38 }
  0x5c   : > { %v3238_v45 = vld [vmem:[%s3840_s27 + $0x244] sm:$0xf]  ;;  %v2618_v46 = vld [vmem:[%s3840_s27 + $0x258] sm:$0xf0]  ;;  %v2617_v48 = vor.u32 %v3241_v42, %v2616_v40  ;;  %v2429_v49 = vor.u32 %v3190_v43, %v2426_v44  ;;  %v2400_v50 = vld [vmem:[%s3840_s27 + $0x90] sm:$0xf] }
  0x5d   : > { %1036 = vmatpush.bf16.msra.mxu0 %v2449_v32  ;;  %v3187_v51 = vld [vmem:[%s3840_s27 + $0xa4] sm:$0xf0]  ;;  %v2592_v52 = vld [vmem:[%s3840_s27 + $0x210] sm:$0xf]  ;;  %v2621_v53 = vor.u32 %v3238_v45, %v2618_v46  ;;  %v3184_v55 = vld [vmem:[%s3840_s27 + $0x94] sm:$0xf] }
  0x5e   : > { %1050 = vmatpush.bf16.msra.mxu1 %v2641_v36  ;;  %1064 = vmatpush.bf16.msra.mxu2 %v2453_v37  ;;  %v3235_v54 = vld [vmem:[%s3840_s27 + $0x224] sm:$0xf0]  ;;  %v2402_v56 = vld [vmem:[%s3840_s27 + $0xa8] sm:$0xf0]  ;;  %v3232_v57 = vld [vmem:[%s3840_s27 + $0x214] sm:$0xf]  ;;  %v2401_v59 = vor.u32 %v3187_v51, %v2400_v50 }
  0x5f   : > { %1078 = vmatpush.bf16.msra.mxu3 %v2645_v41  ;;  %v2594_v58 = vld [vmem:[%s3840_s27 + $0x228] sm:$0xf0]  ;;  %v2593_v60 = vor.u32 %v3235_v54, %v2592_v52  ;;  %v2405_v61 = vor.u32 %v3184_v55, %v2402_v56  ;;  %v2376_v62 = vld [vmem:[%s3840_s27 + $0x60] sm:$0xf]  ;;  %v3181_v63 = vld [vmem:[%s3840_s27 + $0x74] sm:$0xf0] }
  0x60   : > { %v2568_v0 = vld [vmem:[%s3840_s27 + $0x1e0] sm:$0xf]  ;;  %v2597_v1 = vor.u32 %v3232_v57, %v2594_v58  ;;  %v3229_v2 = vld [vmem:[%s3840_s27 + $0x1f4] sm:$0xf0]  ;;  %v3178_v3 = vld [vmem:[%s3840_s27 + $0x64] sm:$0xf]  ;;  %v2377_v7 = vor.u32 %v3181_v63, %v2376_v62 }
  0x61   : > { %1037 = vmatpush.bf16.msra.mxu0 %v2425_v47  ;;  %v2378_v4 = vld [vmem:[%s3840_s27 + $0x78] sm:$0xf0]  ;;  %v3226_v5 = vld [vmem:[%s3840_s27 + $0x1e4] sm:$0xf]  ;;  %v2569_v8 = vor.u32 %v3229_v2, %v2568_v0  ;;  %v2352_v10 = vld [vmem:[%s3840_s27 + $0x30] sm:$0xf] }
  0x62   : > { %1051 = vmatpush.bf16.msra.mxu1 %v2617_v48  ;;  %1065 = vmatpush.bf16.msra.mxu2 %v2429_v49  ;;  %v2570_v6 = vld [vmem:[%s3840_s27 + $0x1f8] sm:$0xf0]  ;;  %v2381_v9 = vor.u32 %v3178_v3, %v2378_v4  ;;  %v3175_v11 = vld [vmem:[%s3840_s27 + $0x44] sm:$0xf0]  ;;  %v2544_v12 = vld [vmem:[%s3840_s27 + $0x1b0] sm:$0xf] }
  0x63   : > { %1079 = vmatpush.bf16.msra.mxu3 %v2621_v53  ;;  %v2573_v13 = vor.u32 %v3226_v5, %v2570_v6  ;;  %v3223_v14 = vld [vmem:[%s3840_s27 + $0x1c4] sm:$0xf0]  ;;  %v3172_v15 = vld [vmem:[%s3840_s27 + $0x34] sm:$0xf]  ;;  %v2354_v16 = vld [vmem:[%s3840_s27 + $0x48] sm:$0xf0]  ;;  %v2353_v19 = vor.u32 %v3175_v11, %v2352_v10 }
  0x64   : > { %v3220_v17 = vld [vmem:[%s3840_s27 + $0x1b4] sm:$0xf]  ;;  %v2546_v18 = vld [vmem:[%s3840_s27 + $0x1c8] sm:$0xf0]  ;;  %v2328_v20 = vld [vmem:[%s3840_s27] sm:$0xf]  ;;  %v2545_v22 = vor.u32 %v3223_v14, %v2544_v12  ;;  %v2357_v23 = vor.u32 %v3172_v15, %v2354_v16 }
  0x65   : > { %1038 = vmatpush.bf16.msra.mxu0 %v2401_v59  ;;  %v3169_v21 = vld [vmem:[%s3840_s27 + $0x14] sm:$0xf0]  ;;  %v2520_v24 = vld [vmem:[%s3840_s27 + $0x180] sm:$0xf]  ;;  %v3166_v26 = vld [vmem:[%s3840_s27 + $0x4] sm:$0xf]  ;;  %v2549_v27 = vor.u32 %v3220_v17, %v2546_v18 }
  0x66   : > { %1052 = vmatpush.bf16.msra.mxu1 %v2593_v60  ;;  %1066 = vmatpush.bf16.msra.mxu2 %v2405_v61  ;;  %v3217_v25 = vld [vmem:[%s3840_s27 + $0x194] sm:$0xf0]  ;;  %v2330_v28 = vld [vmem:[%s3840_s27 + $0x18] sm:$0xf0]  ;;  %v3214_v29 = vld [vmem:[%s3840_s27 + $0x184] sm:$0xf]  ;;  %v2329_v34 = vor.u32 %v3169_v21, %v2328_v20 }
  0x67   : > { %1080 = vmatpush.bf16.msra.mxu3 %v2597_v1  ;;  %v2522_v30 = vld [vmem:[%s3840_s27 + $0x198] sm:$0xf0]  ;;  %v2504_v31 = vld [vmem:[%s3840_s27 + $0x158] sm:$0xf]  ;;  %v3212_v32 = vld [vmem:[%s3840_s27 + $0x16c] sm:$0xf0]  ;;  %v2521_v38 = vor.u32 %v3217_v25, %v2520_v24  ;;  %v2333_v39 = vor.u32 %v3166_v26, %v2330_v28 }
  0x68   : > { %v2696_v33 = vld [vmem:[%s3840_s27 + $0x2d8] sm:$0xf]  ;;  %v3260_v35 = vld [vmem:[%s3840_s27 + $0x2ec] sm:$0xf0]  ;;  %v3209_v36 = vld [vmem:[%s3840_s27 + $0x15c] sm:$0xf]  ;;  %v2525_v42 = vor.u32 %v3214_v29, %v2522_v30  ;;  %v2505_v43 = vor.u32 %v3212_v32, %v2504_v31 }
  0x69   : > { %1039 = vmatpush.bf16.msra.mxu0 %v2377_v7  ;;  %v2506_v37 = vld [vmem:[%s3840_s27 + $0x170] sm:$0xf0]  ;;  %v3257_v40 = vld [vmem:[%s3840_s27 + $0x2dc] sm:$0xf]  ;;  %v2697_v44 = vor.u32 %v3260_v35, %v2696_v33  ;;  %v2480_v46 = vld [vmem:[%s3840_s27 + $0x128] sm:$0xf] }
  0x6a   : > { %1053 = vmatpush.bf16.msra.mxu1 %v2569_v8  ;;  %1067 = vmatpush.bf16.msra.mxu2 %v2381_v9  ;;  %v2698_v41 = vld [vmem:[%s3840_s27 + $0x2f0] sm:$0xf0]  ;;  %v2509_v45 = vor.u32 %v3209_v36, %v2506_v37  ;;  %v3206_v47 = vld [vmem:[%s3840_s27 + $0x13c] sm:$0xf0]  ;;  %v2672_v48 = vld [vmem:[%s3840_s27 + $0x2a8] sm:$0xf] }
  0x6b   : > { %1081 = vmatpush.bf16.msra.mxu3 %v2573_v13  ;;  %v2701_v49 = vor.u32 %v3257_v40, %v2698_v41  ;;  %v3254_v50 = vld [vmem:[%s3840_s27 + $0x2bc] sm:$0xf0]  ;;  %v3203_v51 = vld [vmem:[%s3840_s27 + $0x12c] sm:$0xf]  ;;  %v2482_v52 = vld [vmem:[%s3840_s27 + $0x140] sm:$0xf0]  ;;  %v2481_v56 = vor.u32 %v3206_v47, %v2480_v46 }
  0x6c   : > { %v3251_v53 = vld [vmem:[%s3840_s27 + $0x2ac] sm:$0xf]  ;;  %v2674_v54 = vld [vmem:[%s3840_s27 + $0x2c0] sm:$0xf0]  ;;  %v2456_v55 = vld [vmem:[%s3840_s27 + $0xf8] sm:$0xf]  ;;  %v2673_v60 = vor.u32 %v3254_v50, %v2672_v48  ;;  %v2485_v61 = vor.u32 %v3203_v51, %v2482_v52 }
  0x6d   : > { %1040 = vmatpush.bf16.msra.mxu0 %v2353_v19  ;;  %v3200_v57 = vld [vmem:[%s3840_s27 + $0x10c] sm:$0xf0]  ;;  %v2648_v58 = vld [vmem:[%s3840_s27 + $0x278] sm:$0xf]  ;;  %v3197_v62 = vld [vmem:[%s3840_s27 + $0xfc] sm:$0xf]  ;;  %v2677_v1 = vor.u32 %v3251_v53, %v2674_v54 }
  0x6e   : > { %1054 = vmatpush.bf16.msra.mxu1 %v2545_v22  ;;  %1068 = vmatpush.bf16.msra.mxu2 %v2357_v23  ;;  %v3248_v59 = vld [vmem:[%s3840_s27 + $0x28c] sm:$0xf0]  ;;  %v2458_v63 = vld [vmem:[%s3840_s27 + $0x110] sm:$0xf0]  ;;  %v3165_v2 = vld [vmem:[%s3838_s20 + $0x4] sm:$0xf0]  ;;  %v2457_v9 = vor.u32 %v3200_v57, %v2456_v55 }
  0x6f   : > { %1082 = vmatpush.bf16.msra.mxu3 %v2549_v27  ;;  %v2320_v0 = vld [vmem:[%s3838_s20] sm:$0xf]  ;;  %v3164_v3 = vld [vmem:[%s3838_s20 + $0x4] sm:$0xf]  ;;  %v2322_v4 = vld [vmem:[%s3838_s20 + $0x8] sm:$0xf0]  ;;  %v2649_v10 = vor.u32 %v3248_v59, %v2648_v58  ;;  %v2461_v11 = vor.u32 %v3197_v62, %v2458_v63 }
  0x70   : > { %v3245_v5 = vld [vmem:[%s3840_s27 + $0x27c] sm:$0xf]  ;;  %v2650_v6 = vld [vmem:[%s3840_s27 + $0x290] sm:$0xf0]  ;;  %v3947_v7 = vor.u32 %v3165_v2, %v2320_v0  ;;  %v3949_v8 = vor.u32 %v3164_v3, %v2322_v4  ;;  %v2432_v12 = vld [vmem:[%s3840_s27 + $0xc8] sm:$0xf] }
  0x71   : > { %1041 = vmatpush.bf16.msra.mxu0 %v2329_v34  ;;  %v3194_v13 = vld [vmem:[%s3840_s27 + $0xdc] sm:$0xf0]  ;;  %v2624_v14 = vld [vmem:[%s3840_s27 + $0x248] sm:$0xf]  ;;  %v2653_v15 = vor.u32 %v3245_v5, %v2650_v6  ;;  %v3191_v17 = vld [vmem:[%s3840_s27 + $0xcc] sm:$0xf] }
  0x72   : > { %1055 = vmatpush.bf16.msra.mxu1 %v2521_v38  ;;  %1069 = vmatpush.bf16.msra.mxu2 %v2333_v39  ;;  %v3242_v16 = vld [vmem:[%s3840_s27 + $0x25c] sm:$0xf0]  ;;  %v2434_v18 = vld [vmem:[%s3840_s27 + $0xe0] sm:$0xf0]  ;;  %v3239_v19 = vld [vmem:[%s3840_s27 + $0x24c] sm:$0xf]  ;;  %v2433_v21 = vor.u32 %v3194_v13, %v2432_v12 }
  0x73   : > { %1083 = vmatpush.bf16.msra.mxu3 %v2525_v42  ;;  %v2626_v20 = vld [vmem:[%s3840_s27 + $0x260] sm:$0xf0]  ;;  %v2625_v22 = vor.u32 %v3242_v16, %v2624_v14  ;;  %v2437_v23 = vor.u32 %v3191_v17, %v2434_v18  ;;  %v2408_v24 = vld [vmem:[%s3840_s27 + $0x98] sm:$0xf]  ;;  %v3188_v25 = vld [vmem:[%s3840_s27 + $0xac] sm:$0xf0] }
  0x74   : > { %1042 = vmatmul.bf16.vlgmr.msra.gmra.mxu0 %v3947_v7  ;;  %v2600_v26 = vld [vmem:[%s3840_s27 + $0x218] sm:$0xf]  ;;  %v2629_v27 = vor.u32 %v3239_v19, %v2626_v20  ;;  %v3236_v28 = vld [vmem:[%s3840_s27 + $0x22c] sm:$0xf0]  ;;  %v3185_v29 = vld [vmem:[%s3840_s27 + $0x9c] sm:$0xf]  ;;  %v2409_v33 = vor.u32 %v3188_v25, %v2408_v24 }
  0x75   : > { %1090 = vmatpush.bf16.msrb.mxu0 %v2505_v43  ;;  %1070 = vmatmul.bf16.vlgmr.msra.gmra.mxu2 %v3947_v7  ;;  %v2410_v30 = vld [vmem:[%s3840_s27 + $0xb0] sm:$0xf0]  ;;  %v3233_v31 = vld [vmem:[%s3840_s27 + $0x21c] sm:$0xf]  ;;  %v2601_v34 = vor.u32 %v3236_v28, %v2600_v26  ;;  %v2384_v36 = vld [vmem:[%s3840_s27 + $0x68] sm:$0xf] }
  0x76   : > { %1104 = vmatpush.bf16.msrb.mxu1 %v2697_v44  ;;  %1118 = vmatpush.bf16.msrb.mxu2 %v2509_v45  ;;  %v2602_v32 = vld [vmem:[%s3840_s27 + $0x230] sm:$0xf0]  ;;  %v2413_v35 = vor.u32 %v3185_v29, %v2410_v30  ;;  %v3182_v37 = vld [vmem:[%s3840_s27 + $0x7c] sm:$0xf0]  ;;  %v2576_v38 = vld [vmem:[%s3840_s27 + $0x1e8] sm:$0xf] }
  0x77   : > { %1132 = vmatpush.bf16.msrb.mxu3 %v2701_v49  ;;  %1056 = vmatmul.bf16.vlgmr.msra.gmra.mxu1 %v3949_v8  ;;  %v2605_v39 = vor.u32 %v3233_v31, %v2602_v32  ;;  %v3230_v40 = vld [vmem:[%s3840_s27 + $0x1fc] sm:$0xf0]  ;;  %v3179_v41 = vld [vmem:[%s3840_s27 + $0x6c] sm:$0xf]  ;;  %v2386_v42 = vld [vmem:[%s3840_s27 + $0x80] sm:$0xf0]  ;;  %v2385_v45 = vor.u32 %v3182_v37, %v2384_v36 }
  0x78   : > { %1084 = vmatmul.bf16.vlgmr.msra.gmra.mxu3 %v3949_v8  ;;  %v3227_v43 = vld [vmem:[%s3840_s27 + $0x1ec] sm:$0xf]  ;;  %v2578_v44 = vld [vmem:[%s3840_s27 + $0x200] sm:$0xf0]  ;;  %v2577_v46 = vor.u32 %v3230_v40, %v2576_v38  ;;  %v2389_v47 = vor.u32 %v3179_v41, %v2386_v42  ;;  %v2360_v48 = vld [vmem:[%s3840_s27 + $0x38] sm:$0xf] }
  0x79   : > { %1091 = vmatpush.bf16.msrb.mxu0 %v2481_v56  ;;  %v3176_v49 = vld [vmem:[%s3840_s27 + $0x4c] sm:$0xf0]  ;;  %v2552_v50 = vld [vmem:[%s3840_s27 + $0x1b8] sm:$0xf]  ;;  %v2581_v51 = vor.u32 %v3227_v43, %v2578_v44  ;;  %v3173_v53 = vld [vmem:[%s3840_s27 + $0x3c] sm:$0xf] }
  0x7a   : > { %1105 = vmatpush.bf16.msrb.mxu1 %v2673_v60  ;;  %1119 = vmatpush.bf16.msrb.mxu2 %v2485_v61  ;;  %v3224_v52 = vld [vmem:[%s3840_s27 + $0x1cc] sm:$0xf0]  ;;  %v2362_v54 = vld [vmem:[%s3840_s27 + $0x50] sm:$0xf0]  ;;  %v3221_v55 = vld [vmem:[%s3840_s27 + $0x1bc] sm:$0xf]  ;;  %v2361_v57 = vor.u32 %v3176_v49, %v2360_v48 }
  0x7b   : > { %1133 = vmatpush.bf16.msrb.mxu3 %v2677_v1  ;;  %v2554_v56 = vld [vmem:[%s3840_s27 + $0x1d0] sm:$0xf0]  ;;  %v2336_v58 = vld [vmem:[%s3840_s27 + $0x8] sm:$0xf]  ;;  %v3170_v59 = vld [vmem:[%s3840_s27 + $0x1c] sm:$0xf0]  ;;  %v2553_v60 = vor.u32 %v3224_v52, %v2552_v50  ;;  %v2365_v61 = vor.u32 %v3173_v53, %v2362_v54 }
  0x7c   : > { %v2528_v62 = vld [vmem:[%s3840_s27 + $0x188] sm:$0xf]  ;;  %v3218_v63 = vld [vmem:[%s3840_s27 + $0x19c] sm:$0xf0]  ;;  %v3167_v0 = vld [vmem:[%s3840_s27 + $0xc] sm:$0xf]  ;;  %v2557_v1 = vor.u32 %v3221_v55, %v2554_v56 }
  0x7d   : > { %1092 = vmatpush.bf16.msrb.mxu0 %v2457_v9  ;;  %v2338_v2 = vld [vmem:[%s3840_s27 + $0x20] sm:$0xf0]  ;;  %v3215_v3 = vld [vmem:[%s3840_s27 + $0x18c] sm:$0xf]  ;;  %v2512_v5 = vld [vmem:[%s3840_s27 + $0x160] sm:$0xf]  ;;  %v2529_v14 = vor.u32 %v3218_v63, %v2528_v62 }
  0x7e   : > { %1106 = vmatpush.bf16.msrb.mxu1 %v2649_v10  ;;  %1120 = vmatpush.bf16.msrb.mxu2 %v2461_v11  ;;  %v2530_v4 = vld [vmem:[%s3840_s27 + $0x1a0] sm:$0xf0]  ;;  %v3213_v6 = vld [vmem:[%s3840_s27 + $0x174] sm:$0xf0]  ;;  %v2704_v9 = vld [vmem:[%s3840_s27 + $0x2e0] sm:$0xf]  ;;  %v2337_v10 = vor.u32 %v3170_v59, %v2336_v58 }
  0x7f   : > { %1134 = vmatpush.bf16.msrb.mxu3 %v2653_v15  ;;  %v3261_v11 = vld [vmem:[%s3840_s27 + $0x2f4] sm:$0xf0]  ;;  %v3210_v12 = vld [vmem:[%s3840_s27 + $0x164] sm:$0xf]  ;;  %v2514_v13 = vld [vmem:[%s3840_s27 + $0x178] sm:$0xf0]  ;;  %v2341_v15 = vor.u32 %v3167_v0, %v2338_v2  ;;  %v2533_v18 = vor.u32 %v3215_v3, %v2530_v4  ;;  %v2513_v19 = vor.u32 %v3213_v6, %v2512_v5 }
  0x80   : > { %v3258_v16 = vld [vmem:[%s3840_s27 + $0x2e4] sm:$0xf]  ;;  %v2706_v17 = vld [vmem:[%s3840_s27 + $0x2f8] sm:$0xf0]  ;;  %v2705_v20 = vor.u32 %v3261_v11, %v2704_v9  ;;  %v2680_v24 = vld [vmem:[%s3840_s27 + $0x2b0] sm:$0xf] }
  0x81   : > { %1093 = vmatpush.bf16.msrb.mxu0 %v2433_v21  ;;  %v2517_v21 = vor.u32 %v3210_v12, %v2514_v13  ;;  %v2709_v25 = vor.u32 %v3258_v16, %v2706_v17  ;;  %v3255_v26 = vld [vmem:[%s3840_s27 + $0x2c4] sm:$0xf0]  ;;  %v2490_v28 = vld [vmem:[%s3840_s27 + $0x148] sm:$0xf0]  ;;  %v3252_v29 = vld [vmem:[%s3840_s27 + $0x2b4] sm:$0xf] }
  0x82   : > { %1107 = vmatpush.bf16.msrb.mxu1 %v2625_v22  ;;  %1121 = vmatpush.bf16.msrb.mxu2 %v2437_v23  ;;  %v2488_v22 = vld [vmem:[%s3840_s27 + $0x130] sm:$0xf]  ;;  %v3207_v23 = vld [vmem:[%s3840_s27 + $0x144] sm:$0xf0]  ;;  %v2682_v30 = vld [vmem:[%s3840_s27 + $0x2c8] sm:$0xf0]  ;;  %v2681_v32 = vor.u32 %v3255_v26, %v2680_v24 }
  0x83   : > { %1135 = vmatpush.bf16.msrb.mxu3 %v2629_v27  ;;  %v3204_v27 = vld [vmem:[%s3840_s27 + $0x134] sm:$0xf]  ;;  %v2489_v31 = vor.u32 %v3207_v23, %v2488_v22  ;;  %v2656_v36 = vld [vmem:[%s3840_s27 + $0x280] sm:$0xf]  ;;  %v2685_v37 = vor.u32 %v3252_v29, %v2682_v30  ;;  %v3249_v38 = vld [vmem:[%s3840_s27 + $0x294] sm:$0xf0] }
  0x84   : > { %v2466_v40 = vld [vmem:[%s3840_s27 + $0x118] sm:$0xf0]  ;;  %v3246_v41 = vld [vmem:[%s3840_s27 + $0x284] sm:$0xf]  ;;  %v2657_v44 = vor.u32 %v3249_v38, %v2656_v36  ;;  %v2632_v48 = vld [vmem:[%s3840_s27 + $0x250] sm:$0xf] }
  0x85   : > { %1094 = vmatpush.bf16.msrb.mxu0 %v2409_v33  ;;  %v2493_v33 = vor.u32 %v3204_v27, %v2490_v28  ;;  %v2658_v42 = vld [vmem:[%s3840_s27 + $0x298] sm:$0xf0]  ;;  %v3243_v50 = vld [vmem:[%s3840_s27 + $0x264] sm:$0xf0]  ;;  %v2442_v52 = vld [vmem:[%s3840_s27 + $0xe8] sm:$0xf0] }
  0x86   : > { %1108 = vmatpush.bf16.msrb.mxu1 %v2601_v34  ;;  %1122 = vmatpush.bf16.msrb.mxu2 %v2413_v35  ;;  %v2464_v34 = vld [vmem:[%s3840_s27 + $0x100] sm:$0xf]  ;;  %v3201_v35 = vld [vmem:[%s3840_s27 + $0x114] sm:$0xf0]  ;;  %v2661_v49 = vor.u32 %v3246_v41, %v2658_v42  ;;  %v3240_v53 = vld [vmem:[%s3840_s27 + $0x254] sm:$0xf]  ;;  %v2633_v56 = vor.u32 %v3243_v50, %v2632_v48 }
  0x87   : > { %1136 = vmatpush.bf16.msrb.mxu3 %v2605_v39  ;;  %v3198_v39 = vld [vmem:[%s3840_s27 + $0x104] sm:$0xf]  ;;  %v2465_v43 = vor.u32 %v3201_v35, %v2464_v34  ;;  %v2634_v54 = vld [vmem:[%s3840_s27 + $0x268] sm:$0xf0]  ;;  %v2416_v58 = vld [vmem:[%s3840_s27 + $0xa0] sm:$0xf] }
  0x88   : > { %v3189_v59 = vld [vmem:[%s3840_s27 + $0xb4] sm:$0xf0]  ;;  %v3186_v63 = vld [vmem:[%s3840_s27 + $0xa4] sm:$0xf]  ;;  %v2418_v0 = vld [vmem:[%s3840_s27 + $0xb8] sm:$0xf0] }
  0x89   : > { %1095 = vmatpush.bf16.msrb.mxu0 %v2385_v45  ;;  %v2469_v45 = vor.u32 %v3198_v39, %v2466_v40  ;;  %v3237_v62 = vld [vmem:[%s3840_s27 + $0x234] sm:$0xf0]  ;;  %v2610_v2 = vld [vmem:[%s3840_s27 + $0x238] sm:$0xf0]  ;;  %v2417_v3 = vor.u32 %v3189_v59, %v2416_v58  ;;  %v2421_v5 = vor.u32 %v3186_v63, %v2418_v0  ;;  %v2392_v6 = vld [vmem:[%s3840_s27 + $0x70] sm:$0xf] }
  0x8a   : > { %1109 = vmatpush.bf16.msrb.mxu1 %v2577_v46  ;;  %1123 = vmatpush.bf16.msrb.mxu2 %v2389_v47  ;;  %v2440_v46 = vld [vmem:[%s3840_s27 + $0xd0] sm:$0xf]  ;;  %v3195_v47 = vld [vmem:[%s3840_s27 + $0xe4] sm:$0xf0]  ;;  %v3180_v13 = vld [vmem:[%s3840_s27 + $0x74] sm:$0xf] }
  0x8b   : > { %1137 = vmatpush.bf16.msrb.mxu3 %v2581_v51  ;;  %v3192_v51 = vld [vmem:[%s3840_s27 + $0xd4] sm:$0xf]  ;;  %v2441_v55 = vor.u32 %v3195_v47, %v2440_v46  ;;  %v3183_v9 = vld [vmem:[%s3840_s27 + $0x84] sm:$0xf0]  ;;  %v2586_v16 = vld [vmem:[%s3840_s27 + $0x208] sm:$0xf0] }
  0x8c   : > { %v3231_v12 = vld [vmem:[%s3840_s27 + $0x204] sm:$0xf0]  ;;  %v2393_v17 = vor.u32 %v3183_v9, %v2392_v6  ;;  %v2560_v22 = vld [vmem:[%s3840_s27 + $0x1c0] sm:$0xf]  ;;  %v3225_v24 = vld [vmem:[%s3840_s27 + $0x1d4] sm:$0xf0] }
  0x8d   : > { %1096 = vmatpush.bf16.msrb.mxu0 %v2361_v57  ;;  %v2445_v57 = vor.u32 %v3192_v51, %v2442_v52  ;;  %v2370_v26 = vld [vmem:[%s3840_s27 + $0x58] sm:$0xf0]  ;;  %v3222_v27 = vld [vmem:[%s3840_s27 + $0x1c4] sm:$0xf]  ;;  %v2561_v30 = vor.u32 %v3225_v24, %v2560_v22  ;;  %v2536_v34 = vld [vmem:[%s3840_s27 + $0x190] sm:$0xf] }
  0x8e   : > { %1110 = vmatpush.bf16.msrb.mxu1 %v2553_v60  ;;  %1124 = vmatpush.bf16.msrb.mxu2 %v2365_v61  ;;  %v2608_v60 = vld [vmem:[%s3840_s27 + $0x220] sm:$0xf]  ;;  %v2637_v61 = vor.u32 %v3240_v53, %v2634_v54  ;;  %v2562_v28 = vld [vmem:[%s3840_s27 + $0x1d8] sm:$0xf0]  ;;  %v3219_v36 = vld [vmem:[%s3840_s27 + $0x1a4] sm:$0xf0] }
  0x8f   : > { %1138 = vmatpush.bf16.msrb.mxu3 %v2557_v1  ;;  %v3234_v1 = vld [vmem:[%s3840_s27 + $0x224] sm:$0xf]  ;;  %v2609_v4 = vor.u32 %v3237_v62, %v2608_v60  ;;  %v2565_v35 = vor.u32 %v3222_v27, %v2562_v28  ;;  %v2346_v38 = vld [vmem:[%s3840_s27 + $0x28] sm:$0xf0]  ;;  %v3216_v39 = vld [vmem:[%s3840_s27 + $0x194] sm:$0xf]  ;;  %v2537_v42 = vor.u32 %v3219_v36, %v2536_v34 }
  0x90   : > { %v2613_v11 = vor.u32 %v3234_v1, %v2610_v2  ;;  %v2538_v40 = vld [vmem:[%s3840_s27 + $0x1a8] sm:$0xf0]  ;;  %v434_v46 = vld [vmem:[#allocation2 + $0x30] sm:$0xff]  ;;  %v435_v51 = vld [vmem:[#allocation2] sm:$0xff]  ;;  %p2710_p1 = scmp.ne.s32.totalorder %s3674_s24, 2 }
  0x91   : > { %1097 = vmatpush.bf16.msrb.mxu0 %v2337_v10  ;;  %v2584_v10 = vld [vmem:[%s3840_s27 + $0x1f0] sm:$0xf]  ;;  %v436_v0 = vld [vmem:[#allocation2 + $0x58] sm:$0xff]  ;;  %v439_v27 = vld [vmem:[#allocation2 + $0x20] sm:$0xff]  ;;  %s4137_s8 = sld [smem:[#allocation19_spill]] (!%p2710_p1) }
  0x92   : > { %1111 = vmatpush.bf16.msrb.mxu1 %v2529_v14  ;;  %1125 = vmatpush.bf16.msrb.mxu2 %v2341_v15  ;;  %v2394_v14 = vld [vmem:[%s3840_s27 + $0x88] sm:$0xf0]  ;;  %v3228_v15 = vld [vmem:[%s3840_s27 + $0x1f4] sm:$0xf] }
  0x93   : > { %1139 = vmatpush.bf16.msrb.mxu3 %v2533_v18  ;;  %v2585_v18 = vor.u32 %v3231_v12, %v2584_v10  ;;  %v2589_v23 = vor.u32 %v3228_v15, %v2586_v16  ;;  %v442_v12 = vld [vmem:[#allocation2 + $0x28] sm:$0xff]  ;;  %v438_v22 = vld [vmem:[#allocation2 + $0x50] sm:$0xff] }
  0x94   : > { %1098 = vmatmul.bf16.vlgmr.msrb.gmra.mxu0 %v3947_v7 }
  0x95   : > { %1146 = vmatpush.bf16.msra.mxu0 %v2513_v19  ;;  %1126 = vmatmul.bf16.vlgmr.msrb.gmra.mxu2 %v3947_v7  ;;  %v2397_v19 = vor.u32 %v3180_v13, %v2394_v14 }
  0x96   : > { %1160 = vmatpush.bf16.msra.mxu1 %v2705_v20  ;;  %1174 = vmatpush.bf16.msra.mxu2 %v2517_v21  ;;  %v2368_v20 = vld [vmem:[%s3840_s27 + $0x40] sm:$0xf]  ;;  %v3177_v21 = vld [vmem:[%s3840_s27 + $0x54] sm:$0xf0] }
  0x97   : > { %1188 = vmatpush.bf16.msra.mxu3 %v2709_v25  ;;  %1112 = vmatmul.bf16.vlgmr.msrb.gmra.mxu1 %v3949_v8  ;;  %v3174_v25 = vld [vmem:[%s3840_s27 + $0x44] sm:$0xf]  ;;  %v2369_v29 = vor.u32 %v3177_v21, %v2368_v20 }
  0x98   : > { %1140 = vmatmul.bf16.vlgmr.msrb.gmra.mxu3 %v3949_v8 }
  0x99   : > { %1147 = vmatpush.bf16.msra.mxu0 %v2489_v31  ;;  %v2373_v31 = vor.u32 %v3174_v25, %v2370_v26 }
  0x9a   : > { %1161 = vmatpush.bf16.msra.mxu1 %v2681_v32  ;;  %1175 = vmatpush.bf16.msra.mxu2 %v2493_v33  ;;  %v2344_v32 = vld [vmem:[%s3840_s27 + $0x10] sm:$0xf]  ;;  %v3171_v33 = vld [vmem:[%s3840_s27 + $0x24] sm:$0xf0] }
  0x9b   : > { %1189 = vmatpush.bf16.msra.mxu3 %v2685_v37  ;;  %v3168_v37 = vld [vmem:[%s3840_s27 + $0x14] sm:$0xf]  ;;  %v2345_v41 = vor.u32 %v3171_v33, %v2344_v32 }
  0x9d   : > { %1148 = vmatpush.bf16.msra.mxu0 %v2465_v43  ;;  %v2349_v43 = vor.u32 %v3168_v37, %v2346_v38  ;;  %v445_v37 = vld [vmem:[#allocation2 + $0x40] sm:$0xff] }
  0x9e   : > { %1162 = vmatpush.bf16.msra.mxu1 %v2657_v44  ;;  %1176 = vmatpush.bf16.msra.mxu2 %v2469_v45  ;;  %v2541_v44 = vor.u32 %v3216_v39, %v2538_v40 }
  0x9f   : > { %1190 = vmatpush.bf16.msra.mxu3 %v2661_v49 }
  0xa1   : > { %1149 = vmatpush.bf16.msra.mxu0 %v2441_v55 }
  0xa2   : > { %1163 = vmatpush.bf16.msra.mxu1 %v2633_v56  ;;  %1177 = vmatpush.bf16.msra.mxu2 %v2445_v57  ;;  %v440_v56 = vld [vmem:[#allocation2 + $0x8] sm:$0xff] }
  0xa3   : > { %1191 = vmatpush.bf16.msra.mxu3 %v2637_v61 }
  0xa5   : > { %1150 = vmatpush.bf16.msra.mxu0 %v2417_v3 }
  0xa6   : > { %1164 = vmatpush.bf16.msra.mxu1 %v2609_v4  ;;  %1178 = vmatpush.bf16.msra.mxu2 %v2421_v5  ;;  %v437_v5 = vld [vmem:[#allocation2 + $0x18] sm:$0xff] }
  0xa7   : > { %1192 = vmatpush.bf16.msra.mxu3 %v2613_v11 }
  0xa9   : > { %1151 = vmatpush.bf16.msra.mxu0 %v2393_v17  ;;  %v443_v17 = vld [vmem:[#allocation2 + $0x48] sm:$0xff] }
  0xaa   : > { %1165 = vmatpush.bf16.msra.mxu1 %v2585_v18  ;;  %1179 = vmatpush.bf16.msra.mxu2 %v2397_v19 }
  0xab   : > { %1193 = vmatpush.bf16.msra.mxu3 %v2589_v23 }
  0xad   : > { %1152 = vmatpush.bf16.msra.mxu0 %v2369_v29 }
  0xae   : > { %1166 = vmatpush.bf16.msra.mxu1 %v2561_v30  ;;  %1180 = vmatpush.bf16.msra.mxu2 %v2373_v31  ;;  %v444_v31 = vld [vmem:[#allocation2 + $0x10] sm:$0xff] }
  0xaf   : > { %1194 = vmatpush.bf16.msra.mxu3 %v2565_v35 }
  0xb1   : > { %1153 = vmatpush.bf16.msra.mxu0 %v2345_v41 }
  0xb2   : > { %1167 = vmatpush.bf16.msra.mxu1 %v2537_v42  ;;  %1181 = vmatpush.bf16.msra.mxu2 %v2349_v43 }
  0xb3   : > { %1195 = vmatpush.bf16.msra.mxu3 %v2541_v44 }
  0xb4   : > { %1154 = vmatmul.bf16.vlgmr.msra.gmra.mxu0 %v3947_v7 }
  0xb5   : > { %1168 = vmatmul.bf16.vlgmr.msra.gmra.mxu1 %v3949_v8  ;;  %1182 = vmatmul.bf16.vlgmr.msra.gmra.mxu2 %v3947_v7 }
  0xb6   : > { %1196 = vmatmul.bf16.vlgmr.msra.gmra.mxu3 %v3949_v8  ;;  %v441_v8 = vld [vmem:[#allocation2 + $0x38] sm:$0xff] }
  0xf1   : > { %v1043_v45 = vpop.f32.mrf.mxu0 }
  0xf4   : > { %v1057_v47 = vpop.f32.mrf.mxu1 }
  0xf5   : > { %v1058_v48 = vadd.f32 %v1057_v47, %v1043_v45 }
  0xf7   : > { %v1202_v49 = vadd.f32 %v1058_v48, %v434_v46 }
  0xf8   : > { %v1071_v50 = vpop.f32.mrf.mxu2 }
  0xf9   : > { %1214 = vst [vmem:[#allocation2 + $0x30] sm:$0xff] %v1202_v49  ;;  %v1045_v54 = vpop.f32.mrf.mxu0 }
  0xfb   : > { %v1085_v52 = vpop.f32.mrf.mxu3 }
  0xfc   : > { %v1086_v53 = vadd.f32 %v1085_v52, %v1071_v50  ;;  %v1059_v57 = vpop.f32.mrf.mxu1 }
  0xfd   : > { %v1060_v58 = vadd.f32 %v1059_v57, %v1045_v54 }
  0xfe   : > { %v1203_v55 = vadd.f32 %v1086_v53, %v435_v51 }
  0xff   : > { %v1208_v59 = vadd.f32 %v1060_v58, %v440_v56 }
 0x100   : > { %1215 = vst [vmem:[#allocation2] sm:$0xff] %v1203_v55  ;;  %v1073_v7 = vpop.f32.mrf.mxu2 }
 0x101   : > { %1220 = vst [vmem:[#allocation2 + $0x8] sm:$0xff] %v1208_v59 }
 0x103   : > { %v1087_v60 = vpop.f32.mrf.mxu3 }
 0x104   : > { %v1088_v61 = vadd.f32 %v1087_v60, %v1073_v7 }
 0x106   : > { %v1209_v62 = vadd.f32 %v1088_v61, %v441_v8 }
 0x108   : > { %1221 = vst [vmem:[#allocation2 + $0x38] sm:$0xff] %v1209_v62 }
 0x111   : > { %v1099_v63 = vpop.f32.mrf.mxu0 }
 0x114   : > { %v1113_v1 = vpop.f32.mrf.mxu1 }
 0x115   : > { %v1114_v2 = vadd.f32 %v1113_v1, %v1099_v63 }
 0x117   : > { %v1204_v3 = vadd.f32 %v1114_v2, %v436_v0 }
 0x118   : > { %v1127_v4 = vpop.f32.mrf.mxu2 }
 0x119   : > { %1216 = vst [vmem:[#allocation2 + $0x58] sm:$0xff] %v1204_v3  ;;  %v1101_v10 = vpop.f32.mrf.mxu0 }
 0x11b   : > { %v1141_v6 = vpop.f32.mrf.mxu3 }
 0x11c   : > { %v1142_v9 = vadd.f32 %v1141_v6, %v1127_v4  ;;  %v1115_v13 = vpop.f32.mrf.mxu1 }
 0x11d   : > { %v1116_v14 = vadd.f32 %v1115_v13, %v1101_v10 }
 0x11e   : > { %v1205_v11 = vadd.f32 %v1142_v9, %v437_v5 }
 0x11f   : > { %v1210_v15 = vadd.f32 %v1116_v14, %v442_v12 }
 0x120   : > { %1217 = vst [vmem:[#allocation2 + $0x18] sm:$0xff] %v1205_v11  ;;  %v1129_v16 = vpop.f32.mrf.mxu2 }
 0x121   : > { %1222 = vst [vmem:[#allocation2 + $0x28] sm:$0xff] %v1210_v15 }
 0x123   : > { %v1143_v18 = vpop.f32.mrf.mxu3 }
 0x124   : > { %v1144_v19 = vadd.f32 %v1143_v18, %v1129_v16 }
 0x126   : > { %v1211_v20 = vadd.f32 %v1144_v19, %v443_v17 }
 0x128   : > { %1223 = vst [vmem:[#allocation2 + $0x48] sm:$0xff] %v1211_v20 }
 0x131   : > { %v1155_v21 = vpop.f32.mrf.mxu0 }
 0x132   : > { %v1169_v23 = vpop.f32.mrf.mxu1 }
 0x133   : > { %v1170_v24 = vadd.f32 %v1169_v23, %v1155_v21 }
 0x135   : > { %v1206_v25 = vadd.f32 %v1170_v24, %v438_v22 }
 0x137   : > { %1218 = vst [vmem:[#allocation2 + $0x50] sm:$0xff] %v1206_v25 }
 0x138   : > { %v1183_v26 = vpop.f32.mrf.mxu2 }
 0x139   : > { %v1197_v28 = vpop.f32.mrf.mxu3  ;;  %v1157_v29 = vpop.f32.mrf.mxu0 }
 0x13a   : > { %v1198_v30 = vadd.f32 %v1197_v28, %v1183_v26  ;;  %v1171_v32 = vpop.f32.mrf.mxu1 }
 0x13b   : > { %v1172_v33 = vadd.f32 %v1171_v32, %v1157_v29 }
 0x13c   : > { %v1207_v34 = vadd.f32 %v1198_v30, %v439_v27 }
 0x13d   : > { %v1212_v35 = vadd.f32 %v1172_v33, %v444_v31 }
 0x13e   : > { %1219 = vst [vmem:[#allocation2 + $0x20] sm:$0xff] %v1207_v34 }
 0x13f   : > { %1224 = vst [vmem:[#allocation2 + $0x10] sm:$0xff] %v1212_v35 }
 0x140   : > { %v1185_v36 = vpop.f32.mrf.mxu2 }
 0x141   : > { %v1199_v38 = vpop.f32.mrf.mxu3 }
 0x142   : > { %v1200_v39 = vadd.f32 %v1199_v38, %v1185_v36  ;;  %1229 = sbr.rel (%p2710_p1) target bundleno = 712 (0x2c8), region = 110 }
 0x144   : > { %v1213_v40 = vadd.f32 %v1200_v39, %v445_v37 }
 0x146   : > { %1225 = vst [vmem:[#allocation2 + $0x40] sm:$0xff] %v1213_v40 }
 0x147   : > { %v2769_v41 = vld [vmem:[#allocation6 + $0x70] sm:$0xf]  ;;  %v3277_v42 = vld [vmem:[#allocation6 + $0x74] sm:$0xf0]  ;;  %v2761_v52 = vld [vmem:[#allocation6 + $0x60] sm:$0xf] }
 0x148   : > { %v2833_v43 = vld [vmem:[#allocation6 + $0xf0] sm:$0xf]  ;;  %v2770_v44 = vor.u32 %v3277_v42, %v2769_v41  ;;  %v3293_v45 = vld [vmem:[#allocation6 + $0xf4] sm:$0xf0]  ;;  %v3275_v54 = vld [vmem:[#allocation6 + $0x64] sm:$0xf0] }
 0x149   : > { %v2897_v46 = vld [vmem:[#allocation6 + $0x170] sm:$0xf]  ;;  %v3309_v47 = vld [vmem:[#allocation6 + $0x174] sm:$0xf0]  ;;  %v2834_v48 = vor.u32 %v3293_v45, %v2833_v43  ;;  %v2825_v55 = vld [vmem:[#allocation6 + $0xe0] sm:$0xf]  ;;  %v2762_v57 = vor.u32 %v3275_v54, %v2761_v52 }
 0x14a   : > { %v2898_v49 = vor.u32 %v3309_v47, %v2897_v46  ;;  %v2961_v50 = vld [vmem:[#allocation6 + $0x1f0] sm:$0xf]  ;;  %v3325_v51 = vld [vmem:[#allocation6 + $0x1f4] sm:$0xf0]  ;;  %1830 = vmatpush.bf16.msra.mxu0 %v2770_v44  ;;  %v3291_v56 = vld [vmem:[#allocation6 + $0xe4] sm:$0xf0] }
 0x14b   : > { %v2962_v53 = vor.u32 %v3325_v51, %v2961_v50  ;;  %1844 = vmatpush.bf16.msra.mxu1 %v2834_v48  ;;  %v2826_v58 = vor.u32 %v3291_v56, %v2825_v55  ;;  %v2889_v59 = vld [vmem:[#allocation6 + $0x160] sm:$0xf]  ;;  %v3307_v7 = vld [vmem:[#allocation6 + $0x164] sm:$0xf0]  ;;  %v2753_v62 = vld [vmem:[#allocation6 + $0x50] sm:$0xf] }
 0x14c   : > { %1858 = vmatpush.bf16.msra.mxu2 %v2898_v49  ;;  %v2953_v8 = vld [vmem:[#allocation6 + $0x1e0] sm:$0xf]  ;;  %v2890_v60 = vor.u32 %v3307_v7, %v2889_v59  ;;  %v3323_v61 = vld [vmem:[#allocation6 + $0x1e4] sm:$0xf0]  ;;  %v3273_v63 = vld [vmem:[#allocation6 + $0x54] sm:$0xf0] }
 0x14d   : > { %1872 = vmatpush.bf16.msra.mxu3 %v2962_v53  ;;  %v2954_v0 = vor.u32 %v3323_v61, %v2953_v8  ;;  %v2817_v1 = vld [vmem:[#allocation6 + $0xd0] sm:$0xf]  ;;  %v3289_v2 = vld [vmem:[#allocation6 + $0xd4] sm:$0xf0]  ;;  %v2754_v4 = vor.u32 %v3273_v63, %v2753_v62  ;;  %v2745_v12 = vld [vmem:[#allocation6 + $0x40] sm:$0xf] }
 0x14e   : > { %v2881_v3 = vld [vmem:[#allocation6 + $0x150] sm:$0xf]  ;;  %1831 = vmatpush.bf16.msra.mxu0 %v2762_v57  ;;  %v3305_v5 = vld [vmem:[#allocation6 + $0x154] sm:$0xf0]  ;;  %v2818_v10 = vor.u32 %v3289_v2, %v2817_v1  ;;  %v3271_v13 = vld [vmem:[#allocation6 + $0x44] sm:$0xf0] }
 0x14f   : > { %v2945_v6 = vld [vmem:[#allocation6 + $0x1d0] sm:$0xf]  ;;  %v3321_v9 = vld [vmem:[#allocation6 + $0x1d4] sm:$0xf0]  ;;  %1845 = vmatpush.bf16.msra.mxu1 %v2826_v58  ;;  %v2882_v11 = vor.u32 %v3305_v5, %v2881_v3  ;;  %v2809_v14 = vld [vmem:[#allocation6 + $0xc0] sm:$0xf]  ;;  %v2746_v21 = vor.u32 %v3271_v13, %v2745_v12 }
 0x150   : > { %1859 = vmatpush.bf16.msra.mxu2 %v2890_v60  ;;  %v2946_v15 = vor.u32 %v3321_v9, %v2945_v6  ;;  %v3287_v16 = vld [vmem:[#allocation6 + $0xc4] sm:$0xf0]  ;;  %v2873_v17 = vld [vmem:[#allocation6 + $0x140] sm:$0xf]  ;;  %v2737_v24 = vld [vmem:[#allocation6 + $0x30] sm:$0xf] }
 0x151   : > { %1873 = vmatpush.bf16.msra.mxu3 %v2954_v0  ;;  %v3303_v18 = vld [vmem:[#allocation6 + $0x144] sm:$0xf0]  ;;  %v2937_v19 = vld [vmem:[#allocation6 + $0x1c0] sm:$0xf]  ;;  %v2810_v22 = vor.u32 %v3287_v16, %v2809_v14  ;;  %v3269_v25 = vld [vmem:[#allocation6 + $0x34] sm:$0xf0] }
 0x152   : > { %v3319_v20 = vld [vmem:[#allocation6 + $0x1c4] sm:$0xf0]  ;;  %1832 = vmatpush.bf16.msra.mxu0 %v2754_v4  ;;  %v2874_v23 = vor.u32 %v3303_v18, %v2873_v17  ;;  %v2801_v26 = vld [vmem:[#allocation6 + $0xb0] sm:$0xf]  ;;  %v3285_v28 = vld [vmem:[#allocation6 + $0xb4] sm:$0xf0]  ;;  %v2738_v33 = vor.u32 %v3269_v25, %v2737_v24 }
 0x153   : > { %1846 = vmatpush.bf16.msra.mxu1 %v2818_v10  ;;  %v2938_v27 = vor.u32 %v3319_v20, %v2937_v19  ;;  %v2865_v29 = vld [vmem:[#allocation6 + $0x130] sm:$0xf]  ;;  %v3301_v30 = vld [vmem:[#allocation6 + $0x134] sm:$0xf0]  ;;  %v2802_v34 = vor.u32 %v3285_v28, %v2801_v26  ;;  %v2729_v36 = vld [vmem:[#allocation6 + $0x20] sm:$0xf] }
 0x154   : > { %1860 = vmatpush.bf16.msra.mxu2 %v2882_v11  ;;  %v2929_v31 = vld [vmem:[#allocation6 + $0x1b0] sm:$0xf]  ;;  %v3317_v32 = vld [vmem:[#allocation6 + $0x1b4] sm:$0xf0]  ;;  %v2866_v35 = vor.u32 %v3301_v30, %v2865_v29  ;;  %v3267_v37 = vld [vmem:[#allocation6 + $0x24] sm:$0xf0] }
 0x155   : > { %1874 = vmatpush.bf16.msra.mxu3 %v2946_v15  ;;  %v2793_v38 = vld [vmem:[#allocation6 + $0xa0] sm:$0xf]  ;;  %v2930_v39 = vor.u32 %v3317_v32, %v2929_v31  ;;  %v3283_v40 = vld [vmem:[#allocation6 + $0xa4] sm:$0xf0]  ;;  %v2730_v45 = vor.u32 %v3267_v37, %v2729_v36  ;;  %v2721_v48 = vld [vmem:[#allocation6 + $0x10] sm:$0xf] }
 0x156   : > { %1833 = vmatpush.bf16.msra.mxu0 %v2746_v21  ;;  %v2857_v41 = vld [vmem:[#allocation6 + $0x120] sm:$0xf]  ;;  %v3299_v42 = vld [vmem:[#allocation6 + $0x124] sm:$0xf0]  ;;  %v2794_v46 = vor.u32 %v3283_v40, %v2793_v38  ;;  %v3265_v49 = vld [vmem:[#allocation6 + $0x14] sm:$0xf0] }
 0x157   : > { %1847 = vmatpush.bf16.msra.mxu1 %v2810_v22  ;;  %v2921_v43 = vld [vmem:[#allocation6 + $0x1a0] sm:$0xf]  ;;  %v3315_v44 = vld [vmem:[#allocation6 + $0x1a4] sm:$0xf0]  ;;  %v2858_v47 = vor.u32 %v3299_v42, %v2857_v41  ;;  %v2785_v50 = vld [vmem:[#allocation6 + $0x90] sm:$0xf]  ;;  %v2722_v57 = vor.u32 %v3265_v49, %v2721_v48 }
 0x158   : > { %1861 = vmatpush.bf16.msra.mxu2 %v2874_v23  ;;  %v2922_v51 = vor.u32 %v3315_v44, %v2921_v43  ;;  %v3281_v52 = vld [vmem:[#allocation6 + $0x94] sm:$0xf0]  ;;  %v2849_v53 = vld [vmem:[#allocation6 + $0x110] sm:$0xf]  ;;  %v2713_v58 = vld [vmem:[#allocation6] sm:$0xf] }
 0x159   : > { %1875 = vmatpush.bf16.msra.mxu3 %v2938_v27  ;;  %v3297_v54 = vld [vmem:[#allocation6 + $0x114] sm:$0xf0]  ;;  %v2913_v55 = vld [vmem:[#allocation6 + $0x190] sm:$0xf]  ;;  %v3263_v59 = vld [vmem:[#allocation6 + $0x4] sm:$0xf0]  ;;  %v2786_v7 = vor.u32 %v3281_v52, %v2785_v50 }
 0x15a   : > { %1834 = vmatpush.bf16.msra.mxu0 %v2738_v33  ;;  %v3313_v56 = vld [vmem:[#allocation6 + $0x194] sm:$0xf0]  ;;  %v2850_v8 = vor.u32 %v3297_v54, %v2849_v53  ;;  %v2777_v60 = vld [vmem:[#allocation6 + $0x80] sm:$0xf]  ;;  %v3279_v61 = vld [vmem:[#allocation6 + $0x84] sm:$0xf0]  ;;  %v2714_v6 = vor.u32 %v3263_v59, %v2713_v58 }
 0x15b   : > { %1848 = vmatpush.bf16.msra.mxu1 %v2802_v34  ;;  %v2841_v62 = vld [vmem:[#allocation6 + $0x100] sm:$0xf]  ;;  %v2914_v63 = vor.u32 %v3313_v56, %v2913_v55  ;;  %v3295_v0 = vld [vmem:[#allocation6 + $0x104] sm:$0xf0]  ;;  %v3025_v3 = vld [vmem:[#allocation6 + $0x270] sm:$0xf]  ;;  %v2778_v12 = vor.u32 %v3279_v61, %v2777_v60 }
 0x15c   : > { %1862 = vmatpush.bf16.msra.mxu2 %v2866_v35  ;;  %v2905_v1 = vld [vmem:[#allocation6 + $0x180] sm:$0xf]  ;;  %v3311_v2 = vld [vmem:[#allocation6 + $0x184] sm:$0xf0]  ;;  %v3341_v4 = vld [vmem:[#allocation6 + $0x274] sm:$0xf0]  ;;  %v2842_v13 = vor.u32 %v3295_v0, %v2841_v62 }
 0x15d   : > { %1876 = vmatpush.bf16.msra.mxu3 %v2930_v39  ;;  %v3089_v5 = vld [vmem:[#allocation6 + $0x2f0] sm:$0xf]  ;;  %v3357_v9 = vld [vmem:[#allocation6 + $0x2f4] sm:$0xf0]  ;;  %v3276_v10 = vld [vmem:[#allocation6 + $0x74] sm:$0xf]  ;;  %v2906_v16 = vor.u32 %v3311_v2, %v2905_v1  ;;  %v3026_v17 = vor.u32 %v3341_v4, %v3025_v3 }
 0x15e   : > { %1835 = vmatpush.bf16.msra.mxu0 %v2730_v45  ;;  %v2771_v11 = vld [vmem:[#allocation6 + $0x78] sm:$0xf0]  ;;  %v3292_v14 = vld [vmem:[#allocation6 + $0xf4] sm:$0xf]  ;;  %v3017_v18 = vld [vmem:[#allocation6 + $0x260] sm:$0xf]  ;;  %v3090_v19 = vor.u32 %v3357_v9, %v3089_v5 }
 0x15f   : > { %1849 = vmatpush.bf16.msra.mxu1 %v2794_v46  ;;  %v2835_v15 = vld [vmem:[#allocation6 + $0xf8] sm:$0xf0]  ;;  %v2774_v20 = vor.u32 %v3276_v10, %v2771_v11  ;;  %v3339_v21 = vld [vmem:[#allocation6 + $0x264] sm:$0xf0]  ;;  %v3081_v22 = vld [vmem:[#allocation6 + $0x2e0] sm:$0xf] }
 0x160   : > { %1863 = vmatpush.bf16.msra.mxu2 %v2858_v47  ;;  %v3355_v23 = vld [vmem:[#allocation6 + $0x2e4] sm:$0xf0]  ;;  %v2838_v24 = vor.u32 %v3292_v14, %v2835_v15  ;;  %v3274_v25 = vld [vmem:[#allocation6 + $0x64] sm:$0xf]  ;;  %v2763_v26 = vld [vmem:[#allocation6 + $0x68] sm:$0xf0]  ;;  %v3018_v31 = vor.u32 %v3339_v21, %v3017_v18 }
 0x161   : > { %1877 = vmatpush.bf16.msra.mxu3 %v2922_v51  ;;  %v3290_v27 = vld [vmem:[#allocation6 + $0xe4] sm:$0xf]  ;;  %v2827_v28 = vld [vmem:[#allocation6 + $0xe8] sm:$0xf0]  ;;  %v1230_v29 = vld [vmem:[#allocation2 + $0x30] sm:$0xff]  ;;  %v3082_v36 = vor.u32 %v3355_v23, %v3081_v22  ;;  %v2766_v37 = vor.u32 %v3274_v25, %v2763_v26 }
 0x162   : > { %1836 = vmatpush.bf16.msra.mxu0 %v2722_v57  ;;  %v1236_v30 = vld [vmem:[#allocation2 + $0x8] sm:$0xff]  ;;  %v3009_v32 = vld [vmem:[#allocation6 + $0x250] sm:$0xf]  ;;  %v3337_v33 = vld [vmem:[#allocation6 + $0x254] sm:$0xf0]  ;;  %v2830_v41 = vor.u32 %v3290_v27, %v2827_v28 }
 0x163   : > { %1850 = vmatpush.bf16.msra.mxu1 %v2786_v7  ;;  %v3073_v34 = vld [vmem:[#allocation6 + $0x2d0] sm:$0xf]  ;;  %v4068_v35 = vpack.c.bf16 %v1236_v30, %v1230_v29  ;;  %v3353_v38 = vld [vmem:[#allocation6 + $0x2d4] sm:$0xf0]  ;;  %v3272_v39 = vld [vmem:[#allocation6 + $0x54] sm:$0xf]  ;;  %v3010_v49 = vor.u32 %v3337_v33, %v3009_v32 }
 0x164   : > { %1864 = vmatpush.bf16.msra.mxu2 %v2850_v8  ;;  %v2755_v40 = vld [vmem:[#allocation6 + $0x58] sm:$0xf0]  ;;  %v3288_v42 = vld [vmem:[#allocation6 + $0xd4] sm:$0xf]  ;;  %v1231_v43 = vld [vmem:[#allocation2] sm:$0xff]  ;;  %v3074_v53 = vor.u32 %v3353_v38, %v3073_v34 }
 0x165   : > { %1878 = vmatpush.bf16.msra.mxu3 %v2914_v63  ;;  %v1237_v44 = vld [vmem:[#allocation2 + $0x38] sm:$0xff]  ;;  %v1238_v48 = vld [vmem:[#allocation2 + $0x28] sm:$0xff]  ;;  %v3001_v50 = vld [vmem:[#allocation6 + $0x240] sm:$0xf]  ;;  %v2758_v54 = vor.u32 %v3272_v39, %v2755_v40 }
 0x166   : > { %1837 = vmatpush.bf16.msra.mxu0 %v2714_v6  ;;  %v2819_v45 = vld [vmem:[#allocation6 + $0xd8] sm:$0xf0]  ;;  %v4071_v46 = vpack.c.bf16 %v1237_v44, %v1231_v43  ;;  %v3335_v51 = vld [vmem:[#allocation6 + $0x244] sm:$0xf0]  ;;  %v3065_v55 = vld [vmem:[#allocation6 + $0x2c0] sm:$0xf] }
 0x167   : > { %1851 = vmatpush.bf16.msra.mxu1 %v2778_v12  ;;  %v1232_v47 = vld [vmem:[#allocation2 + $0x58] sm:$0xff]  ;;  %v3351_v56 = vld [vmem:[#allocation6 + $0x2c4] sm:$0xf0]  ;;  %v3270_v57 = vld [vmem:[#allocation6 + $0x44] sm:$0xf]  ;;  %v2822_v58 = vor.u32 %v3288_v42, %v2819_v45  ;;  %v3002_v63 = vor.u32 %v3335_v51, %v3001_v50 }
 0x168   : > { %1865 = vmatpush.bf16.msra.mxu2 %v2842_v13  ;;  %v4073_v52 = vpack.c.bf16 %v1238_v48, %v1232_v47  ;;  %v2747_v59 = vld [vmem:[#allocation6 + $0x48] sm:$0xf0]  ;;  %v1233_v7 = vld [vmem:[#allocation2 + $0x18] sm:$0xff]  ;;  %v3286_v60 = vld [vmem:[#allocation6 + $0xc4] sm:$0xf]  ;;  %v3066_v0 = vor.u32 %v3351_v56, %v3065_v55 }
 0x169   : > { %1879 = vmatpush.bf16.msra.mxu3 %v2906_v16  ;;  %1838 = vmatmul.bf16.vlgmr.msra.gmra.mxu0 %v4068_v35  ;;  %v1239_v8 = vld [vmem:[#allocation2 + $0x48] sm:$0xff]  ;;  %v2750_v1 = vor.u32 %v3270_v57, %v2747_v59  ;;  %v2993_v2 = vld [vmem:[#allocation6 + $0x230] sm:$0xf]  ;;  %v3333_v3 = vld [vmem:[#allocation6 + $0x234] sm:$0xf0] }
 0x16a   : > { %1886 = vmatpush.bf16.msrb.mxu0 %v3026_v17  ;;  %1852 = vmatmul.bf16.vlgmr.msra.gmra.mxu1 %v4071_v46  ;;  %v2811_v61 = vld [vmem:[#allocation6 + $0xc8] sm:$0xf0]  ;;  %v4077_v62 = vpack.c.bf16 %v1239_v8, %v1233_v7  ;;  %v3057_v4 = vld [vmem:[#allocation6 + $0x2b0] sm:$0xf]  ;;  %v3349_v6 = vld [vmem:[#allocation6 + $0x2b4] sm:$0xf0]  ;;  %v2994_v13 = vor.u32 %v3333_v3, %v2993_v2 }
 0x16b   : > { %1900 = vmatpush.bf16.msrb.mxu1 %v3090_v19  ;;  %1866 = vmatmul.bf16.vlgmr.msra.gmra.mxu2 %v4073_v52  ;;  %v2814_v5 = vor.u32 %v3286_v60, %v2811_v61  ;;  %v3268_v9 = vld [vmem:[#allocation6 + $0x34] sm:$0xf]  ;;  %v2739_v10 = vld [vmem:[#allocation6 + $0x38] sm:$0xf0]  ;;  %v3058_v14 = vor.u32 %v3349_v6, %v3057_v4  ;;  %v2985_v16 = vld [vmem:[#allocation6 + $0x220] sm:$0xf] }
 0x16c   : > { %1914 = vmatpush.bf16.msrb.mxu2 %v2774_v20  ;;  %v3284_v11 = vld [vmem:[#allocation6 + $0xb4] sm:$0xf]  ;;  %v2803_v12 = vld [vmem:[#allocation6 + $0xb8] sm:$0xf0]  ;;  %1880 = vmatmul.bf16.vlgmr.msra.gmra.mxu3 %v4077_v62  ;;  %v2742_v15 = vor.u32 %v3268_v9, %v2739_v10  ;;  %v3331_v17 = vld [vmem:[#allocation6 + $0x224] sm:$0xf0] }
 0x16d   : > { %1928 = vmatpush.bf16.msrb.mxu3 %v2838_v24  ;;  %v3049_v18 = vld [vmem:[#allocation6 + $0x2a0] sm:$0xf]  ;;  %v2806_v19 = vor.u32 %v3284_v11, %v2803_v12  ;;  %v3347_v20 = vld [vmem:[#allocation6 + $0x2a4] sm:$0xf0]  ;;  %v3266_v21 = vld [vmem:[#allocation6 + $0x24] sm:$0xf]  ;;  %v2986_v25 = vor.u32 %v3331_v17, %v2985_v16 }
 0x16e   : > { %1887 = vmatpush.bf16.msrb.mxu0 %v3018_v31  ;;  %v2731_v22 = vld [vmem:[#allocation6 + $0x28] sm:$0xf0]  ;;  %v3282_v23 = vld [vmem:[#allocation6 + $0xa4] sm:$0xf]  ;;  %v3050_v26 = vor.u32 %v3347_v20, %v3049_v18  ;;  %v2977_v28 = vld [vmem:[#allocation6 + $0x210] sm:$0xf] }
 0x16f   : > { %1901 = vmatpush.bf16.msrb.mxu1 %v3082_v36  ;;  %v2795_v24 = vld [vmem:[#allocation6 + $0xa8] sm:$0xf0]  ;;  %v2734_v27 = vor.u32 %v3266_v21, %v2731_v22  ;;  %v3329_v29 = vld [vmem:[#allocation6 + $0x214] sm:$0xf0]  ;;  %v3041_v30 = vld [vmem:[#allocation6 + $0x290] sm:$0xf] }
 0x170   : > { %1915 = vmatpush.bf16.msrb.mxu2 %v2766_v37  ;;  %v2798_v31 = vor.u32 %v3282_v23, %v2795_v24  ;;  %v3345_v32 = vld [vmem:[#allocation6 + $0x294] sm:$0xf0]  ;;  %v3264_v33 = vld [vmem:[#allocation6 + $0x14] sm:$0xf]  ;;  %v2723_v34 = vld [vmem:[#allocation6 + $0x18] sm:$0xf0]  ;;  %v2978_v38 = vor.u32 %v3329_v29, %v2977_v28 }
 0x171   : > { %1929 = vmatpush.bf16.msrb.mxu3 %v2830_v41  ;;  %v3280_v36 = vld [vmem:[#allocation6 + $0x94] sm:$0xf]  ;;  %v2787_v37 = vld [vmem:[#allocation6 + $0x98] sm:$0xf0]  ;;  %v2969_v39 = vld [vmem:[#allocation6 + $0x200] sm:$0xf]  ;;  %v3042_v42 = vor.u32 %v3345_v32, %v3041_v30  ;;  %v2726_v43 = vor.u32 %v3264_v33, %v2723_v34 }
 0x172   : > { %1888 = vmatpush.bf16.msrb.mxu0 %v3010_v49  ;;  %v3327_v40 = vld [vmem:[#allocation6 + $0x204] sm:$0xf0]  ;;  %v3033_v41 = vld [vmem:[#allocation6 + $0x280] sm:$0xf]  ;;  %v3262_v45 = vld [vmem:[#allocation6 + $0x4] sm:$0xf]  ;;  %v2790_v48 = vor.u32 %v3280_v36, %v2787_v37 }
 0x173   : > { %1902 = vmatpush.bf16.msrb.mxu1 %v3074_v53  ;;  %v3343_v44 = vld [vmem:[#allocation6 + $0x284] sm:$0xf0]  ;;  %v2715_v47 = vld [vmem:[#allocation6 + $0x8] sm:$0xf0]  ;;  %v3278_v49 = vld [vmem:[#allocation6 + $0x84] sm:$0xf]  ;;  %v2970_v56 = vor.u32 %v3327_v40, %v2969_v39 }
 0x174   : > { %1916 = vmatpush.bf16.msrb.mxu2 %v2758_v54  ;;  %v2779_v50 = vld [vmem:[#allocation6 + $0x88] sm:$0xf0]  ;;  %v3308_v51 = vld [vmem:[#allocation6 + $0x174] sm:$0xf]  ;;  %v2899_v53 = vld [vmem:[#allocation6 + $0x178] sm:$0xf0]  ;;  %v3034_v7 = vor.u32 %v3343_v44, %v3033_v41  ;;  %v2718_v8 = vor.u32 %v3262_v45, %v2715_v47 }
 0x175   : > { %1930 = vmatpush.bf16.msrb.mxu3 %v2822_v58  ;;  %v3324_v54 = vld [vmem:[#allocation6 + $0x1f4] sm:$0xf]  ;;  %v2963_v55 = vld [vmem:[#allocation6 + $0x1f8] sm:$0xf0]  ;;  %v1235_v2 = vld [vmem:[#allocation2 + $0x20] sm:$0xff] }
 0x176   : > { %1889 = vmatpush.bf16.msrb.mxu0 %v3002_v63  ;;  %v3340_v57 = vld [vmem:[#allocation6 + $0x274] sm:$0xf]  ;;  %v3027_v58 = vld [vmem:[#allocation6 + $0x278] sm:$0xf0]  ;;  %v1241_v3 = vld [vmem:[#allocation2 + $0x40] sm:$0xff]  ;;  %v2966_v4 = vor.u32 %v3324_v54, %v2963_v55 }
 0x177   : > { %1903 = vmatpush.bf16.msrb.mxu1 %v3066_v0  ;;  %v3356_v59 = vld [vmem:[#allocation6 + $0x2f4] sm:$0xf]  ;;  %v3091_v60 = vld [vmem:[#allocation6 + $0x2f8] sm:$0xf0]  ;;  %v2782_v0 = vor.u32 %v3278_v49, %v2779_v50  ;;  %v3306_v6 = vld [vmem:[#allocation6 + $0x164] sm:$0xf]  ;;  %v4082_v16 = vpack.c.bf16 %v1241_v3, %v1235_v2 }
 0x178   : > { %1917 = vmatpush.bf16.msrb.mxu2 %v2750_v1  ;;  %v1234_v61 = vld [vmem:[#allocation2 + $0x50] sm:$0xff]  ;;  %v2902_v1 = vor.u32 %v3308_v51, %v2899_v53  ;;  %v2891_v9 = vld [vmem:[#allocation6 + $0x168] sm:$0xf0]  ;;  %v3322_v10 = vld [vmem:[#allocation6 + $0x1e4] sm:$0xf]  ;;  %v3094_v11 = vor.u32 %v3356_v59, %v3091_v60 }
 0x179   : > { %1931 = vmatpush.bf16.msrb.mxu3 %v2814_v5  ;;  %v1240_v63 = vld [vmem:[#allocation2 + $0x10] sm:$0xff]  ;;  %v3030_v5 = vor.u32 %v3340_v57, %v3027_v58  ;;  %v3354_v17 = vld [vmem:[#allocation6 + $0x2e4] sm:$0xf]  ;;  %v3083_v18 = vld [vmem:[#allocation6 + $0x2e8] sm:$0xf0] }
 0x17a   : > { %1890 = vmatpush.bf16.msrb.mxu0 %v2994_v13  ;;  %v4080_v12 = vpack.c.bf16 %v1240_v63, %v1234_v61  ;;  %v2955_v13 = vld [vmem:[#allocation6 + $0x1e8] sm:$0xf0]  ;;  %v3304_v22 = vld [vmem:[#allocation6 + $0x154] sm:$0xf]  ;;  %v2883_v23 = vld [vmem:[#allocation6 + $0x158] sm:$0xf0] }
 0x17b   : > { %1904 = vmatpush.bf16.msrb.mxu1 %v3058_v14  ;;  %v3338_v14 = vld [vmem:[#allocation6 + $0x264] sm:$0xf]  ;;  %v2958_v20 = vor.u32 %v3322_v10, %v2955_v13  ;;  %v3320_v24 = vld [vmem:[#allocation6 + $0x1d4] sm:$0xf]  ;;  %v3011_v28 = vld [vmem:[#allocation6 + $0x258] sm:$0xf0] }
 0x17c   : > { %1918 = vmatpush.bf16.msrb.mxu2 %v2742_v15  ;;  %v3019_v15 = vld [vmem:[#allocation6 + $0x268] sm:$0xf0]  ;;  %v3352_v29 = vld [vmem:[#allocation6 + $0x2d4] sm:$0xf]  ;;  %v3075_v30 = vld [vmem:[#allocation6 + $0x2d8] sm:$0xf0] }
 0x17d   : > { %1932 = vmatpush.bf16.msrb.mxu3 %v2806_v19  ;;  %v2894_v19 = vor.u32 %v3306_v6, %v2891_v9  ;;  %v3022_v21 = vor.u32 %v3338_v14, %v3019_v15  ;;  %v3302_v32 = vld [vmem:[#allocation6 + $0x144] sm:$0xf]  ;;  %v2875_v36 = vld [vmem:[#allocation6 + $0x148] sm:$0xf0]  ;;  %v3300_v45 = vld [vmem:[#allocation6 + $0x134] sm:$0xf] }
 0x17e   : > { %1891 = vmatpush.bf16.msrb.mxu0 %v2986_v25  ;;  %v3086_v25 = vor.u32 %v3354_v17, %v3083_v18  ;;  %v3318_v37 = vld [vmem:[#allocation6 + $0x1c4] sm:$0xf]  ;;  %v2939_v39 = vld [vmem:[#allocation6 + $0x1c8] sm:$0xf0]  ;;  %v2867_v47 = vld [vmem:[#allocation6 + $0x138] sm:$0xf0] }
 0x17f   : > { %1905 = vmatpush.bf16.msrb.mxu1 %v3050_v26  ;;  %v2947_v26 = vld [vmem:[#allocation6 + $0x1d8] sm:$0xf0]  ;;  %v3334_v40 = vld [vmem:[#allocation6 + $0x244] sm:$0xf]  ;;  %v3003_v41 = vld [vmem:[#allocation6 + $0x248] sm:$0xf0]  ;;  %v2942_v44 = vor.u32 %v3318_v37, %v2939_v39 }
 0x180   : > { %1919 = vmatpush.bf16.msrb.mxu2 %v2734_v27  ;;  %v3336_v27 = vld [vmem:[#allocation6 + $0x254] sm:$0xf]  ;;  %v2950_v33 = vor.u32 %v3320_v24, %v2947_v26  ;;  %v2931_v50 = vld [vmem:[#allocation6 + $0x1b8] sm:$0xf0]  ;;  %v3298_v59 = vld [vmem:[#allocation6 + $0x124] sm:$0xf] }
 0x181   : > { %1933 = vmatpush.bf16.msrb.mxu3 %v2798_v31  ;;  %v2886_v31 = vor.u32 %v3304_v22, %v2883_v23  ;;  %v3014_v34 = vor.u32 %v3336_v27, %v3011_v28  ;;  %v3332_v51 = vld [vmem:[#allocation6 + $0x234] sm:$0xf]  ;;  %v2995_v53 = vld [vmem:[#allocation6 + $0x238] sm:$0xf0]  ;;  %v2923_v61 = vld [vmem:[#allocation6 + $0x1a8] sm:$0xf0] }
 0x182   : > { %1892 = vmatpush.bf16.msrb.mxu0 %v2978_v38  ;;  %v3078_v38 = vor.u32 %v3352_v29, %v3075_v30  ;;  %v3348_v54 = vld [vmem:[#allocation6 + $0x2b4] sm:$0xf]  ;;  %v3059_v55 = vld [vmem:[#allocation6 + $0x2b8] sm:$0xf0]  ;;  %v2998_v58 = vor.u32 %v3332_v51, %v2995_v53  ;;  %v3330_v63 = vld [vmem:[#allocation6 + $0x224] sm:$0xf] }
 0x183   : > { %1906 = vmatpush.bf16.msrb.mxu1 %v3042_v42  ;;  %v3350_v42 = vld [vmem:[#allocation6 + $0x2c4] sm:$0xf]  ;;  %v3062_v60 = vor.u32 %v3348_v54, %v3059_v55  ;;  %v3051_v2 = vld [vmem:[#allocation6 + $0x2a8] sm:$0xf0]  ;;  %v3296_v6 = vld [vmem:[#allocation6 + $0x114] sm:$0xf] }
 0x184   : > { %1920 = vmatpush.bf16.msrb.mxu2 %v2726_v43  ;;  %v2878_v43 = vor.u32 %v3302_v32, %v2875_v36  ;;  %v2851_v9 = vld [vmem:[#allocation6 + $0x118] sm:$0xf0]  ;;  %v3312_v10 = vld [vmem:[#allocation6 + $0x194] sm:$0xf]  ;;  %v3294_v22 = vld [vmem:[#allocation6 + $0x104] sm:$0xf] }
 0x185   : > { %1934 = vmatpush.bf16.msrb.mxu3 %v2790_v48  ;;  %v3316_v48 = vld [vmem:[#allocation6 + $0x1b4] sm:$0xf]  ;;  %v2915_v13 = vld [vmem:[#allocation6 + $0x198] sm:$0xf0]  ;;  %v2843_v23 = vld [vmem:[#allocation6 + $0x108] sm:$0xf0] }
 0x186   : > { %1893 = vmatpush.bf16.msrb.mxu0 %v2970_v56  ;;  %v2870_v56 = vor.u32 %v3300_v45, %v2867_v47  ;;  %v2934_v57 = vor.u32 %v3316_v48, %v2931_v50  ;;  %v3328_v14 = vld [vmem:[#allocation6 + $0x214] sm:$0xf]  ;;  %v2979_v15 = vld [vmem:[#allocation6 + $0x218] sm:$0xf0]  ;;  %v3310_v24 = vld [vmem:[#allocation6 + $0x184] sm:$0xf] }
 0x187   : > { %1907 = vmatpush.bf16.msrb.mxu1 %v3034_v7  ;;  %v2859_v7 = vld [vmem:[#allocation6 + $0x128] sm:$0xf0]  ;;  %v3344_v17 = vld [vmem:[#allocation6 + $0x294] sm:$0xf]  ;;  %v3043_v18 = vld [vmem:[#allocation6 + $0x298] sm:$0xf0] }
 0x188   : > { %1921 = vmatpush.bf16.msrb.mxu2 %v2718_v8  ;;  %v3314_v8 = vld [vmem:[#allocation6 + $0x1a4] sm:$0xf]  ;;  %v2862_v3 = vor.u32 %v3298_v59, %v2859_v7  ;;  %v2907_v26 = vld [vmem:[#allocation6 + $0x188] sm:$0xf0]  ;;  %v3365_v36 = vld [vmem:[#allocation9 + $0x38] sm:$0xff] }
 0x189   : > { %1935 = vmatpush.bf16.msrb.mxu3 %v2782_v0  ;;  %1894 = vmatmul.bf16.vlgmr.msrb.gmra.mxu0 %v4080_v12  ;;  %v2987_v0 = vld [vmem:[#allocation6 + $0x228] sm:$0xf0]  ;;  %v3326_v27 = vld [vmem:[#allocation6 + $0x204] sm:$0xf]  ;;  %v2910_v32 = vor.u32 %v3310_v24, %v2907_v26  ;;  %v3364_v37 = vld [vmem:[#allocation9 + $0x30] sm:$0xff] }
 0x18a   : > { %1942 = vmatpush.bf16.msra.mxu0 %v2902_v1  ;;  %1908 = vmatmul.bf16.vlgmr.msrb.gmra.mxu1 %v4082_v16  ;;  %v3346_v1 = vld [vmem:[#allocation6 + $0x2a4] sm:$0xf]  ;;  %v2971_v28 = vld [vmem:[#allocation6 + $0x208] sm:$0xf0]  ;;  %v3372_v45 = vld [vmem:[#allocation9 + $0x70] sm:$0xff] }
 0x18b   : > { %1956 = vmatpush.bf16.msra.mxu1 %v2966_v4  ;;  %1922 = vmatmul.bf16.vlgmr.msrb.gmra.mxu2 %v4068_v35  ;;  %v3067_v35 = vld [vmem:[#allocation6 + $0x2c8] sm:$0xf0]  ;;  %v2926_v4 = vor.u32 %v3314_v8, %v2923_v61  ;;  %v3342_v29 = vld [vmem:[#allocation6 + $0x284] sm:$0xf] }
 0x18c   : > { %1970 = vmatpush.bf16.msra.mxu2 %v3030_v5  ;;  %1936 = vmatmul.bf16.vlgmr.msrb.gmra.mxu3 %v4071_v46  ;;  %v3006_v46 = vor.u32 %v3334_v40, %v3003_v41  ;;  %v3070_v49 = vor.u32 %v3350_v42, %v3067_v35  ;;  %v2990_v5 = vor.u32 %v3330_v63, %v2987_v0  ;;  %v3035_v30 = vld [vmem:[#allocation6 + $0x288] sm:$0xf0]  ;;  %v3362_v39 = vld [vmem:[#allocation9 + $0x20] sm:$0xff]  ;;  %v3361_v40 = vld [vmem:[#allocation9 + $0x18] sm:$0xff] }
 0x18d   : > { %1984 = vmatpush.bf16.msra.mxu3 %v3094_v11  ;;  %v3054_v11 = vor.u32 %v3346_v1, %v3051_v2  ;;  %v3360_v41 = vld [vmem:[#allocation9 + $0x10] sm:$0xff]  ;;  %v3359_v42 = vld [vmem:[#allocation9 + $0x8] sm:$0xff]  ;;  %v3370_v59 = vld [vmem:[#allocation9 + $0x60] sm:$0xff] }
 0x18e   : > { %1943 = vmatpush.bf16.msra.mxu0 %v2894_v19  ;;  %v2854_v19 = vor.u32 %v3296_v6, %v2851_v9  ;;  %v3371_v55 = vld [vmem:[#allocation9 + $0x68] sm:$0xff]  ;;  %v3369_v0 = vld [vmem:[#allocation9 + $0x58] sm:$0xff] }
 0x18f   : > { %1957 = vmatpush.bf16.msra.mxu1 %v2958_v20  ;;  %v2918_v20 = vor.u32 %v3312_v10, %v2915_v13 }
 0x190   : > { %1971 = vmatpush.bf16.msra.mxu2 %v3022_v21  ;;  %v2982_v21 = vor.u32 %v3328_v14, %v2979_v15  ;;  %v3366_v14 = vld [vmem:[#allocation9 + $0x40] sm:$0xff] }
 0x191   : > { %1985 = vmatpush.bf16.msra.mxu3 %v3086_v25  ;;  %v3046_v25 = vor.u32 %v3344_v17, %v3043_v18 }
 0x192   : > { %1944 = vmatpush.bf16.msra.mxu0 %v2886_v31  ;;  %v2846_v31 = vor.u32 %v3294_v22, %v2843_v23 }
 0x193   : > { %1958 = vmatpush.bf16.msra.mxu1 %v2950_v33  ;;  %v2974_v33 = vor.u32 %v3326_v27, %v2971_v28 }
 0x194   : > { %1972 = vmatpush.bf16.msra.mxu2 %v3014_v34  ;;  %v3038_v34 = vor.u32 %v3342_v29, %v3035_v30 }
 0x195   : > { %1986 = vmatpush.bf16.msra.mxu3 %v3078_v38  ;;  %v3363_v38 = vld [vmem:[#allocation9 + $0x28] sm:$0xff] }
 0x196   : > { %1945 = vmatpush.bf16.msra.mxu0 %v2878_v43 }
 0x197   : > { %1959 = vmatpush.bf16.msra.mxu1 %v2942_v44 }
 0x198   : > { %1973 = vmatpush.bf16.msra.mxu2 %v3006_v46 }
 0x199   : > { %1987 = vmatpush.bf16.msra.mxu3 %v3070_v49 }
 0x19a   : > { %1946 = vmatpush.bf16.msra.mxu0 %v2870_v56 }
 0x19b   : > { %1960 = vmatpush.bf16.msra.mxu1 %v2934_v57 }
 0x19c   : > { %1974 = vmatpush.bf16.msra.mxu2 %v2998_v58 }
 0x19d   : > { %1988 = vmatpush.bf16.msra.mxu3 %v3062_v60 }
 0x19e   : > { %1947 = vmatpush.bf16.msra.mxu0 %v2862_v3 }
 0x19f   : > { %1961 = vmatpush.bf16.msra.mxu1 %v2926_v4 }
 0x1a0   : > { %1975 = vmatpush.bf16.msra.mxu2 %v2990_v5  ;;  %v3368_v5 = vld [vmem:[#allocation9 + $0x50] sm:$0xff] }
 0x1a1   : > { %1989 = vmatpush.bf16.msra.mxu3 %v3054_v11  ;;  %v3367_v11 = vld [vmem:[#allocation9 + $0x48] sm:$0xff] }
 0x1a2   : > { %1948 = vmatpush.bf16.msra.mxu0 %v2854_v19 }
 0x1a3   : > { %1962 = vmatpush.bf16.msra.mxu1 %v2918_v20 }
 0x1a4   : > { %1976 = vmatpush.bf16.msra.mxu2 %v2982_v21 }
 0x1a5   : > { %1990 = vmatpush.bf16.msra.mxu3 %v3046_v25 }
 0x1a6   : > { %1949 = vmatpush.bf16.msra.mxu0 %v2846_v31 }
 0x1a7   : > { %1963 = vmatpush.bf16.msra.mxu1 %v2910_v32 }
 0x1a8   : > { %1977 = vmatpush.bf16.msra.mxu2 %v2974_v33 }
 0x1a9   : > { %1991 = vmatpush.bf16.msra.mxu3 %v3038_v34  ;;  %1950 = vmatmul.bf16.vlgmr.msra.gmra.mxu0 %v4073_v52  ;;  %v1344_v52 = vld [vmem:[#allocation8] sm:$0x3] }
 0x1aa   : > { %1964 = vmatmul.bf16.vlgmr.msra.gmra.mxu1 %v4077_v62  ;;  %2136 = vmatpush.bf16.msrb.mxu0 %v3365_v36  ;;  %v1346_v43 = vperm.slane %v1344_v52, 0  ;;  %v1347_v18 = vperm.slane %v1344_v52, 1 }
 0x1ab   : > { %1978 = vmatmul.bf16.vlgmr.msra.gmra.mxu2 %v4080_v12  ;;  %v3358_v12 = vld [vmem:[#allocation9] sm:$0xff] }
 0x1ac   : > { %1992 = vmatmul.bf16.vlgmr.msra.gmra.mxu3 %v4082_v16  ;;  %v3373_v16 = vld [vmem:[#allocation9 + $0x78] sm:$0xff] }
 0x1ad   : > { %2150 = vmatpush.bf16.msrb.mxu1 %v3373_v16 }
 0x1ae   : > { %2137 = vmatpush.bf16.msrb.mxu0 %v3364_v37 }
 0x1b1   : > { %2151 = vmatpush.bf16.msrb.mxu1 %v3372_v45 }
 0x1b2   : > { %2138 = vmatpush.bf16.msrb.mxu0 %v3363_v38 }
 0x1b5   : > { %2152 = vmatpush.bf16.msrb.mxu1 %v3371_v55 }
 0x1b6   : > { %2139 = vmatpush.bf16.msrb.mxu0 %v3362_v39 }
 0x1b9   : > { %2153 = vmatpush.bf16.msrb.mxu1 %v3370_v59 }
 0x1ba   : > { %2140 = vmatpush.bf16.msrb.mxu0 %v3361_v40 }
 0x1bd   : > { %2154 = vmatpush.bf16.msrb.mxu1 %v3369_v0 }
 0x1be   : > { %2141 = vmatpush.bf16.msrb.mxu0 %v3360_v41 }
 0x1c1   : > { %2155 = vmatpush.bf16.msrb.mxu1 %v3368_v5 }
 0x1c2   : > { %2142 = vmatpush.bf16.msrb.mxu0 %v3359_v42 }
 0x1c5   : > { %2156 = vmatpush.bf16.msrb.mxu1 %v3367_v11 }
 0x1c6   : > { %2143 = vmatpush.bf16.msrb.mxu0 %v3358_v12  ;;  %v3475_v12 = vld [vmem:[#allocation11] ss:$0 sm:$0xff] }
 0x1c9   : > { %2157 = vmatpush.bf16.msrb.mxu1 %v3366_v14 }
 0x1e6   : > { %v1839_v35 = vpop.f32.mrf.mxu0 }
 0x1e7   : > { %v1853_v62 = vpop.f32.mrf.mxu1  ;;  %v1840_v44 = vadd.f32 %v1839_v35, %v1346_v43 }
 0x1e9   : > { %v1854_v48 = vadd.f32 %v1853_v62, %v1840_v44 }
 0x1ee   : > { %v1867_v46 = vpop.f32.mrf.mxu2  ;;  %v1841_v47 = vpop.f32.mrf.mxu0 }
 0x1ef   : > { %v1855_v49 = vpop.f32.mrf.mxu1  ;;  %v1881_v50 = vpop.f32.mrf.mxu3  ;;  %v1842_v51 = vadd.f32 %v1841_v47, %v1346_v43  ;;  %v1868_v53 = vadd.f32 %v1867_v46, %v1854_v48 }
 0x1f1   : > { %v1856_v54 = vadd.f32 %v1855_v49, %v1842_v51  ;;  %v1882_v57 = vadd.f32 %v1881_v50, %v1868_v53 }
 0x1f6   : > { %v1869_v56 = vpop.f32.mrf.mxu2 }
 0x1f7   : > { %v1870_v8 = vadd.f32 %v1869_v56, %v1856_v54  ;;  %v1883_v60 = vpop.f32.mrf.mxu3 }
 0x1f9   : > { %v1884_v63 = vadd.f32 %v1883_v60, %v1870_v8 }
 0x206   : > { %v1895_v58 = vpop.f32.mrf.mxu0 }
 0x207   : > { %v1909_v7 = vpop.f32.mrf.mxu1  ;;  %v1896_v61 = vadd.f32 %v1895_v58, %v1882_v57 }
 0x209   : > { %v1910_v1 = vadd.f32 %v1909_v7, %v1896_v61 }
 0x20b   : > { %v1998_v6 = vmax.f32 %v1910_v1, 0.0 }
 0x20e   : > { %v1897_v2 = vpop.f32.mrf.mxu0  ;;  %v1923_v15 = vpop.f32.mrf.mxu2 }
 0x20f   : > { %v1898_v3 = vadd.f32 %v1897_v2, %v1884_v63  ;;  %v1911_v4 = vpop.f32.mrf.mxu1  ;;  %v1937_v17 = vpop.f32.mrf.mxu3  ;;  %v1924_v20 = vadd.f32 %v1923_v15, %v1347_v18 }
 0x211   : > { %v1912_v9 = vadd.f32 %v1911_v4, %v1898_v3  ;;  %v1938_v24 = vadd.f32 %v1937_v17, %v1924_v20 }
 0x213   : > { %v2000_v10 = vmax.f32 %v1912_v9, 0.0 }
 0x215   : > { %v2002_v13 = vpack.c.bf16 %v2000_v10, %v1998_v6 }
 0x216   : > { %v1925_v19 = vpop.f32.mrf.mxu2 }
 0x217   : > { %2144 = vmatmul.bf16.vlgmr.msrb.gmra.mxu0 %v2002_v13  ;;  %v1939_v21 = vpop.f32.mrf.mxu3  ;;  %v1926_v25 = vadd.f32 %v1925_v19, %v1347_v18 }
 0x219   : > { %v1940_v28 = vadd.f32 %v1939_v21, %v1926_v25 }
 0x226   : > { %v1951_v22 = vpop.f32.mrf.mxu0 }
 0x227   : > { %v1965_v23 = vpop.f32.mrf.mxu1  ;;  %v1952_v26 = vadd.f32 %v1951_v22, %v1938_v24 }
 0x229   : > { %v1966_v31 = vadd.f32 %v1965_v23, %v1952_v26 }
 0x22e   : > { %v1979_v27 = vpop.f32.mrf.mxu2  ;;  %v1953_v30 = vpop.f32.mrf.mxu0 }
 0x22f   : > { %v1993_v29 = vpop.f32.mrf.mxu3  ;;  %v1954_v32 = vadd.f32 %v1953_v30, %v1940_v28  ;;  %v1980_v33 = vadd.f32 %v1979_v27, %v1966_v31  ;;  %v1967_v34 = vpop.f32.mrf.mxu1 }
 0x231   : > { %v1968_v36 = vadd.f32 %v1967_v34, %v1954_v32  ;;  %v1994_v38 = vadd.f32 %v1993_v29, %v1980_v33 }
 0x233   : > { %v1999_v42 = vmax.f32 %v1994_v38, 0.0 }
 0x236   : > { %v1981_v37 = vpop.f32.mrf.mxu2 }
 0x237   : > { %v1982_v39 = vadd.f32 %v1981_v37, %v1968_v36  ;;  %v1995_v40 = vpop.f32.mrf.mxu3 }
 0x239   : > { %v1996_v41 = vadd.f32 %v1995_v40, %v1982_v39 }
 0x23b   : > { %v2001_v52 = vmax.f32 %v1996_v41, 0.0 }
 0x23d   : > { %v2003_v35 = vpack.c.bf16 %v2001_v52, %v1999_v42 }
 0x23f   : > { %2158 = vmatmul.bf16.vlgmr.msrb.gmra.mxu1 %v2003_v35 }
 0x294   : > { %v2145_v62 = vpop.f32.mrf.mxu0 }
 0x295   : > { %v2146_v43 = vadd.f32 %v3475_v12, %v2145_v62 }
 0x29c   : > { %v2147_v46 = vpop.f32.mrf.mxu0 }
 0x29d   : > { %v2148_v45 = vadd.f32 %v3475_v12, %v2147_v46 }
 0x2bc   : > { %v2159_v16 = vpop.f32.mrf.mxu1 }
 0x2bd   : > { %v2160_v44 = vadd.f32 %v2159_v16, %v2146_v43 }
 0x2bf   : > { %2164 = vst [vmem:[%s4137_s8] sm:$0xff] %v2160_v44 }
 0x2c4   : > { %v2161_v47 = vpop.f32.mrf.mxu1 }
 0x2c5   : > { %v2162_v48 = vadd.f32 %v2161_v47, %v2148_v45 }
 0x2c7   : > { %2165 = vst [vmem:[%s4137_s8 + $0x8] sm:$0xff] %v2162_v48 }
 0x2c8 PF: > { %s21_s26 = sadd.s32 1, %s3682_s26   ;;  %s4138_s6 = sld [smem:[#allocation16_spill]] }
 0x2c9   : > { %p18_p2 = scmp.ge.s32.totalorder %s21_s26, 5   ;;  %s4139_s17 = sld [smem:[#allocation15_spill]] }
 0x2ca   : > { %s4140_s21 = smov %s3666_s22  ;;  %s4141_s22 = smov %s3670_s23 }
 0x2cb   : > { %s4143_s24 = smov %s3678_s25  ;;  %20 = sbr.rel (!%p18_p2) target bundleno = 10 (0xa), region = 154 }
 0x2ce   : > { %s4142_s23 = smov %s4138_s6 }
 0x2cf   : > { %s4144_s25 = smov %s4139_s17 }
 0x2d0   :  { %2188 = vsyncpa [#allocation5], 1 }
 0x2d1   :  { %2190 = vsyncpa [#allocation5 + $0x1], 1 }
 0x2d2   :  { %2191 = vsyncpa [#allocation7], 1 }
 0x2d3   :  { %2192 = vsyncpa [#allocation10], 1 }

// kernel: squeeze.18
= control target key start
LH: loop header
LB: loop body
LE: loop exit
PB: predicated region body
PF: predicated region fallthrough
CT: control target
= control target key end

     0   :  { %s144_s0 = inlined_call_operand.vmem [shape: f32[2,256], index: 0, kind: input, shape index: {}]   ;;  %s145_s1 = inlined_call_operand.hbm [shape: f32[2,16,16], index: 1, kind: output, shape index: {}]  }
   0x1   :  { %v73_v0 = vld [vmem:[%s144_s0 + $0x2] sm:$0x3]  ;;  %v9_v1 = vld [vmem:[%s144_s0] sm:$0x3] }
   0x2   :  { %8 = vst [vmem:[#allocation2 + $0x8] sm:$0x3] %v73_v0 }
   0x3   :  { %10 = vst [vmem:[#allocation2] sm:$0x3] %v9_v1 }
   0x4   :  { %2 = vsyncpa [#allocation1], 0  ;;  %s108_s0 = smov 112   ;;  %s109_s10 = smov 80   ;;  %vm12_vm0 = vcmask 130048  }
   0x5   :  { %s110_s11 = smov 48   ;;  %s111_s12 = smov 96  }
   0x6   :  { %s112_s13 = smov 64   ;;  %s113_s14 = smov 32  }
   0x7   :  { %s114_s15 = smov 16   ;;  %s115_s16 = smov [#allocation0]  }
   0x8   :  { %s64_s17 = sshll.u32 %s115_s16, 4  ;;  %s66_s1 = sshll.u32 %s145_s1, 4  ;;  %s65_s17 = int_to_ptr.vmem [resolvable:$true] %s64_s17  ;;  %s67_s1 = int_to_ptr.hbm [resolvable:$true] %s66_s1 }
   0x9   :  { %v15_v5 = vld [vmem:[#allocation2 + $0x8] sm:$0x3]  }
   0xa   :  { %v19_v2 = vld.sshfl [vmem:[#allocation2] sm:$0xff pattern:$0x99999180]   ;;  %18 = vst.msk [vmem:[#allocation0 + $0x8] ss:$16 sm:$0x3] %vm12_vm0, %v15_v5  }
   0xb   :  { %20 = vrot.lane.b32.xlu0 %v19_v2, %s108_s0  ;;  %32 = vrot.lane.b32.xlu1 %v19_v2, %s109_s10  ;;  %v11_v4 = vld [vmem:[#allocation2] sm:$0x3]  }
   0xc   :  { %44 = vrot.lane.b32.xlu2 %v19_v2, %s110_s11  ;;  %13 = vst.msk [vmem:[#allocation0] ss:$16 sm:$0x3] %vm12_vm0, %v11_v4  }
  0x13   :  { %26 = vrot.lane.b32.xlu0 %v19_v2, %s111_s12  ;;  %38 = vrot.lane.b32.xlu1 %v19_v2, %s112_s13 }
  0x14   :  { %50 = vrot.lane.b32.xlu2 %v19_v2, %s113_s14 }
  0x1b   :  { %56 = vrot.lane.b32.xlu0 %v19_v2, %s114_s15 }
  0x66   :  { %v45_v3 = vpop.permute.xlu2 %44  }
  0x67   :  { %48 = vst.msk [vmem:[#allocation0 + $0x5] ss:$8 sm:$0xf] %vm12_vm0, %v45_v3  }
  0x6e   :  { %v51_v6 = vpop.permute.xlu2 %50  }
  0x6f   :  { %54 = vst.msk [vmem:[#allocation0 + $0x6] ss:$8 sm:$0xf] %vm12_vm0, %v51_v6  }
  0x7d   :  { %v21_v7 = vpop.permute.xlu0 %20   ;;  %v33_v8 = vpop.permute.xlu1 %32  }
  0x7e   :  { %24 = vst.msk [vmem:[#allocation0 + $0x1] ss:$8 sm:$0xf] %vm12_vm0, %v21_v7  }
  0x7f   :  { %36 = vst.msk [vmem:[#allocation0 + $0x3] ss:$8 sm:$0xf] %vm12_vm0, %v33_v8  }
  0x85   :  { %v27_v9 = vpop.permute.xlu0 %26   ;;  %v39_v10 = vpop.permute.xlu1 %38  }
  0x86   :  { %30 = vst.msk [vmem:[#allocation0 + $0x2] ss:$8 sm:$0xf] %vm12_vm0, %v27_v9  }
  0x87   :  { %42 = vst.msk [vmem:[#allocation0 + $0x4] ss:$8 sm:$0xf] %vm12_vm0, %v39_v10  }
  0x8d   :  { %v57_v11 = vpop.permute.xlu0 %56  }
  0x8e   :  { %60 = vst.msk [vmem:[#allocation0 + $0x7] ss:$8 sm:$0xf] %vm12_vm0, %v57_v11  }
  0x8f   :  { %69 = dma.vmem_to_hbm [thread:$0]  %s65_s17, 512, %s67_s1, [#allocation1]  }
  0x90   :  { %106 = dma.done.wait [#allocation1], 512  }
  0x91   :  { %107 = vsyncadd [#allocation1], 4294966784 }
  0x92   :  { %72 = vsyncpa [#allocation1], 1 }

// kernel: joint_training_forward.7
= control target key start
LH: loop header
LB: loop body
LE: loop exit
PB: predicated region body
PF: predicated region fallthrough
CT: control target
= control target key end

     0   :  { %s666_s18 = smov [#allocation3]   ;;  %s752_s0 = inlined_call_operand.vmem [shape: s32[2,2], index: 0, kind: input, shape index: {}]   ;;  %s753_s1 = inlined_call_operand.vmem [shape: f32[2,8,3,256], index: 1, kind: input, shape index: {}]   ;;  %s754_s2 = inlined_call_operand.vmem [shape: s32[2,8,1,256], index: 2, kind: input, shape index: {}]   ;;  %s755_s3 = inlined_call_operand.vmem [shape: f32[2,2,3,256], index: 3, kind: output, shape index: {0}]   ;;  %s756_s4 = inlined_call_operand.vmem [shape: s32[2,2,1,256], index: 4, kind: output, shape index: {1}]  }
   0x1   :  { %s11_s17 = sshll.u32 %s752_s0, 4  ;;  %s12_s17 = int_to_ptr.vmem [resolvable:$true] %s11_s17 }
   0x2   :  { %14 = dma.vmem_to_smem %s12_s17, 32, %s666_s18, [#allocation2] }
   0x3   :  { %644 = dma.done.wait [#allocation2], 32 }
   0x4   :  { %645 = vsyncadd [#allocation2], 4294967264 }
   0x5   :  { %17 = sfence }
   0x6   :  { %s695_s19 = smov 0   ;;  %s697_s20 = smov 0  }
   0x7   :  { %s699_s21 = smov 0   ;;  %s701_s22 = smov 0  }
   0x8   :  { %s703_s23 = smov 0  }
   0x9 LB: > { %s32_s0 = sadd.s32 1, %s656_s21  ;;  %s35_s24 = sadd.s32 1, %s660_s22  ;;  %s664_s23 = sphi %s703_s23, %s23_s23   ;;  %s660_s22 = sphi %s701_s22, %s760_s22   ;;  %s656_s21 = sphi %s699_s21, %s759_s21   ;;  %s652_s20 = sphi %s697_s20, %s758_s20   ;;  %s648_s19 = sphi %s695_s19, %s757_s19  }
   0xa   : > { %p33_p0 = scmp.ge.s32.totalorder %s32_s0, 2  ;;  %p556_p1 = scmp.ge.s32.totalorder %s664_s23, 1 }
   0xb   : > { %p250_p2 = scmp.lt.s32.totalorder %s664_s23, 5 }
   0xc   : > { %s762_s0 = smov (%p33_p0, %s32_s0), 0  ;;  %s764_s24 = smov (!%p33_p0, %s35_s24), %s660_s22 }
   0xd   : > { %p251_p3 = pnand %p556_p1, %p250_p2  ;;  %p37_p4 = scmp.ge.s32.totalorder %s764_s24, 2 }
   0xe   : > { %s314_s25 = sshra.s32 (!%p251_p3), %s648_s19, 7  ;;  %s319_s26 = sand.u32 (!%p251_p3), 127, %s648_s19 }
   0xf   : > { %s766_s24 = smov (%p37_p4, %s764_s24), 0  ;;  %254 = sbr.rel (%p251_p3) target bundleno = 36 (0x24), region = 28 }
  0x10   : > { %s316_s27 = sadd.s32 (!%p251_p3), %s652_s20, %s314_s25  ;;  %p322_p5 = scmp.lt.s32.totalorder (!%p251_p3), %s652_s20, 1 }
  0x11   : > { %s557_s28 = sshll.u32 (!%p251_p3), %s316_s27, 7  ;;  %p365_p6 = scmp.lt.s32.totalorder (!%p251_p3), %s648_s19, 1 }
  0x12   : > { %s320_s29 = sadd.s32 (!%p251_p3), %s557_s28, %s319_s26 }
  0x13   : > { %s321_s30 = sld [smem:[#allocation3 + %s320_s29]] (!%p251_p3) }
  0x14   : > { %s768_s20 = smov (!%p322_p5, %s652_s20), 1  ;;  %s770_s19 = smov (!%p365_p6, %s648_s19), 1  ;;  %v383_v0 = vlaneseq }
  0x15   : > { %s565_s5 = sshll.u32 %s768_s20, 2  ;;  %s564_s6 = sshll.u32 %s770_s19, 1 }
  0x16   : > { %s346_s7 = sld [smem:[#allocation3 + %s320_s29]]  ;;  %s369_s8 = sadd.s32 %s565_s5, %s564_s6  ;;  %vm385_vm0 = vcmp.lt.s32.totalorder %v383_v0, 256 }
  0x17   : > { %s559_s9 = sshll.u32 %s768_s20, 4  ;;  %s566_s10 = sshll.u32 %s369_s8, 2 }
  0x18   : > { %s371_s16 = scalar_lea.vmem %s755_s3, %s566_s10  ;;  %s379_s28 = scalar_lea.vmem %s756_s4, %s369_s8 }
  0x19   : > { %p324_p7 = scmp.lt.s32.totalorder %s321_s30, 7 }
  0x1b   : > { %s772_s30 = smov (!%p324_p7, %s321_s30), 7 }
  0x1c   : > { %s558_s11 = sshll.u32 %s772_s30, 1  ;;  %p349_p8 = scmp.lt.s32.totalorder %s346_s7, 7 }
  0x1d   : > { %s328_s12 = sadd.s32 %s559_s9, %s558_s11 }
  0x1e   : > { %s560_s13 = sshll.u32 %s328_s12, 2  ;;  %s774_s7 = smov (!%p349_p8, %s346_s7), 7 }
  0x1f   : > { %s330_s25 = scalar_lea.vmem %s753_s1, %s560_s13  ;;  %s562_s19 = sshll.u32 %s774_s7, 1 }
  0x20   : > { %v380_v1 = vld [vmem:[%s330_s25] sm:$0x77]  ;;  %s353_s20 = sadd.s32 %s562_s19, %s559_s9 }
  0x21   : > { %381 = vst [vmem:[%s371_s16] sm:$0x77] %v380_v1  ;;  %s354_s5 = scalar_lea.vmem %s754_s2, %s353_s20 }
  0x22   : > { %v382_v2 = vld [vmem:[%s354_s5] sm:$0x3] }
  0x23   : > { %387 = vst.msk [vmem:[%s379_s28] sm:$0x3] %vm385_vm0, %v382_v2 }
  0x24 PF: > { %s23_s23 = sadd.s32 1, %s664_s23   ;;  %s757_s19 = smov %s656_s21 }
  0x25   : > { %p20_p9 = scmp.ge.s32.totalorder %s23_s23, 6   ;;  %s758_s20 = smov %s660_s22 }
  0x26   : > { %s759_s21 = smov %s762_s0  ;;  %s760_s22 = smov %s766_s24 }
  0x27   :  { %22 = sbr.rel (!%p20_p9) target bundleno = 9 (0x9), region = 73 }

</bundles_post_ra>
